<compile_context>
chip_gen: v5e
topology: v5e:2x2
jax: 0.10.0
libtpu: 0.0.40
codegen_flags: <defaults>
</compile_context>

<pallas_src>
import functools
import math

import jax
import jax.numpy as jnp
from jax import lax
from jax.experimental import pallas as pl
from jax.experimental.pallas import tpu as pltpu

F32 = jnp.float32
LN_EPS = 1e-5      # GPT2 layer_norm_epsilon
LANE = 128
S_PAD_MIN = 16     # padded in-kernel sequence length (multiple of 8 sublanes)


# ----------------------------- in-kernel helpers -----------------------------

def _layer_norm(x, g, b):
    mu = jnp.mean(x, axis=-1, keepdims=True)
    xc = x - mu
    var = jnp.mean(xc * xc, axis=-1, keepdims=True)
    return xc * lax.rsqrt(var + LN_EPS) * g + b


def _gelu_tanh(x):
    # TODO(synk): torch.nn.GELU() default is exact-erf GELU; GPT2's MLP uses
    # gelu_new (tanh).  Tanh form used for both (no guaranteed Mosaic erf
    # lowering); numerically extremely close.
    c = 0.7978845608028654  # sqrt(2/pi)
    return 0.5 * x * (1.0 + jnp.tanh(c * (x + 0.044715 * x * x * x)))


# ------------------------------ fused Pallas kernel ---------------------------

def meteor_kernel(*refs, n_head, n_layer, chunk_b, s_real, s_pad):
    """Entire Meteor forward for one batch-chunk (grid axis = chunks, parallel).

    Input refs (in order):
      feats(1, chunk_b, 2F), adapter_w(2F,F), adapter_b(1,F), proj_w(F,E),
      proj_b(1,E), base(s_pad,E) [= cat(prompt,0)+wpe, zero-padded rows],
      n_layer x [ln1_g, ln1_b, wqkv, bqkv, wo, bo, ln2_g, ln2_b, wfc, bfc,
                 wpr, bpr],
      lnf_g(1,E), lnf_b(1,E), alpha(1,1), cls_w(E,128), cls_b(1,128)
    Output ref: (1, chunk_b, 128) lane-padded logits.
    """
    (ft_ref, aw_ref, ab_ref, pw_ref, pb_ref, base_ref) = refs[:6]
    blk_refs = refs[6:6 + 12 * n_layer]
    lnfg_ref, lnfb_ref, alpha_ref, cw_ref, cb_ref, out_ref = refs[6 + 12 * n_layer:]

    base = base_ref[...]                                  # (s_pad, E)
    e = base.shape[1]
    d = e // n_head
    inv_sqrt_d = 1.0 / math.sqrt(d)
    r_rows = chunk_b * s_pad

    # ---- adapter (Linear 2F->F + GELU) + feature projection (F->E) ----
    ft = ft_ref[0]                                        # (chunk_b, 2F)
    fused = _gelu_tanh(jnp.dot(ft, aw_ref[...], preferred_element_type=F32)
                       + ab_ref[...])
    fused = (jnp.dot(fused, pw_ref[...], preferred_element_type=F32)
             + pb_ref[...])                               # (chunk_b, E)

    # ---- stacked residual stream (chunk_b * s_pad, E): prompt + fused + wpe ----
    last_row = lax.broadcasted_iota(jnp.int32, (s_pad, e), 0) == (s_real - 1)
    pieces = []
    for i in range(chunk_b):                              # static tiny loop
        fi = jnp.broadcast_to(fused[i:i + 1, :], (s_pad, e))
        pieces.append(base + jnp.where(last_row, fi, 0.0))
    x = pieces[0] if chunk_b == 1 else jnp.concatenate(pieces, axis=0)

    # ---- block-diagonal causal mask over the stacked rows (hoisted once) ----
    ri = lax.broadcasted_iota(jnp.int32, (r_rows, r_rows), 0)
    ci = lax.broadcasted_iota(jnp.int32, (r_rows, r_rows), 1)
    if s_pad & (s_pad - 1) == 0:                          # power of two: bit ops
        shift = int(math.log2(s_pad))
        same_blk = (ri >> shift) == (ci >> shift)
        causal_in = (ci & (s_pad - 1)) <= (ri & (s_pad - 1))
    else:
        same_blk = (ri // s_pad) == (ci // s_pad)
        causal_in = (ci % s_pad) <= (ri % s_pad)
    mask = jnp.logical_and(same_blk, causal_in)
    neg = jnp.float32(-1e30)

    # ---- GPT2 blocks (static unrolled layer loop) ----
    for l in range(n_layer):
        (ln1g, ln1b, wqkv, bqkv, wo, bo,
         ln2g, ln2b, wfc, bfc, wpr, bpr) = blk_refs[12 * l:12 * (l + 1)]

        # attention branch
        xn = _layer_norm(x, ln1g[...], ln1b[...])
        qkv = jnp.dot(xn, wqkv[...], preferred_element_type=F32) + bqkv[...]
        q_all = qkv[:, 0:e] * inv_sqrt_d
        k_all = qkv[:, e:2 * e]
        v_all = qkv[:, 2 * e:3 * e]

        # per-head scores, batched softmax across heads (one XLU/EUP chain)
        sc_parts = []
        for h in range(n_head):                           # static unrolled
            q = q_all[:, h * d:(h + 1) * d]
            k = k_all[:, h * d:(h + 1) * d]
            sc = lax.dot_general(q, k, (((1,), (1,)), ((), ())),
                                 preferred_element_type=F32)
            sc_parts.append(jnp.where(mask, sc, neg))
        sc_all = jnp.concatenate(sc_parts, axis=0)        # (n_head*R, R)
        sc_all = sc_all - jnp.max(sc_all, axis=-1, keepdims=True)
        p_all = jnp.exp(sc_all)
        p_all = p_all * pl.reciprocal(jnp.sum(p_all, axis=-1, keepdims=True),
                                      approx=True)

        head_outs = []
        for h in range(n_head):
            p_h = p_all[h * r_rows:(h + 1) * r_rows, :]   # aligned sublane slice
            v_h = v_all[:, h * d:(h + 1) * d]
            head_outs.append(jnp.dot(p_h, v_h, preferred_element_type=F32))
        o_cat = jnp.concatenate(head_outs, axis=1)        # (R, E)
        x = x + jnp.dot(o_cat, wo[...], preferred_element_type=F32) + bo[...]

        # MLP branch
        h1n = _layer_norm(x, ln2g[...], ln2b[...])
        a = _gelu_tanh(jnp.dot(h1n, wfc[...], preferred_element_type=F32)
                       + bfc[...])
        x = x + jnp.dot(a, wpr[...], preferred_element_type=F32) + bpr[...]

    # ---- ln_f on last two real tokens, alpha blend, classifier ----
    alpha = alpha_ref[...]                                # (1,1), sigmoid in wrapper
    mixes = []
    for i in range(chunk_b):
        rows2 = x[i * s_pad + s_real - 2: i * s_pad + s_real, :]   # (2, E)
        h2 = _layer_norm(rows2, lnfg_ref[...], lnfb_ref[...])
        mixes.append(alpha * h2[1:2, :] + (1.0 - alpha) * h2[0:1, :])
    mix = mixes[0] if chunk_b == 1 else jnp.concatenate(mixes, axis=0)
    out_ref[0] = (jnp.dot(mix, cw_ref[...], preferred_element_type=F32)
                  + cb_ref[...])                          # (chunk_b, 128)


# --------------------------------- wrapper ------------------------------------

def _num_tc_chunks():
    """2 grid chunks on v7x (2 TensorCores/chip); 1 (fully folded) otherwise."""
    try:
        kind = jax.devices()[0].device_kind.lower()
    except Exception:
        kind = ""
    return 2 if ("v7" in kind or "7x" in kind) else 1


def meteor_forward(params, image_embedding, text_embedding, prompt_input_ids,
                   prompt_attention_mask, *, n_head, num_chunks=None):
    # The reference forward never uses prompt_input_ids / prompt_attention_mask.
    del prompt_input_ids, prompt_attention_mask
    b_sz, f_dim = image_embedding.shape
    e = params["proj_w"].shape[1]
    assert e % n_head == 0
    n_prompt = params["prompt"].shape[0]
    s_real = n_prompt + 1
    s_pad = max(S_PAD_MIN, ((s_real + 7) // 8) * 8)
    blocks = params["blocks"]
    n_layer = len(blocks)
    num_classes = params["cls_w"].shape[1]
    c_pad = ((num_classes + LANE - 1) // LANE) * LANE

    if num_chunks is None:
        num_chunks = _num_tc_chunks()
    num_chunks = max(1, min(num_chunks, b_sz))
    chunk_b = -(-b_sz // num_chunks)                      # ceil
    b_pad = num_chunks * chunk_b

    # one-time wrapper glue (tiny XLA ops, outside the kernel)
    feats = jnp.concatenate([image_embedding, text_embedding], axis=1)  # (B, 2F)
    feats = jnp.pad(feats.astype(F32), ((0, b_pad - b_sz), (0, 0)))
    feats = feats.reshape(num_chunks, chunk_b, 2 * f_dim)

    base = params["wpe"][:s_real] + jnp.concatenate(
        [params["prompt"], jnp.zeros((1, e), F32)], axis=0)
    base = jnp.pad(base, ((0, s_pad - s_real), (0, 0)))                 # (s_pad, E)

    alpha = jax.nn.sigmoid(params["scale"]).reshape(1, 1).astype(F32)
    cls_w = jnp.pad(params["cls_w"], ((0, 0), (0, c_pad - num_classes)))
    cls_b = jnp.pad(params["cls_b"], ((0, 0), (0, c_pad - num_classes)))

    kernel = functools.partial(meteor_kernel, n_head=n_head, n_layer=n_layer,
                               chunk_b=chunk_b, s_real=s_real, s_pad=s_pad)

    def whole(a):
        nd = a.ndim
        return pl.BlockSpec(a.shape, lambda c, _nd=nd: (0,) * _nd)

    block_arrays = []
    for blk in blocks:
        block_arrays += [blk["ln1_g"], blk["ln1_b"], blk["wqkv"], blk["bqkv"],
                         blk["wo"], blk["bo"], blk["ln2_g"], blk["ln2_b"],
                         blk["wfc"], blk["bfc"], blk["wpr"], blk["bpr"]]

    weight_arrays = ([params["adapter_w"], params["adapter_b"],
                      params["proj_w"], params["proj_b"], base]
                     + block_arrays
                     + [params["lnf_g"], params["lnf_b"], alpha, cls_w, cls_b])

    in_specs = ([pl.BlockSpec((1, chunk_b, 2 * f_dim), lambda c: (c, 0, 0))]
                + [whole(a) for a in weight_arrays])

    out = pl.pallas_call(
        kernel,
        grid=(num_chunks,),
        in_specs=in_specs,
        out_specs=pl.BlockSpec((1, chunk_b, c_pad), lambda c: (c, 0, 0)),
        out_shape=jax.ShapeDtypeStruct((num_chunks, chunk_b, c_pad), F32),
        compiler_params=pltpu.CompilerParams(dimension_semantics=("parallel",)),
    )(feats, *weight_arrays)

    out = out.reshape(num_chunks * chunk_b, c_pad)
    return out[:b_sz, :num_classes]


# ------------------------------- parameter init -------------------------------

def init_params(key, *, img_dim, n_embd, n_layer, n_head, n_positions, n_prompt,
                num_classes):
    del n_head
    keys = jax.random.split(key, 6 + n_layer)

    def dense(k, shape, std=0.02):
        return (std * jax.random.normal(k, shape)).astype(F32)

    p = {}
    p["adapter_w"] = dense(keys[0], (2 * img_dim, img_dim))
    p["adapter_b"] = jnp.zeros((1, img_dim), F32)
    p["proj_w"] = dense(keys[1], (img_dim, n_embd))
    p["proj_b"] = jnp.zeros((1, n_embd), F32)
    lim = math.sqrt(6.0 / (n_prompt + n_embd))                  # xavier_uniform
    p["prompt"] = jax.random.uniform(keys[2], (n_prompt, n_embd), F32, -lim, lim)
    p["wpe"] = dense(keys[3], (n_positions, n_embd))
    p["scale"] = jnp.zeros((1, 1), F32)                         # nn.init.zeros_
    p["cls_w"] = dense(keys[4], (n_embd, num_classes))
    p["cls_b"] = jnp.zeros((1, num_classes), F32)
    p["lnf_g"] = jnp.ones((1, n_embd), F32)
    p["lnf_b"] = jnp.zeros((1, n_embd), F32)

    blocks = []
    for l in range(n_layer):
        kk = jax.random.split(keys[5 + l], 4)
        blocks.append(dict(
            ln1_g=jnp.ones((1, n_embd), F32),
            ln1_b=jnp.zeros((1, n_embd), F32),
            wqkv=dense(kk[0], (n_embd, 3 * n_embd)),
            bqkv=jnp.zeros((1, 3 * n_embd), F32),
            wo=dense(kk[1], (n_embd, n_embd)),
            bo=jnp.zeros((1, n_embd), F32),
            ln2_g=jnp.ones((1, n_embd), F32),
            ln2_b=jnp.zeros((1, n_embd), F32),
            wfc=dense(kk[2], (n_embd, 4 * n_embd)),
            bfc=jnp.zeros((1, 4 * n_embd), F32),
            wpr=dense(kk[3], (4 * n_embd, n_embd)),
            bpr=jnp.zeros((1, n_embd), F32)))
    p["blocks"] = blocks
    return p


# ------------------------------------ main -------------------------------------

if __name__ == "__main__":
    B = 2
    IMG_DIM = 32          # img_feature_dim (small synthetic config)
    N_EMBD = 32           # gpt2 n_embd
    N_HEAD = 4
    N_LAYER = 2
    N_PROMPT = 10         # prompt_embedding rows
    N_POS = 32            # gpt2 n_positions (>= 11)
    NUM_CLASSES = 2

    key = jax.random.PRNGKey(0)
    kp, k1, k2, k3 = jax.random.split(key, 4)
    params = init_params(kp, img_dim=IMG_DIM, n_embd=N_EMBD, n_layer=N_LAYER,
                         n_head=N_HEAD, n_positions=N_POS, n_prompt=N_PROMPT,
                         num_classes=NUM_CLASSES)

    image_embedding = jax.random.normal(k1, (B, IMG_DIM), F32)
    text_embedding = jax.random.normal(k2, (B, IMG_DIM), F32)
    prompt_input_ids = jax.random.randint(k3, (B, N_PROMPT), 0, 100)
    prompt_attention_mask = jnp.ones((B, N_PROMPT), jnp.int32)

    logits = meteor_forward(params, image_embedding, text_embedding,
                            prompt_input_ids, prompt_attention_mask,
                            n_head=N_HEAD)
    jax.block_until_ready(logits)
    assert logits.shape == (B, NUM_CLASSES) and logits.dtype == F32
    assert bool(jnp.all(jnp.isfinite(logits)))
    print("KERNEL_OK")
</pallas_src>

<mosaic_0001>
module attributes {stable_mosaic.version = 11 : i64} {
  func.func @meteor_kernel(%arg0: i32, %arg1: memref<1x2x64xf32, #tpu.memory_space<vmem>>, %arg2: memref<64x32xf32, #tpu.memory_space<vmem>>, %arg3: memref<1x32xf32, #tpu.memory_space<vmem>>, %arg4: memref<32x32xf32, #tpu.memory_space<vmem>>, %arg5: memref<1x32xf32, #tpu.memory_space<vmem>>, %arg6: memref<16x32xf32, #tpu.memory_space<vmem>>, %arg7: memref<1x32xf32, #tpu.memory_space<vmem>>, %arg8: memref<1x32xf32, #tpu.memory_space<vmem>>, %arg9: memref<32x96xf32, #tpu.memory_space<vmem>>, %arg10: memref<1x96xf32, #tpu.memory_space<vmem>>, %arg11: memref<32x32xf32, #tpu.memory_space<vmem>>, %arg12: memref<1x32xf32, #tpu.memory_space<vmem>>, %arg13: memref<1x32xf32, #tpu.memory_space<vmem>>, %arg14: memref<1x32xf32, #tpu.memory_space<vmem>>, %arg15: memref<32x128xf32, #tpu.memory_space<vmem>>, %arg16: memref<1x128xf32, #tpu.memory_space<vmem>>, %arg17: memref<128x32xf32, #tpu.memory_space<vmem>>, %arg18: memref<1x32xf32, #tpu.memory_space<vmem>>, %arg19: memref<1x32xf32, #tpu.memory_space<vmem>>, %arg20: memref<1x32xf32, #tpu.memory_space<vmem>>, %arg21: memref<32x96xf32, #tpu.memory_space<vmem>>, %arg22: memref<1x96xf32, #tpu.memory_space<vmem>>, %arg23: memref<32x32xf32, #tpu.memory_space<vmem>>, %arg24: memref<1x32xf32, #tpu.memory_space<vmem>>, %arg25: memref<1x32xf32, #tpu.memory_space<vmem>>, %arg26: memref<1x32xf32, #tpu.memory_space<vmem>>, %arg27: memref<32x128xf32, #tpu.memory_space<vmem>>, %arg28: memref<1x128xf32, #tpu.memory_space<vmem>>, %arg29: memref<128x32xf32, #tpu.memory_space<vmem>>, %arg30: memref<1x32xf32, #tpu.memory_space<vmem>>, %arg31: memref<1x32xf32, #tpu.memory_space<vmem>>, %arg32: memref<1x32xf32, #tpu.memory_space<vmem>>, %arg33: memref<1x1xf32, #tpu.memory_space<vmem>>, %arg34: memref<32x128xf32, #tpu.memory_space<vmem>>, %arg35: memref<1x128xf32, #tpu.memory_space<vmem>>, %arg36: memref<1x2x128xf32, #tpu.memory_space<vmem>>) attributes {dimension_semantics = [#tpu.dimension_semantics<parallel>], iteration_bounds = array<i64: 1>, scalar_prefetch = 0 : i64, scratch_operands = 0 : i64, tpu.core_type = #tpu.core_type<tc>, window_params = [{transform_indices = @transform_0, window_bounds = array<i64: 1, 2, 64>}, {pipeline_mode = #tpu.pipeline_mode<synchronous>, transform_indices = @transform_1, window_bounds = array<i64: 64, 32>}, {pipeline_mode = #tpu.pipeline_mode<synchronous>, transform_indices = @transform_2, window_bounds = array<i64: 1, 32>}, {pipeline_mode = #tpu.pipeline_mode<synchronous>, transform_indices = @transform_3, window_bounds = array<i64: 32, 32>}, {pipeline_mode = #tpu.pipeline_mode<synchronous>, transform_indices = @transform_4, window_bounds = array<i64: 1, 32>}, {pipeline_mode = #tpu.pipeline_mode<synchronous>, transform_indices = @transform_5, window_bounds = array<i64: 16, 32>}, {pipeline_mode = #tpu.pipeline_mode<synchronous>, transform_indices = @transform_6, window_bounds = array<i64: 1, 32>}, {pipeline_mode = #tpu.pipeline_mode<synchronous>, transform_indices = @transform_7, window_bounds = array<i64: 1, 32>}, {pipeline_mode = #tpu.pipeline_mode<synchronous>, transform_indices = @transform_8, window_bounds = array<i64: 32, 96>}, {pipeline_mode = #tpu.pipeline_mode<synchronous>, transform_indices = @transform_9, window_bounds = array<i64: 1, 96>}, {pipeline_mode = #tpu.pipeline_mode<synchronous>, transform_indices = @transform_10, window_bounds = array<i64: 32, 32>}, {pipeline_mode = #tpu.pipeline_mode<synchronous>, transform_indices = @transform_11, window_bounds = array<i64: 1, 32>}, {pipeline_mode = #tpu.pipeline_mode<synchronous>, transform_indices = @transform_12, window_bounds = array<i64: 1, 32>}, {pipeline_mode = #tpu.pipeline_mode<synchronous>, transform_indices = @transform_13, window_bounds = array<i64: 1, 32>}, {pipeline_mode = #tpu.pipeline_mode<synchronous>, transform_indices = @transform_14, window_bounds = array<i64: 32, 128>}, {pipeline_mode = #tpu.pipeline_mode<synchronous>, transform_indices = @transform_15, window_bounds = array<i64: 1, 128>}, {pipeline_mode = #tpu.pipeline_mode<synchronous>, transform_indices = @transform_16, window_bounds = array<i64: 128, 32>}, {pipeline_mode = #tpu.pipeline_mode<synchronous>, transform_indices = @transform_17, window_bounds = array<i64: 1, 32>}, {pipeline_mode = #tpu.pipeline_mode<synchronous>, transform_indices = @transform_18, window_bounds = array<i64: 1, 32>}, {pipeline_mode = #tpu.pipeline_mode<synchronous>, transform_indices = @transform_19, window_bounds = array<i64: 1, 32>}, {pipeline_mode = #tpu.pipeline_mode<synchronous>, transform_indices = @transform_20, window_bounds = array<i64: 32, 96>}, {pipeline_mode = #tpu.pipeline_mode<synchronous>, transform_indices = @transform_21, window_bounds = array<i64: 1, 96>}, {pipeline_mode = #tpu.pipeline_mode<synchronous>, transform_indices = @transform_22, window_bounds = array<i64: 32, 32>}, {pipeline_mode = #tpu.pipeline_mode<synchronous>, transform_indices = @transform_23, window_bounds = array<i64: 1, 32>}, {pipeline_mode = #tpu.pipeline_mode<synchronous>, transform_indices = @transform_24, window_bounds = array<i64: 1, 32>}, {pipeline_mode = #tpu.pipeline_mode<synchronous>, transform_indices = @transform_25, window_bounds = array<i64: 1, 32>}, {pipeline_mode = #tpu.pipeline_mode<synchronous>, transform_indices = @transform_26, window_bounds = array<i64: 32, 128>}, {pipeline_mode = #tpu.pipeline_mode<synchronous>, transform_indices = @transform_27, window_bounds = array<i64: 1, 128>}, {pipeline_mode = #tpu.pipeline_mode<synchronous>, transform_indices = @transform_28, window_bounds = array<i64: 128, 32>}, {pipeline_mode = #tpu.pipeline_mode<synchronous>, transform_indices = @transform_29, window_bounds = array<i64: 1, 32>}, {pipeline_mode = #tpu.pipeline_mode<synchronous>, transform_indices = @transform_30, window_bounds = array<i64: 1, 32>}, {pipeline_mode = #tpu.pipeline_mode<synchronous>, transform_indices = @transform_31, window_bounds = array<i64: 1, 32>}, {pipeline_mode = #tpu.pipeline_mode<synchronous>, transform_indices = @transform_32, window_bounds = array<i64: 1, 1>}, {pipeline_mode = #tpu.pipeline_mode<synchronous>, transform_indices = @transform_33, window_bounds = array<i64: 32, 128>}, {pipeline_mode = #tpu.pipeline_mode<synchronous>, transform_indices = @transform_34, window_bounds = array<i64: 1, 128>}, {transform_indices = @transform_35, window_bounds = array<i64: 1, 2, 128>}]} {
    %c0 = arith.constant 0 : index
    %c0_0 = arith.constant 0 : index
    %0 = vector.load %arg6[%c0, %c0_0] : memref<16x32xf32, #tpu.memory_space<vmem>>, vector<16x32xf32>
    %c0_1 = arith.constant 0 : index
    %c0_2 = arith.constant 0 : index
    %c0_3 = arith.constant 0 : index
    %1 = vector.load %arg1[%c0_1, %c0_2, %c0_3] : memref<1x2x64xf32, #tpu.memory_space<vmem>>, vector<1x2x64xf32>
    %2 = vector.shape_cast %1 : vector<1x2x64xf32> to vector<2x64xf32>
    %c0_4 = arith.constant 0 : index
    %c0_5 = arith.constant 0 : index
    %3 = vector.load %arg2[%c0_4, %c0_5] : memref<64x32xf32, #tpu.memory_space<vmem>>, vector<64x32xf32>
    %cst = arith.constant dense<0.000000e+00> : vector<2x32xf32>
    %4 = tpu.matmul %2, %3, %cst {dimension_numbers = #tpu.dot_dimension_numbers<[1], [0], [0], [1], [0, 0, 1, 1], [], []>} : vector<2x64xf32>, vector<64x32xf32>, vector<2x32xf32> -> vector<2x32xf32>
    %c0_6 = arith.constant 0 : index
    %c0_7 = arith.constant 0 : index
    %5 = vector.load %arg3[%c0_6, %c0_7] : memref<1x32xf32, #tpu.memory_space<vmem>>, vector<1x32xf32>
    %6 = vector.broadcast %5 : vector<1x32xf32> to vector<2x32xf32>
    %7 = arith.addf %4, %6 : vector<2x32xf32>
    %cst_8 = arith.constant 5.000000e-01 : f32
    %8 = vector.broadcast %cst_8 : f32 to vector<2x32xf32>
    %9 = arith.mulf %8, %7 : vector<2x32xf32>
    %cst_9 = arith.constant 4.471500e-02 : f32
    %10 = vector.broadcast %cst_9 : f32 to vector<2x32xf32>
    %11 = arith.mulf %10, %7 : vector<2x32xf32>
    %12 = arith.mulf %11, %7 : vector<2x32xf32>
    %13 = arith.mulf %12, %7 : vector<2x32xf32>
    %14 = arith.addf %7, %13 : vector<2x32xf32>
    %cst_10 = arith.constant 0.797884583 : f32
    %15 = vector.broadcast %cst_10 : f32 to vector<2x32xf32>
    %16 = arith.mulf %15, %14 : vector<2x32xf32>
    %17 = math.tanh %16 : vector<2x32xf32>
    %cst_11 = arith.constant 1.000000e+00 : f32
    %18 = vector.broadcast %cst_11 : f32 to vector<2x32xf32>
    %19 = arith.addf %18, %17 : vector<2x32xf32>
    %20 = arith.mulf %9, %19 : vector<2x32xf32>
    %c0_12 = arith.constant 0 : index
    %c0_13 = arith.constant 0 : index
    %21 = vector.load %arg4[%c0_12, %c0_13] : memref<32x32xf32, #tpu.memory_space<vmem>>, vector<32x32xf32>
    %cst_14 = arith.constant dense<0.000000e+00> : vector<2x32xf32>
    %22 = tpu.matmul %20, %21, %cst_14 {dimension_numbers = #tpu.dot_dimension_numbers<[1], [0], [0], [1], [0, 0, 1, 1], [], []>} : vector<2x32xf32>, vector<32x32xf32>, vector<2x32xf32> -> vector<2x32xf32>
    %c0_15 = arith.constant 0 : index
    %c0_16 = arith.constant 0 : index
    %23 = vector.load %arg5[%c0_15, %c0_16] : memref<1x32xf32, #tpu.memory_space<vmem>>, vector<1x32xf32>
    %24 = vector.broadcast %23 : vector<1x32xf32> to vector<2x32xf32>
    %25 = arith.addf %22, %24 : vector<2x32xf32>
    %26 = tpu.iota {dimensions = array<i32: 0>} : vector<16x32xi32>
    %c10_i32 = arith.constant 10 : i32
    %27 = vector.broadcast %c10_i32 : i32 to vector<16x32xi32>
    %28 = arith.cmpi eq, %26, %27 : vector<16x32xi32>
    %29 = vector.extract_strided_slice %25 {offsets = [0, 0], sizes = [1, 32], strides = [1, 1]} : vector<2x32xf32> to vector<1x32xf32>
    %30 = vector.shape_cast %29 : vector<1x32xf32> to vector<1x32xf32>
    %31 = vector.broadcast %30 : vector<1x32xf32> to vector<16x32xf32>
    %cst_17 = arith.constant 0.000000e+00 : f32
    %32 = vector.broadcast %cst_17 : f32 to vector<16x32xf32>
    %33 = arith.select %28, %31, %32 : vector<16x32xi1>, vector<16x32xf32>
    %34 = arith.addf %0, %33 : vector<16x32xf32>
    %35 = vector.extract_strided_slice %25 {offsets = [1, 0], sizes = [1, 32], strides = [1, 1]} : vector<2x32xf32> to vector<1x32xf32>
    %36 = vector.shape_cast %35 : vector<1x32xf32> to vector<1x32xf32>
    %37 = vector.broadcast %36 : vector<1x32xf32> to vector<16x32xf32>
    %cst_18 = arith.constant 0.000000e+00 : f32
    %38 = vector.broadcast %cst_18 : f32 to vector<16x32xf32>
    %39 = arith.select %28, %37, %38 : vector<16x32xi1>, vector<16x32xf32>
    %40 = arith.addf %0, %39 : vector<16x32xf32>
    %41 = tpu.concatenate %34, %40 in 0 : vector<16x32xf32>, vector<16x32xf32> -> vector<32x32xf32>
    %42 = tpu.iota {dimensions = array<i32: 0>} : vector<32x32xi32>
    %43 = tpu.iota {dimensions = array<i32: 1>} : vector<32x32xi32>
    %c4_i32 = arith.constant 4 : i32
    %44 = vector.broadcast %c4_i32 : i32 to vector<32x32xi32>
    %45 = arith.shrsi %42, %44 : vector<32x32xi32>
    %c4_i32_19 = arith.constant 4 : i32
    %46 = vector.broadcast %c4_i32_19 : i32 to vector<32x32xi32>
    %47 = arith.shrsi %43, %46 : vector<32x32xi32>
    %48 = arith.cmpi eq, %45, %47 : vector<32x32xi32>
    %c15_i32 = arith.constant 15 : i32
    %49 = vector.broadcast %c15_i32 : i32 to vector<32x32xi32>
    %50 = arith.andi %43, %49 : vector<32x32xi32>
    %c15_i32_20 = arith.constant 15 : i32
    %51 = vector.broadcast %c15_i32_20 : i32 to vector<32x32xi32>
    %52 = arith.andi %42, %51 : vector<32x32xi32>
    %53 = arith.cmpi sle, %50, %52 : vector<32x32xi32>
    %54 = arith.andi %48, %53 : vector<32x32xi1>
    %c0_21 = arith.constant 0 : index
    %c0_22 = arith.constant 0 : index
    %55 = vector.load %arg7[%c0_21, %c0_22] : memref<1x32xf32, #tpu.memory_space<vmem>>, vector<1x32xf32>
    %c0_23 = arith.constant 0 : index
    %c0_24 = arith.constant 0 : index
    %56 = vector.load %arg8[%c0_23, %c0_24] : memref<1x32xf32, #tpu.memory_space<vmem>>, vector<1x32xf32>
    %cst_25 = arith.constant dense<0.000000e+00> : vector<32xf32>
    %57 = vector.multi_reduction <add>, %41, %cst_25 [1] : vector<32x32xf32> to vector<32xf32>
    %58 = vector.shape_cast %57 : vector<32xf32> to vector<32x1xf32>
    %cst_26 = arith.constant 3.200000e+01 : f32
    %59 = vector.broadcast %cst_26 : f32 to vector<32x1xf32>
    %60 = arith.divf %58, %59 : vector<32x1xf32>
    %61 = vector.broadcast %60 : vector<32x1xf32> to vector<32x32xf32>
    %62 = arith.subf %41, %61 : vector<32x32xf32>
    %63 = arith.mulf %62, %62 : vector<32x32xf32>
    %cst_27 = arith.constant dense<0.000000e+00> : vector<32xf32>
    %64 = vector.multi_reduction <add>, %63, %cst_27 [1] : vector<32x32xf32> to vector<32xf32>
    %65 = vector.shape_cast %64 : vector<32xf32> to vector<32x1xf32>
    %cst_28 = arith.constant 3.200000e+01 : f32
    %66 = vector.broadcast %cst_28 : f32 to vector<32x1xf32>
    %67 = arith.divf %65, %66 : vector<32x1xf32>
    %cst_29 = arith.constant 9.99999974E-6 : f32
    %68 = vector.broadcast %cst_29 : f32 to vector<32x1xf32>
    %69 = arith.addf %67, %68 : vector<32x1xf32>
    %70 = math.rsqrt %69 : vector<32x1xf32>
    %71 = vector.broadcast %70 : vector<32x1xf32> to vector<32x32xf32>
    %72 = arith.mulf %62, %71 : vector<32x32xf32>
    %73 = vector.broadcast %55 : vector<1x32xf32> to vector<32x32xf32>
    %74 = arith.mulf %72, %73 : vector<32x32xf32>
    %75 = vector.broadcast %56 : vector<1x32xf32> to vector<32x32xf32>
    %76 = arith.addf %74, %75 : vector<32x32xf32>
    %c0_30 = arith.constant 0 : index
    %c0_31 = arith.constant 0 : index
    %77 = vector.load %arg9[%c0_30, %c0_31] : memref<32x96xf32, #tpu.memory_space<vmem>>, vector<32x96xf32>
    %cst_32 = arith.constant dense<0.000000e+00> : vector<32x96xf32>
    %78 = tpu.matmul %76, %77, %cst_32 {dimension_numbers = #tpu.dot_dimension_numbers<[1], [0], [0], [1], [0, 0, 1, 1], [], []>} : vector<32x32xf32>, vector<32x96xf32>, vector<32x96xf32> -> vector<32x96xf32>
    %c0_33 = arith.constant 0 : index
    %c0_34 = arith.constant 0 : index
    %79 = vector.load %arg10[%c0_33, %c0_34] : memref<1x96xf32, #tpu.memory_space<vmem>>, vector<1x96xf32>
    %80 = vector.broadcast %79 : vector<1x96xf32> to vector<32x96xf32>
    %81 = arith.addf %78, %80 : vector<32x96xf32>
    %82 = vector.extract_strided_slice %81 {offsets = [0, 0], sizes = [32, 32], strides = [1, 1]} : vector<32x96xf32> to vector<32x32xf32>
    %cst_35 = arith.constant 0.353553385 : f32
    %83 = vector.broadcast %cst_35 : f32 to vector<32x32xf32>
    %84 = arith.mulf %82, %83 : vector<32x32xf32>
    %85 = vector.extract_strided_slice %81 {offsets = [0, 32], sizes = [32, 32], strides = [1, 1]} : vector<32x96xf32> to vector<32x32xf32>
    %86 = vector.extract_strided_slice %81 {offsets = [0, 64], sizes = [32, 32], strides = [1, 1]} : vector<32x96xf32> to vector<32x32xf32>
    %87 = vector.extract_strided_slice %84 {offsets = [0, 0], sizes = [32, 8], strides = [1, 1]} : vector<32x32xf32> to vector<32x8xf32>
    %88 = vector.extract_strided_slice %85 {offsets = [0, 0], sizes = [32, 8], strides = [1, 1]} : vector<32x32xf32> to vector<32x8xf32>
    %cst_36 = arith.constant dense<0.000000e+00> : vector<32x32xf32>
    %89 = tpu.matmul %87, %88, %cst_36 {dimension_numbers = #tpu.dot_dimension_numbers<[1], [1], [0], [0], [0, 0, 1, 0], [], []>} : vector<32x8xf32>, vector<32x8xf32>, vector<32x32xf32> -> vector<32x32xf32>
    %cst_37 = arith.constant -1.000000e+30 : f32
    %90 = vector.broadcast %cst_37 : f32 to vector<32x32xf32>
    %91 = arith.select %54, %89, %90 : vector<32x32xi1>, vector<32x32xf32>
    %92 = vector.extract_strided_slice %84 {offsets = [0, 8], sizes = [32, 8], strides = [1, 1]} : vector<32x32xf32> to vector<32x8xf32>
    %93 = vector.extract_strided_slice %85 {offsets = [0, 8], sizes = [32, 8], strides = [1, 1]} : vector<32x32xf32> to vector<32x8xf32>
    %cst_38 = arith.constant dense<0.000000e+00> : vector<32x32xf32>
    %94 = tpu.matmul %92, %93, %cst_38 {dimension_numbers = #tpu.dot_dimension_numbers<[1], [1], [0], [0], [0, 0, 1, 0], [], []>} : vector<32x8xf32>, vector<32x8xf32>, vector<32x32xf32> -> vector<32x32xf32>
    %cst_39 = arith.constant -1.000000e+30 : f32
    %95 = vector.broadcast %cst_39 : f32 to vector<32x32xf32>
    %96 = arith.select %54, %94, %95 : vector<32x32xi1>, vector<32x32xf32>
    %97 = vector.extract_strided_slice %84 {offsets = [0, 16], sizes = [32, 8], strides = [1, 1]} : vector<32x32xf32> to vector<32x8xf32>
    %98 = vector.extract_strided_slice %85 {offsets = [0, 16], sizes = [32, 8], strides = [1, 1]} : vector<32x32xf32> to vector<32x8xf32>
    %cst_40 = arith.constant dense<0.000000e+00> : vector<32x32xf32>
    %99 = tpu.matmul %97, %98, %cst_40 {dimension_numbers = #tpu.dot_dimension_numbers<[1], [1], [0], [0], [0, 0, 1, 0], [], []>} : vector<32x8xf32>, vector<32x8xf32>, vector<32x32xf32> -> vector<32x32xf32>
    %cst_41 = arith.constant -1.000000e+30 : f32
    %100 = vector.broadcast %cst_41 : f32 to vector<32x32xf32>
    %101 = arith.select %54, %99, %100 : vector<32x32xi1>, vector<32x32xf32>
    %102 = vector.extract_strided_slice %84 {offsets = [0, 24], sizes = [32, 8], strides = [1, 1]} : vector<32x32xf32> to vector<32x8xf32>
    %103 = vector.extract_strided_slice %85 {offsets = [0, 24], sizes = [32, 8], strides = [1, 1]} : vector<32x32xf32> to vector<32x8xf32>
    %cst_42 = arith.constant dense<0.000000e+00> : vector<32x32xf32>
    %104 = tpu.matmul %102, %103, %cst_42 {dimension_numbers = #tpu.dot_dimension_numbers<[1], [1], [0], [0], [0, 0, 1, 0], [], []>} : vector<32x8xf32>, vector<32x8xf32>, vector<32x32xf32> -> vector<32x32xf32>
    %cst_43 = arith.constant -1.000000e+30 : f32
    %105 = vector.broadcast %cst_43 : f32 to vector<32x32xf32>
    %106 = arith.select %54, %104, %105 : vector<32x32xi1>, vector<32x32xf32>
    %107 = tpu.concatenate %91, %96, %101, %106 in 0 : vector<32x32xf32>, vector<32x32xf32>, vector<32x32xf32>, vector<32x32xf32> -> vector<128x32xf32>
    %cst_44 = arith.constant dense<0xFF800000> : vector<128xf32>
    %108 = vector.multi_reduction <maximumf>, %107, %cst_44 [1] : vector<128x32xf32> to vector<128xf32>
    %109 = vector.shape_cast %108 : vector<128xf32> to vector<128x1xf32>
    %110 = vector.broadcast %109 : vector<128x1xf32> to vector<128x32xf32>
    %111 = arith.subf %107, %110 : vector<128x32xf32>
    %112 = math.exp %111 : vector<128x32xf32>
    %cst_45 = arith.constant dense<0.000000e+00> : vector<128xf32>
    %113 = vector.multi_reduction <add>, %112, %cst_45 [1] : vector<128x32xf32> to vector<128xf32>
    %114 = vector.shape_cast %113 : vector<128xf32> to vector<128x1xf32>
    %115 = tpu.reciprocal %114 {approx = true} : vector<128x1xf32> -> vector<128x1xf32>
    %116 = vector.broadcast %115 : vector<128x1xf32> to vector<128x32xf32>
    %117 = arith.mulf %112, %116 : vector<128x32xf32>
    %118 = vector.extract_strided_slice %117 {offsets = [0, 0], sizes = [32, 32], strides = [1, 1]} : vector<128x32xf32> to vector<32x32xf32>
    %119 = vector.extract_strided_slice %86 {offsets = [0, 0], sizes = [32, 8], strides = [1, 1]} : vector<32x32xf32> to vector<32x8xf32>
    %cst_46 = arith.constant dense<0.000000e+00> : vector<32x8xf32>
    %120 = tpu.matmul %118, %119, %cst_46 {dimension_numbers = #tpu.dot_dimension_numbers<[1], [0], [0], [1], [0, 0, 1, 1], [], []>} : vector<32x32xf32>, vector<32x8xf32>, vector<32x8xf32> -> vector<32x8xf32>
    %121 = vector.extract_strided_slice %117 {offsets = [32, 0], sizes = [32, 32], strides = [1, 1]} : vector<128x32xf32> to vector<32x32xf32>
    %122 = vector.extract_strided_slice %86 {offsets = [0, 8], sizes = [32, 8], strides = [1, 1]} : vector<32x32xf32> to vector<32x8xf32>
    %cst_47 = arith.constant dense<0.000000e+00> : vector<32x8xf32>
    %123 = tpu.matmul %121, %122, %cst_47 {dimension_numbers = #tpu.dot_dimension_numbers<[1], [0], [0], [1], [0, 0, 1, 1], [], []>} : vector<32x32xf32>, vector<32x8xf32>, vector<32x8xf32> -> vector<32x8xf32>
    %124 = vector.extract_strided_slice %117 {offsets = [64, 0], sizes = [32, 32], strides = [1, 1]} : vector<128x32xf32> to vector<32x32xf32>
    %125 = vector.extract_strided_slice %86 {offsets = [0, 16], sizes = [32, 8], strides = [1, 1]} : vector<32x32xf32> to vector<32x8xf32>
    %cst_48 = arith.constant dense<0.000000e+00> : vector<32x8xf32>
    %126 = tpu.matmul %124, %125, %cst_48 {dimension_numbers = #tpu.dot_dimension_numbers<[1], [0], [0], [1], [0, 0, 1, 1], [], []>} : vector<32x32xf32>, vector<32x8xf32>, vector<32x8xf32> -> vector<32x8xf32>
    %127 = vector.extract_strided_slice %117 {offsets = [96, 0], sizes = [32, 32], strides = [1, 1]} : vector<128x32xf32> to vector<32x32xf32>
    %128 = vector.extract_strided_slice %86 {offsets = [0, 24], sizes = [32, 8], strides = [1, 1]} : vector<32x32xf32> to vector<32x8xf32>
    %cst_49 = arith.constant dense<0.000000e+00> : vector<32x8xf32>
    %129 = tpu.matmul %127, %128, %cst_49 {dimension_numbers = #tpu.dot_dimension_numbers<[1], [0], [0], [1], [0, 0, 1, 1], [], []>} : vector<32x32xf32>, vector<32x8xf32>, vector<32x8xf32> -> vector<32x8xf32>
    %130 = tpu.concatenate %120, %123, %126, %129 in 1 : vector<32x8xf32>, vector<32x8xf32>, vector<32x8xf32>, vector<32x8xf32> -> vector<32x32xf32>
    %c0_50 = arith.constant 0 : index
    %c0_51 = arith.constant 0 : index
    %131 = vector.load %arg11[%c0_50, %c0_51] : memref<32x32xf32, #tpu.memory_space<vmem>>, vector<32x32xf32>
    %cst_52 = arith.constant dense<0.000000e+00> : vector<32x32xf32>
    %132 = tpu.matmul %130, %131, %cst_52 {dimension_numbers = #tpu.dot_dimension_numbers<[1], [0], [0], [1], [0, 0, 1, 1], [], []>} : vector<32x32xf32>, vector<32x32xf32>, vector<32x32xf32> -> vector<32x32xf32>
    %133 = arith.addf %41, %132 : vector<32x32xf32>
    %c0_53 = arith.constant 0 : index
    %c0_54 = arith.constant 0 : index
    %134 = vector.load %arg12[%c0_53, %c0_54] : memref<1x32xf32, #tpu.memory_space<vmem>>, vector<1x32xf32>
    %135 = vector.broadcast %134 : vector<1x32xf32> to vector<32x32xf32>
    %136 = arith.addf %133, %135 : vector<32x32xf32>
    %c0_55 = arith.constant 0 : index
    %c0_56 = arith.constant 0 : index
    %137 = vector.load %arg13[%c0_55, %c0_56] : memref<1x32xf32, #tpu.memory_space<vmem>>, vector<1x32xf32>
    %c0_57 = arith.constant 0 : index
    %c0_58 = arith.constant 0 : index
    %138 = vector.load %arg14[%c0_57, %c0_58] : memref<1x32xf32, #tpu.memory_space<vmem>>, vector<1x32xf32>
    %cst_59 = arith.constant dense<0.000000e+00> : vector<32xf32>
    %139 = vector.multi_reduction <add>, %136, %cst_59 [1] : vector<32x32xf32> to vector<32xf32>
    %140 = vector.shape_cast %139 : vector<32xf32> to vector<32x1xf32>
    %cst_60 = arith.constant 3.200000e+01 : f32
    %141 = vector.broadcast %cst_60 : f32 to vector<32x1xf32>
    %142 = arith.divf %140, %141 : vector<32x1xf32>
    %143 = vector.broadcast %142 : vector<32x1xf32> to vector<32x32xf32>
    %144 = arith.subf %136, %143 : vector<32x32xf32>
    %145 = arith.mulf %144, %144 : vector<32x32xf32>
    %cst_61 = arith.constant dense<0.000000e+00> : vector<32xf32>
    %146 = vector.multi_reduction <add>, %145, %cst_61 [1] : vector<32x32xf32> to vector<32xf32>
    %147 = vector.shape_cast %146 : vector<32xf32> to vector<32x1xf32>
    %cst_62 = arith.constant 3.200000e+01 : f32
    %148 = vector.broadcast %cst_62 : f32 to vector<32x1xf32>
    %149 = arith.divf %147, %148 : vector<32x1xf32>
    %cst_63 = arith.constant 9.99999974E-6 : f32
    %150 = vector.broadcast %cst_63 : f32 to vector<32x1xf32>
    %151 = arith.addf %149, %150 : vector<32x1xf32>
    %152 = math.rsqrt %151 : vector<32x1xf32>
    %153 = vector.broadcast %152 : vector<32x1xf32> to vector<32x32xf32>
    %154 = arith.mulf %144, %153 : vector<32x32xf32>
    %155 = vector.broadcast %137 : vector<1x32xf32> to vector<32x32xf32>
    %156 = arith.mulf %154, %155 : vector<32x32xf32>
    %157 = vector.broadcast %138 : vector<1x32xf32> to vector<32x32xf32>
    %158 = arith.addf %156, %157 : vector<32x32xf32>
    %c0_64 = arith.constant 0 : index
    %c0_65 = arith.constant 0 : index
    %159 = vector.load %arg15[%c0_64, %c0_65] : memref<32x128xf32, #tpu.memory_space<vmem>>, vector<32x128xf32>
    %cst_66 = arith.constant dense<0.000000e+00> : vector<32x128xf32>
    %160 = tpu.matmul %158, %159, %cst_66 {dimension_numbers = #tpu.dot_dimension_numbers<[1], [0], [0], [1], [0, 0, 1, 1], [], []>} : vector<32x32xf32>, vector<32x128xf32>, vector<32x128xf32> -> vector<32x128xf32>
    %c0_67 = arith.constant 0 : index
    %c0_68 = arith.constant 0 : index
    %161 = vector.load %arg16[%c0_67, %c0_68] : memref<1x128xf32, #tpu.memory_space<vmem>>, vector<1x128xf32>
    %162 = vector.broadcast %161 : vector<1x128xf32> to vector<32x128xf32>
    %163 = arith.addf %160, %162 : vector<32x128xf32>
    %cst_69 = arith.constant 5.000000e-01 : f32
    %164 = vector.broadcast %cst_69 : f32 to vector<32x128xf32>
    %165 = arith.mulf %164, %163 : vector<32x128xf32>
    %cst_70 = arith.constant 4.471500e-02 : f32
    %166 = vector.broadcast %cst_70 : f32 to vector<32x128xf32>
    %167 = arith.mulf %166, %163 : vector<32x128xf32>
    %168 = arith.mulf %167, %163 : vector<32x128xf32>
    %169 = arith.mulf %168, %163 : vector<32x128xf32>
    %170 = arith.addf %163, %169 : vector<32x128xf32>
    %cst_71 = arith.constant 0.797884583 : f32
    %171 = vector.broadcast %cst_71 : f32 to vector<32x128xf32>
    %172 = arith.mulf %171, %170 : vector<32x128xf32>
    %173 = math.tanh %172 : vector<32x128xf32>
    %cst_72 = arith.constant 1.000000e+00 : f32
    %174 = vector.broadcast %cst_72 : f32 to vector<32x128xf32>
    %175 = arith.addf %174, %173 : vector<32x128xf32>
    %176 = arith.mulf %165, %175 : vector<32x128xf32>
    %c0_73 = arith.constant 0 : index
    %c0_74 = arith.constant 0 : index
    %177 = vector.load %arg17[%c0_73, %c0_74] : memref<128x32xf32, #tpu.memory_space<vmem>>, vector<128x32xf32>
    %cst_75 = arith.constant dense<0.000000e+00> : vector<32x32xf32>
    %178 = tpu.matmul %176, %177, %cst_75 {dimension_numbers = #tpu.dot_dimension_numbers<[1], [0], [0], [1], [0, 0, 1, 1], [], []>} : vector<32x128xf32>, vector<128x32xf32>, vector<32x32xf32> -> vector<32x32xf32>
    %179 = arith.addf %136, %178 : vector<32x32xf32>
    %c0_76 = arith.constant 0 : index
    %c0_77 = arith.constant 0 : index
    %180 = vector.load %arg18[%c0_76, %c0_77] : memref<1x32xf32, #tpu.memory_space<vmem>>, vector<1x32xf32>
    %181 = vector.broadcast %180 : vector<1x32xf32> to vector<32x32xf32>
    %182 = arith.addf %179, %181 : vector<32x32xf32>
    %c0_78 = arith.constant 0 : index
    %c0_79 = arith.constant 0 : index
    %183 = vector.load %arg19[%c0_78, %c0_79] : memref<1x32xf32, #tpu.memory_space<vmem>>, vector<1x32xf32>
    %c0_80 = arith.constant 0 : index
    %c0_81 = arith.constant 0 : index
    %184 = vector.load %arg20[%c0_80, %c0_81] : memref<1x32xf32, #tpu.memory_space<vmem>>, vector<1x32xf32>
    %cst_82 = arith.constant dense<0.000000e+00> : vector<32xf32>
    %185 = vector.multi_reduction <add>, %182, %cst_82 [1] : vector<32x32xf32> to vector<32xf32>
    %186 = vector.shape_cast %185 : vector<32xf32> to vector<32x1xf32>
    %cst_83 = arith.constant 3.200000e+01 : f32
    %187 = vector.broadcast %cst_83 : f32 to vector<32x1xf32>
    %188 = arith.divf %186, %187 : vector<32x1xf32>
    %189 = vector.broadcast %188 : vector<32x1xf32> to vector<32x32xf32>
    %190 = arith.subf %182, %189 : vector<32x32xf32>
    %191 = arith.mulf %190, %190 : vector<32x32xf32>
    %cst_84 = arith.constant dense<0.000000e+00> : vector<32xf32>
    %192 = vector.multi_reduction <add>, %191, %cst_84 [1] : vector<32x32xf32> to vector<32xf32>
    %193 = vector.shape_cast %192 : vector<32xf32> to vector<32x1xf32>
    %cst_85 = arith.constant 3.200000e+01 : f32
    %194 = vector.broadcast %cst_85 : f32 to vector<32x1xf32>
    %195 = arith.divf %193, %194 : vector<32x1xf32>
    %cst_86 = arith.constant 9.99999974E-6 : f32
    %196 = vector.broadcast %cst_86 : f32 to vector<32x1xf32>
    %197 = arith.addf %195, %196 : vector<32x1xf32>
    %198 = math.rsqrt %197 : vector<32x1xf32>
    %199 = vector.broadcast %198 : vector<32x1xf32> to vector<32x32xf32>
    %200 = arith.mulf %190, %199 : vector<32x32xf32>
    %201 = vector.broadcast %183 : vector<1x32xf32> to vector<32x32xf32>
    %202 = arith.mulf %200, %201 : vector<32x32xf32>
    %203 = vector.broadcast %184 : vector<1x32xf32> to vector<32x32xf32>
    %204 = arith.addf %202, %203 : vector<32x32xf32>
    %c0_87 = arith.constant 0 : index
    %c0_88 = arith.constant 0 : index
    %205 = vector.load %arg21[%c0_87, %c0_88] : memref<32x96xf32, #tpu.memory_space<vmem>>, vector<32x96xf32>
    %cst_89 = arith.constant dense<0.000000e+00> : vector<32x96xf32>
    %206 = tpu.matmul %204, %205, %cst_89 {dimension_numbers = #tpu.dot_dimension_numbers<[1], [0], [0], [1], [0, 0, 1, 1], [], []>} : vector<32x32xf32>, vector<32x96xf32>, vector<32x96xf32> -> vector<32x96xf32>
    %c0_90 = arith.constant 0 : index
    %c0_91 = arith.constant 0 : index
    %207 = vector.load %arg22[%c0_90, %c0_91] : memref<1x96xf32, #tpu.memory_space<vmem>>, vector<1x96xf32>
    %208 = vector.broadcast %207 : vector<1x96xf32> to vector<32x96xf32>
    %209 = arith.addf %206, %208 : vector<32x96xf32>
    %210 = vector.extract_strided_slice %209 {offsets = [0, 0], sizes = [32, 32], strides = [1, 1]} : vector<32x96xf32> to vector<32x32xf32>
    %cst_92 = arith.constant 0.353553385 : f32
    %211 = vector.broadcast %cst_92 : f32 to vector<32x32xf32>
    %212 = arith.mulf %210, %211 : vector<32x32xf32>
    %213 = vector.extract_strided_slice %209 {offsets = [0, 32], sizes = [32, 32], strides = [1, 1]} : vector<32x96xf32> to vector<32x32xf32>
    %214 = vector.extract_strided_slice %209 {offsets = [0, 64], sizes = [32, 32], strides = [1, 1]} : vector<32x96xf32> to vector<32x32xf32>
    %215 = vector.extract_strided_slice %212 {offsets = [0, 0], sizes = [32, 8], strides = [1, 1]} : vector<32x32xf32> to vector<32x8xf32>
    %216 = vector.extract_strided_slice %213 {offsets = [0, 0], sizes = [32, 8], strides = [1, 1]} : vector<32x32xf32> to vector<32x8xf32>
    %cst_93 = arith.constant dense<0.000000e+00> : vector<32x32xf32>
    %217 = tpu.matmul %215, %216, %cst_93 {dimension_numbers = #tpu.dot_dimension_numbers<[1], [1], [0], [0], [0, 0, 1, 0], [], []>} : vector<32x8xf32>, vector<32x8xf32>, vector<32x32xf32> -> vector<32x32xf32>
    %cst_94 = arith.constant -1.000000e+30 : f32
    %218 = vector.broadcast %cst_94 : f32 to vector<32x32xf32>
    %219 = arith.select %54, %217, %218 : vector<32x32xi1>, vector<32x32xf32>
    %220 = vector.extract_strided_slice %212 {offsets = [0, 8], sizes = [32, 8], strides = [1, 1]} : vector<32x32xf32> to vector<32x8xf32>
    %221 = vector.extract_strided_slice %213 {offsets = [0, 8], sizes = [32, 8], strides = [1, 1]} : vector<32x32xf32> to vector<32x8xf32>
    %cst_95 = arith.constant dense<0.000000e+00> : vector<32x32xf32>
    %222 = tpu.matmul %220, %221, %cst_95 {dimension_numbers = #tpu.dot_dimension_numbers<[1], [1], [0], [0], [0, 0, 1, 0], [], []>} : vector<32x8xf32>, vector<32x8xf32>, vector<32x32xf32> -> vector<32x32xf32>
    %cst_96 = arith.constant -1.000000e+30 : f32
    %223 = vector.broadcast %cst_96 : f32 to vector<32x32xf32>
    %224 = arith.select %54, %222, %223 : vector<32x32xi1>, vector<32x32xf32>
    %225 = vector.extract_strided_slice %212 {offsets = [0, 16], sizes = [32, 8], strides = [1, 1]} : vector<32x32xf32> to vector<32x8xf32>
    %226 = vector.extract_strided_slice %213 {offsets = [0, 16], sizes = [32, 8], strides = [1, 1]} : vector<32x32xf32> to vector<32x8xf32>
    %cst_97 = arith.constant dense<0.000000e+00> : vector<32x32xf32>
    %227 = tpu.matmul %225, %226, %cst_97 {dimension_numbers = #tpu.dot_dimension_numbers<[1], [1], [0], [0], [0, 0, 1, 0], [], []>} : vector<32x8xf32>, vector<32x8xf32>, vector<32x32xf32> -> vector<32x32xf32>
    %cst_98 = arith.constant -1.000000e+30 : f32
    %228 = vector.broadcast %cst_98 : f32 to vector<32x32xf32>
    %229 = arith.select %54, %227, %228 : vector<32x32xi1>, vector<32x32xf32>
    %230 = vector.extract_strided_slice %212 {offsets = [0, 24], sizes = [32, 8], strides = [1, 1]} : vector<32x32xf32> to vector<32x8xf32>
    %231 = vector.extract_strided_slice %213 {offsets = [0, 24], sizes = [32, 8], strides = [1, 1]} : vector<32x32xf32> to vector<32x8xf32>
    %cst_99 = arith.constant dense<0.000000e+00> : vector<32x32xf32>
    %232 = tpu.matmul %230, %231, %cst_99 {dimension_numbers = #tpu.dot_dimension_numbers<[1], [1], [0], [0], [0, 0, 1, 0], [], []>} : vector<32x8xf32>, vector<32x8xf32>, vector<32x32xf32> -> vector<32x32xf32>
    %cst_100 = arith.constant -1.000000e+30 : f32
    %233 = vector.broadcast %cst_100 : f32 to vector<32x32xf32>
    %234 = arith.select %54, %232, %233 : vector<32x32xi1>, vector<32x32xf32>
    %235 = tpu.concatenate %219, %224, %229, %234 in 0 : vector<32x32xf32>, vector<32x32xf32>, vector<32x32xf32>, vector<32x32xf32> -> vector<128x32xf32>
    %cst_101 = arith.constant dense<0xFF800000> : vector<128xf32>
    %236 = vector.multi_reduction <maximumf>, %235, %cst_101 [1] : vector<128x32xf32> to vector<128xf32>
    %237 = vector.shape_cast %236 : vector<128xf32> to vector<128x1xf32>
    %238 = vector.broadcast %237 : vector<128x1xf32> to vector<128x32xf32>
    %239 = arith.subf %235, %238 : vector<128x32xf32>
    %240 = math.exp %239 : vector<128x32xf32>
    %cst_102 = arith.constant dense<0.000000e+00> : vector<128xf32>
    %241 = vector.multi_reduction <add>, %240, %cst_102 [1] : vector<128x32xf32> to vector<128xf32>
    %242 = vector.shape_cast %241 : vector<128xf32> to vector<128x1xf32>
    %243 = tpu.reciprocal %242 {approx = true} : vector<128x1xf32> -> vector<128x1xf32>
    %244 = vector.broadcast %243 : vector<128x1xf32> to vector<128x32xf32>
    %245 = arith.mulf %240, %244 : vector<128x32xf32>
    %246 = vector.extract_strided_slice %245 {offsets = [0, 0], sizes = [32, 32], strides = [1, 1]} : vector<128x32xf32> to vector<32x32xf32>
    %247 = vector.extract_strided_slice %214 {offsets = [0, 0], sizes = [32, 8], strides = [1, 1]} : vector<32x32xf32> to vector<32x8xf32>
    %cst_103 = arith.constant dense<0.000000e+00> : vector<32x8xf32>
    %248 = tpu.matmul %246, %247, %cst_103 {dimension_numbers = #tpu.dot_dimension_numbers<[1], [0], [0], [1], [0, 0, 1, 1], [], []>} : vector<32x32xf32>, vector<32x8xf32>, vector<32x8xf32> -> vector<32x8xf32>
    %249 = vector.extract_strided_slice %245 {offsets = [32, 0], sizes = [32, 32], strides = [1, 1]} : vector<128x32xf32> to vector<32x32xf32>
    %250 = vector.extract_strided_slice %214 {offsets = [0, 8], sizes = [32, 8], strides = [1, 1]} : vector<32x32xf32> to vector<32x8xf32>
    %cst_104 = arith.constant dense<0.000000e+00> : vector<32x8xf32>
    %251 = tpu.matmul %249, %250, %cst_104 {dimension_numbers = #tpu.dot_dimension_numbers<[1], [0], [0], [1], [0, 0, 1, 1], [], []>} : vector<32x32xf32>, vector<32x8xf32>, vector<32x8xf32> -> vector<32x8xf32>
    %252 = vector.extract_strided_slice %245 {offsets = [64, 0], sizes = [32, 32], strides = [1, 1]} : vector<128x32xf32> to vector<32x32xf32>
    %253 = vector.extract_strided_slice %214 {offsets = [0, 16], sizes = [32, 8], strides = [1, 1]} : vector<32x32xf32> to vector<32x8xf32>
    %cst_105 = arith.constant dense<0.000000e+00> : vector<32x8xf32>
    %254 = tpu.matmul %252, %253, %cst_105 {dimension_numbers = #tpu.dot_dimension_numbers<[1], [0], [0], [1], [0, 0, 1, 1], [], []>} : vector<32x32xf32>, vector<32x8xf32>, vector<32x8xf32> -> vector<32x8xf32>
    %255 = vector.extract_strided_slice %245 {offsets = [96, 0], sizes = [32, 32], strides = [1, 1]} : vector<128x32xf32> to vector<32x32xf32>
    %256 = vector.extract_strided_slice %214 {offsets = [0, 24], sizes = [32, 8], strides = [1, 1]} : vector<32x32xf32> to vector<32x8xf32>
    %cst_106 = arith.constant dense<0.000000e+00> : vector<32x8xf32>
    %257 = tpu.matmul %255, %256, %cst_106 {dimension_numbers = #tpu.dot_dimension_numbers<[1], [0], [0], [1], [0, 0, 1, 1], [], []>} : vector<32x32xf32>, vector<32x8xf32>, vector<32x8xf32> -> vector<32x8xf32>
    %258 = tpu.concatenate %248, %251, %254, %257 in 1 : vector<32x8xf32>, vector<32x8xf32>, vector<32x8xf32>, vector<32x8xf32> -> vector<32x32xf32>
    %c0_107 = arith.constant 0 : index
    %c0_108 = arith.constant 0 : index
    %259 = vector.load %arg23[%c0_107, %c0_108] : memref<32x32xf32, #tpu.memory_space<vmem>>, vector<32x32xf32>
    %cst_109 = arith.constant dense<0.000000e+00> : vector<32x32xf32>
    %260 = tpu.matmul %258, %259, %cst_109 {dimension_numbers = #tpu.dot_dimension_numbers<[1], [0], [0], [1], [0, 0, 1, 1], [], []>} : vector<32x32xf32>, vector<32x32xf32>, vector<32x32xf32> -> vector<32x32xf32>
    %261 = arith.addf %182, %260 : vector<32x32xf32>
    %c0_110 = arith.constant 0 : index
    %c0_111 = arith.constant 0 : index
    %262 = vector.load %arg24[%c0_110, %c0_111] : memref<1x32xf32, #tpu.memory_space<vmem>>, vector<1x32xf32>
    %263 = vector.broadcast %262 : vector<1x32xf32> to vector<32x32xf32>
    %264 = arith.addf %261, %263 : vector<32x32xf32>
    %c0_112 = arith.constant 0 : index
    %c0_113 = arith.constant 0 : index
    %265 = vector.load %arg25[%c0_112, %c0_113] : memref<1x32xf32, #tpu.memory_space<vmem>>, vector<1x32xf32>
    %c0_114 = arith.constant 0 : index
    %c0_115 = arith.constant 0 : index
    %266 = vector.load %arg26[%c0_114, %c0_115] : memref<1x32xf32, #tpu.memory_space<vmem>>, vector<1x32xf32>
    %cst_116 = arith.constant dense<0.000000e+00> : vector<32xf32>
    %267 = vector.multi_reduction <add>, %264, %cst_116 [1] : vector<32x32xf32> to vector<32xf32>
    %268 = vector.shape_cast %267 : vector<32xf32> to vector<32x1xf32>
    %cst_117 = arith.constant 3.200000e+01 : f32
    %269 = vector.broadcast %cst_117 : f32 to vector<32x1xf32>
    %270 = arith.divf %268, %269 : vector<32x1xf32>
    %271 = vector.broadcast %270 : vector<32x1xf32> to vector<32x32xf32>
    %272 = arith.subf %264, %271 : vector<32x32xf32>
    %273 = arith.mulf %272, %272 : vector<32x32xf32>
    %cst_118 = arith.constant dense<0.000000e+00> : vector<32xf32>
    %274 = vector.multi_reduction <add>, %273, %cst_118 [1] : vector<32x32xf32> to vector<32xf32>
    %275 = vector.shape_cast %274 : vector<32xf32> to vector<32x1xf32>
    %cst_119 = arith.constant 3.200000e+01 : f32
    %276 = vector.broadcast %cst_119 : f32 to vector<32x1xf32>
    %277 = arith.divf %275, %276 : vector<32x1xf32>
    %cst_120 = arith.constant 9.99999974E-6 : f32
    %278 = vector.broadcast %cst_120 : f32 to vector<32x1xf32>
    %279 = arith.addf %277, %278 : vector<32x1xf32>
    %280 = math.rsqrt %279 : vector<32x1xf32>
    %281 = vector.broadcast %280 : vector<32x1xf32> to vector<32x32xf32>
    %282 = arith.mulf %272, %281 : vector<32x32xf32>
    %283 = vector.broadcast %265 : vector<1x32xf32> to vector<32x32xf32>
    %284 = arith.mulf %282, %283 : vector<32x32xf32>
    %285 = vector.broadcast %266 : vector<1x32xf32> to vector<32x32xf32>
    %286 = arith.addf %284, %285 : vector<32x32xf32>
    %c0_121 = arith.constant 0 : index
    %c0_122 = arith.constant 0 : index
    %287 = vector.load %arg27[%c0_121, %c0_122] : memref<32x128xf32, #tpu.memory_space<vmem>>, vector<32x128xf32>
    %cst_123 = arith.constant dense<0.000000e+00> : vector<32x128xf32>
    %288 = tpu.matmul %286, %287, %cst_123 {dimension_numbers = #tpu.dot_dimension_numbers<[1], [0], [0], [1], [0, 0, 1, 1], [], []>} : vector<32x32xf32>, vector<32x128xf32>, vector<32x128xf32> -> vector<32x128xf32>
    %c0_124 = arith.constant 0 : index
    %c0_125 = arith.constant 0 : index
    %289 = vector.load %arg28[%c0_124, %c0_125] : memref<1x128xf32, #tpu.memory_space<vmem>>, vector<1x128xf32>
    %290 = vector.broadcast %289 : vector<1x128xf32> to vector<32x128xf32>
    %291 = arith.addf %288, %290 : vector<32x128xf32>
    %cst_126 = arith.constant 5.000000e-01 : f32
    %292 = vector.broadcast %cst_126 : f32 to vector<32x128xf32>
    %293 = arith.mulf %292, %291 : vector<32x128xf32>
    %cst_127 = arith.constant 4.471500e-02 : f32
    %294 = vector.broadcast %cst_127 : f32 to vector<32x128xf32>
    %295 = arith.mulf %294, %291 : vector<32x128xf32>
    %296 = arith.mulf %295, %291 : vector<32x128xf32>
    %297 = arith.mulf %296, %291 : vector<32x128xf32>
    %298 = arith.addf %291, %297 : vector<32x128xf32>
    %cst_128 = arith.constant 0.797884583 : f32
    %299 = vector.broadcast %cst_128 : f32 to vector<32x128xf32>
    %300 = arith.mulf %299, %298 : vector<32x128xf32>
    %301 = math.tanh %300 : vector<32x128xf32>
    %cst_129 = arith.constant 1.000000e+00 : f32
    %302 = vector.broadcast %cst_129 : f32 to vector<32x128xf32>
    %303 = arith.addf %302, %301 : vector<32x128xf32>
    %304 = arith.mulf %293, %303 : vector<32x128xf32>
    %c0_130 = arith.constant 0 : index
    %c0_131 = arith.constant 0 : index
    %305 = vector.load %arg29[%c0_130, %c0_131] : memref<128x32xf32, #tpu.memory_space<vmem>>, vector<128x32xf32>
    %cst_132 = arith.constant dense<0.000000e+00> : vector<32x32xf32>
    %306 = tpu.matmul %304, %305, %cst_132 {dimension_numbers = #tpu.dot_dimension_numbers<[1], [0], [0], [1], [0, 0, 1, 1], [], []>} : vector<32x128xf32>, vector<128x32xf32>, vector<32x32xf32> -> vector<32x32xf32>
    %307 = arith.addf %264, %306 : vector<32x32xf32>
    %c0_133 = arith.constant 0 : index
    %c0_134 = arith.constant 0 : index
    %308 = vector.load %arg30[%c0_133, %c0_134] : memref<1x32xf32, #tpu.memory_space<vmem>>, vector<1x32xf32>
    %309 = vector.broadcast %308 : vector<1x32xf32> to vector<32x32xf32>
    %310 = arith.addf %307, %309 : vector<32x32xf32>
    %c0_135 = arith.constant 0 : index
    %c0_136 = arith.constant 0 : index
    %311 = vector.load %arg33[%c0_135, %c0_136] : memref<1x1xf32, #tpu.memory_space<vmem>>, vector<1x1xf32>
    %312 = vector.extract_strided_slice %310 {offsets = [9, 0], sizes = [2, 32], strides = [1, 1]} : vector<32x32xf32> to vector<2x32xf32>
    %c0_137 = arith.constant 0 : index
    %c0_138 = arith.constant 0 : index
    %313 = vector.load %arg31[%c0_137, %c0_138] : memref<1x32xf32, #tpu.memory_space<vmem>>, vector<1x32xf32>
    %c0_139 = arith.constant 0 : index
    %c0_140 = arith.constant 0 : index
    %314 = vector.load %arg32[%c0_139, %c0_140] : memref<1x32xf32, #tpu.memory_space<vmem>>, vector<1x32xf32>
    %cst_141 = arith.constant dense<0.000000e+00> : vector<2xf32>
    %315 = vector.multi_reduction <add>, %312, %cst_141 [1] : vector<2x32xf32> to vector<2xf32>
    %316 = vector.shape_cast %315 : vector<2xf32> to vector<2x1xf32>
    %cst_142 = arith.constant 3.200000e+01 : f32
    %317 = vector.broadcast %cst_142 : f32 to vector<2x1xf32>
    %318 = arith.divf %316, %317 : vector<2x1xf32>
    %319 = vector.broadcast %318 : vector<2x1xf32> to vector<2x32xf32>
    %320 = arith.subf %312, %319 : vector<2x32xf32>
    %321 = arith.mulf %320, %320 : vector<2x32xf32>
    %cst_143 = arith.constant dense<0.000000e+00> : vector<2xf32>
    %322 = vector.multi_reduction <add>, %321, %cst_143 [1] : vector<2x32xf32> to vector<2xf32>
    %323 = vector.shape_cast %322 : vector<2xf32> to vector<2x1xf32>
    %cst_144 = arith.constant 3.200000e+01 : f32
    %324 = vector.broadcast %cst_144 : f32 to vector<2x1xf32>
    %325 = arith.divf %323, %324 : vector<2x1xf32>
    %cst_145 = arith.constant 9.99999974E-6 : f32
    %326 = vector.broadcast %cst_145 : f32 to vector<2x1xf32>
    %327 = arith.addf %325, %326 : vector<2x1xf32>
    %328 = math.rsqrt %327 : vector<2x1xf32>
    %329 = vector.broadcast %328 : vector<2x1xf32> to vector<2x32xf32>
    %330 = arith.mulf %320, %329 : vector<2x32xf32>
    %331 = vector.broadcast %313 : vector<1x32xf32> to vector<2x32xf32>
    %332 = arith.mulf %330, %331 : vector<2x32xf32>
    %333 = vector.broadcast %314 : vector<1x32xf32> to vector<2x32xf32>
    %334 = arith.addf %332, %333 : vector<2x32xf32>
    %335 = vector.extract_strided_slice %334 {offsets = [1, 0], sizes = [1, 32], strides = [1, 1]} : vector<2x32xf32> to vector<1x32xf32>
    %336 = vector.broadcast %311 : vector<1x1xf32> to vector<1x32xf32>
    %337 = arith.mulf %336, %335 : vector<1x32xf32>
    %cst_146 = arith.constant 1.000000e+00 : f32
    %338 = vector.broadcast %cst_146 : f32 to vector<1x1xf32>
    %339 = arith.subf %338, %311 : vector<1x1xf32>
    %340 = vector.extract_strided_slice %334 {offsets = [0, 0], sizes = [1, 32], strides = [1, 1]} : vector<2x32xf32> to vector<1x32xf32>
    %341 = vector.broadcast %339 : vector<1x1xf32> to vector<1x32xf32>
    %342 = arith.mulf %341, %340 : vector<1x32xf32>
    %343 = arith.addf %337, %342 : vector<1x32xf32>
    %344 = vector.extract_strided_slice %310 {offsets = [25, 0], sizes = [2, 32], strides = [1, 1]} : vector<32x32xf32> to vector<2x32xf32>
    %c0_147 = arith.constant 0 : index
    %c0_148 = arith.constant 0 : index
    %345 = vector.load %arg31[%c0_147, %c0_148] : memref<1x32xf32, #tpu.memory_space<vmem>>, vector<1x32xf32>
    %c0_149 = arith.constant 0 : index
    %c0_150 = arith.constant 0 : index
    %346 = vector.load %arg32[%c0_149, %c0_150] : memref<1x32xf32, #tpu.memory_space<vmem>>, vector<1x32xf32>
    %cst_151 = arith.constant dense<0.000000e+00> : vector<2xf32>
    %347 = vector.multi_reduction <add>, %344, %cst_151 [1] : vector<2x32xf32> to vector<2xf32>
    %348 = vector.shape_cast %347 : vector<2xf32> to vector<2x1xf32>
    %cst_152 = arith.constant 3.200000e+01 : f32
    %349 = vector.broadcast %cst_152 : f32 to vector<2x1xf32>
    %350 = arith.divf %348, %349 : vector<2x1xf32>
    %351 = vector.broadcast %350 : vector<2x1xf32> to vector<2x32xf32>
    %352 = arith.subf %344, %351 : vector<2x32xf32>
    %353 = arith.mulf %352, %352 : vector<2x32xf32>
    %cst_153 = arith.constant dense<0.000000e+00> : vector<2xf32>
    %354 = vector.multi_reduction <add>, %353, %cst_153 [1] : vector<2x32xf32> to vector<2xf32>
    %355 = vector.shape_cast %354 : vector<2xf32> to vector<2x1xf32>
    %cst_154 = arith.constant 3.200000e+01 : f32
    %356 = vector.broadcast %cst_154 : f32 to vector<2x1xf32>
    %357 = arith.divf %355, %356 : vector<2x1xf32>
    %cst_155 = arith.constant 9.99999974E-6 : f32
    %358 = vector.broadcast %cst_155 : f32 to vector<2x1xf32>
    %359 = arith.addf %357, %358 : vector<2x1xf32>
    %360 = math.rsqrt %359 : vector<2x1xf32>
    %361 = vector.broadcast %360 : vector<2x1xf32> to vector<2x32xf32>
    %362 = arith.mulf %352, %361 : vector<2x32xf32>
    %363 = vector.broadcast %345 : vector<1x32xf32> to vector<2x32xf32>
    %364 = arith.mulf %362, %363 : vector<2x32xf32>
    %365 = vector.broadcast %346 : vector<1x32xf32> to vector<2x32xf32>
    %366 = arith.addf %364, %365 : vector<2x32xf32>
    %367 = vector.extract_strided_slice %366 {offsets = [1, 0], sizes = [1, 32], strides = [1, 1]} : vector<2x32xf32> to vector<1x32xf32>
    %368 = vector.broadcast %311 : vector<1x1xf32> to vector<1x32xf32>
    %369 = arith.mulf %368, %367 : vector<1x32xf32>
    %cst_156 = arith.constant 1.000000e+00 : f32
    %370 = vector.broadcast %cst_156 : f32 to vector<1x1xf32>
    %371 = arith.subf %370, %311 : vector<1x1xf32>
    %372 = vector.extract_strided_slice %366 {offsets = [0, 0], sizes = [1, 32], strides = [1, 1]} : vector<2x32xf32> to vector<1x32xf32>
    %373 = vector.broadcast %371 : vector<1x1xf32> to vector<1x32xf32>
    %374 = arith.mulf %373, %372 : vector<1x32xf32>
    %375 = arith.addf %369, %374 : vector<1x32xf32>
    %376 = tpu.concatenate %343, %375 in 0 : vector<1x32xf32>, vector<1x32xf32> -> vector<2x32xf32>
    %c0_157 = arith.constant 0 : index
    %c0_158 = arith.constant 0 : index
    %377 = vector.load %arg34[%c0_157, %c0_158] : memref<32x128xf32, #tpu.memory_space<vmem>>, vector<32x128xf32>
    %cst_159 = arith.constant dense<0.000000e+00> : vector<2x128xf32>
    %378 = tpu.matmul %376, %377, %cst_159 {dimension_numbers = #tpu.dot_dimension_numbers<[1], [0], [0], [1], [0, 0, 1, 1], [], []>} : vector<2x32xf32>, vector<32x128xf32>, vector<2x128xf32> -> vector<2x128xf32>
    %c0_160 = arith.constant 0 : index
    %c0_161 = arith.constant 0 : index
    %379 = vector.load %arg35[%c0_160, %c0_161] : memref<1x128xf32, #tpu.memory_space<vmem>>, vector<1x128xf32>
    %380 = vector.broadcast %379 : vector<1x128xf32> to vector<2x128xf32>
    %381 = arith.addf %378, %380 : vector<2x128xf32>
    %c0_162 = arith.constant 0 : index
    %c0_163 = arith.constant 0 : index
    %c0_164 = arith.constant 0 : index
    %382 = vector.load %arg36[%c0_162, %c0_163, %c0_164] : memref<1x2x128xf32, #tpu.memory_space<vmem>>, vector<1x2x128xf32>
    %383 = vector.shape_cast %382 : vector<1x2x128xf32> to vector<2x128xf32>
    %384 = vector.shape_cast %381 : vector<2x128xf32> to vector<1x2x128xf32>
    tpu.vector_store %arg36[%c0_162, %c0_163, %c0_164], %384 {strides = array<i32>} : memref<1x2x128xf32, #tpu.memory_space<vmem>>, vector<1x2x128xf32>,
    return
  }
  func.func @transform_0(%arg0: i32) -> (i32, i32, i32) {
    %c0_i32 = arith.constant 0 : i32
    %c0_i32_0 = arith.constant 0 : i32
    %c0_i32_1 = arith.constant 0 : i32
    return %arg0, %c0_i32, %c0_i32_0 : i32, i32, i32
  }
  func.func @transform_1(%arg0: i32) -> (i32, i32) {
    %c0_i32 = arith.constant 0 : i32
    %c0_i32_0 = arith.constant 0 : i32
    %c0_i32_1 = arith.constant 0 : i32
    return %c0_i32, %c0_i32_0 : i32, i32
  }
  func.func @transform_2(%arg0: i32) -> (i32, i32) {
    %c0_i32 = arith.constant 0 : i32
    %c0_i32_0 = arith.constant 0 : i32
    %c0_i32_1 = arith.constant 0 : i32
    return %c0_i32, %c0_i32_0 : i32, i32
  }
  func.func @transform_3(%arg0: i32) -> (i32, i32) {
    %c0_i32 = arith.constant 0 : i32
    %c0_i32_0 = arith.constant 0 : i32
    %c0_i32_1 = arith.constant 0 : i32
    return %c0_i32, %c0_i32_0 : i32, i32
  }
  func.func @transform_4(%arg0: i32) -> (i32, i32) {
    %c0_i32 = arith.constant 0 : i32
    %c0_i32_0 = arith.constant 0 : i32
    %c0_i32_1 = arith.constant 0 : i32
    return %c0_i32, %c0_i32_0 : i32, i32
  }
  func.func @transform_5(%arg0: i32) -> (i32, i32) {
    %c0_i32 = arith.constant 0 : i32
    %c0_i32_0 = arith.constant 0 : i32
    %c0_i32_1 = arith.constant 0 : i32
    return %c0_i32, %c0_i32_0 : i32, i32
  }
  func.func @transform_6(%arg0: i32) -> (i32, i32) {
    %c0_i32 = arith.constant 0 : i32
    %c0_i32_0 = arith.constant 0 : i32
    %c0_i32_1 = arith.constant 0 : i32
    return %c0_i32, %c0_i32_0 : i32, i32
  }
  func.func @transform_7(%arg0: i32) -> (i32, i32) {
    %c0_i32 = arith.constant 0 : i32
    %c0_i32_0 = arith.constant 0 : i32
    %c0_i32_1 = arith.constant 0 : i32
    return %c0_i32, %c0_i32_0 : i32, i32
  }
  func.func @transform_8(%arg0: i32) -> (i32, i32) {
    %c0_i32 = arith.constant 0 : i32
    %c0_i32_0 = arith.constant 0 : i32
    %c0_i32_1 = arith.constant 0 : i32
    return %c0_i32, %c0_i32_0 : i32, i32
  }
  func.func @transform_9(%arg0: i32) -> (i32, i32) {
    %c0_i32 = arith.constant 0 : i32
    %c0_i32_0 = arith.constant 0 : i32
    %c0_i32_1 = arith.constant 0 : i32
    return %c0_i32, %c0_i32_0 : i32, i32
  }
  func.func @transform_10(%arg0: i32) -> (i32, i32) {
    %c0_i32 = arith.constant 0 : i32
    %c0_i32_0 = arith.constant 0 : i32
    %c0_i32_1 = arith.constant 0 : i32
    return %c0_i32, %c0_i32_0 : i32, i32
  }
  func.func @transform_11(%arg0: i32) -> (i32, i32) {
    %c0_i32 = arith.constant 0 : i32
    %c0_i32_0 = arith.constant 0 : i32
    %c0_i32_1 = arith.constant 0 : i32
    return %c0_i32, %c0_i32_0 : i32, i32
  }
  func.func @transform_12(%arg0: i32) -> (i32, i32) {
    %c0_i32 = arith.constant 0 : i32
    %c0_i32_0 = arith.constant 0 : i32
    %c0_i32_1 = arith.constant 0 : i32
    return %c0_i32, %c0_i32_0 : i32, i32
  }
  func.func @transform_13(%arg0: i32) -> (i32, i32) {
    %c0_i32 = arith.constant 0 : i32
    %c0_i32_0 = arith.constant 0 : i32
    %c0_i32_1 = arith.constant 0 : i32
    return %c0_i32, %c0_i32_0 : i32, i32
  }
  func.func @transform_14(%arg0: i32) -> (i32, i32) {
    %c0_i32 = arith.constant 0 : i32
    %c0_i32_0 = arith.constant 0 : i32
    %c0_i32_1 = arith.constant 0 : i32
    return %c0_i32, %c0_i32_0 : i32, i32
  }
  func.func @transform_15(%arg0: i32) -> (i32, i32) {
    %c0_i32 = arith.constant 0 : i32
    %c0_i32_0 = arith.constant 0 : i32
    %c0_i32_1 = arith.constant 0 : i32
    return %c0_i32, %c0_i32_0 : i32, i32
  }
  func.func @transform_16(%arg0: i32) -> (i32, i32) {
    %c0_i32 = arith.constant 0 : i32
    %c0_i32_0 = arith.constant 0 : i32
    %c0_i32_1 = arith.constant 0 : i32
    return %c0_i32, %c0_i32_0 : i32, i32
  }
  func.func @transform_17(%arg0: i32) -> (i32, i32) {
    %c0_i32 = arith.constant 0 : i32
    %c0_i32_0 = arith.constant 0 : i32
    %c0_i32_1 = arith.constant 0 : i32
    return %c0_i32, %c0_i32_0 : i32, i32
  }
  func.func @transform_18(%arg0: i32) -> (i32, i32) {
    %c0_i32 = arith.constant 0 : i32
    %c0_i32_0 = arith.constant 0 : i32
    %c0_i32_1 = arith.constant 0 : i32
    return %c0_i32, %c0_i32_0 : i32, i32
  }
  func.func @transform_19(%arg0: i32) -> (i32, i32) {
    %c0_i32 = arith.constant 0 : i32
    %c0_i32_0 = arith.constant 0 : i32
    %c0_i32_1 = arith.constant 0 : i32
    return %c0_i32, %c0_i32_0 : i32, i32
  }
  func.func @transform_20(%arg0: i32) -> (i32, i32) {
    %c0_i32 = arith.constant 0 : i32
    %c0_i32_0 = arith.constant 0 : i32
    %c0_i32_1 = arith.constant 0 : i32
    return %c0_i32, %c0_i32_0 : i32, i32
  }
  func.func @transform_21(%arg0: i32) -> (i32, i32) {
    %c0_i32 = arith.constant 0 : i32
    %c0_i32_0 = arith.constant 0 : i32
    %c0_i32_1 = arith.constant 0 : i32
    return %c0_i32, %c0_i32_0 : i32, i32
  }
  func.func @transform_22(%arg0: i32) -> (i32, i32) {
    %c0_i32 = arith.constant 0 : i32
    %c0_i32_0 = arith.constant 0 : i32
    %c0_i32_1 = arith.constant 0 : i32
    return %c0_i32, %c0_i32_0 : i32, i32
  }
  func.func @transform_23(%arg0: i32) -> (i32, i32) {
    %c0_i32 = arith.constant 0 : i32
    %c0_i32_0 = arith.constant 0 : i32
    %c0_i32_1 = arith.constant 0 : i32
    return %c0_i32, %c0_i32_0 : i32, i32
  }
  func.func @transform_24(%arg0: i32) -> (i32, i32) {
    %c0_i32 = arith.constant 0 : i32
    %c0_i32_0 = arith.constant 0 : i32
    %c0_i32_1 = arith.constant 0 : i32
    return %c0_i32, %c0_i32_0 : i32, i32
  }
  func.func @transform_25(%arg0: i32) -> (i32, i32) {
    %c0_i32 = arith.constant 0 : i32
    %c0_i32_0 = arith.constant 0 : i32
    %c0_i32_1 = arith.constant 0 : i32
    return %c0_i32, %c0_i32_0 : i32, i32
  }
  func.func @transform_26(%arg0: i32) -> (i32, i32) {
    %c0_i32 = arith.constant 0 : i32
    %c0_i32_0 = arith.constant 0 : i32
    %c0_i32_1 = arith.constant 0 : i32
    return %c0_i32, %c0_i32_0 : i32, i32
  }
  func.func @transform_27(%arg0: i32) -> (i32, i32) {
    %c0_i32 = arith.constant 0 : i32
    %c0_i32_0 = arith.constant 0 : i32
    %c0_i32_1 = arith.constant 0 : i32
    return %c0_i32, %c0_i32_0 : i32, i32
  }
  func.func @transform_28(%arg0: i32) -> (i32, i32) {
    %c0_i32 = arith.constant 0 : i32
    %c0_i32_0 = arith.constant 0 : i32
    %c0_i32_1 = arith.constant 0 : i32
    return %c0_i32, %c0_i32_0 : i32, i32
  }
  func.func @transform_29(%arg0: i32) -> (i32, i32) {
    %c0_i32 = arith.constant 0 : i32
    %c0_i32_0 = arith.constant 0 : i32
    %c0_i32_1 = arith.constant 0 : i32
    return %c0_i32, %c0_i32_0 : i32, i32
  }
  func.func @transform_30(%arg0: i32) -> (i32, i32) {
    %c0_i32 = arith.constant 0 : i32
    %c0_i32_0 = arith.constant 0 : i32
    %c0_i32_1 = arith.constant 0 : i32
    return %c0_i32, %c0_i32_0 : i32, i32
  }
  func.func @transform_31(%arg0: i32) -> (i32, i32) {
    %c0_i32 = arith.constant 0 : i32
    %c0_i32_0 = arith.constant 0 : i32
    %c0_i32_1 = arith.constant 0 : i32
    return %c0_i32, %c0_i32_0 : i32, i32
  }
  func.func @transform_32(%arg0: i32) -> (i32, i32) {
    %c0_i32 = arith.constant 0 : i32
    %c0_i32_0 = arith.constant 0 : i32
    %c0_i32_1 = arith.constant 0 : i32
    return %c0_i32, %c0_i32_0 : i32, i32
  }
  func.func @transform_33(%arg0: i32) -> (i32, i32) {
    %c0_i32 = arith.constant 0 : i32
    %c0_i32_0 = arith.constant 0 : i32
    %c0_i32_1 = arith.constant 0 : i32
    return %c0_i32, %c0_i32_0 : i32, i32
  }
  func.func @transform_34(%arg0: i32) -> (i32, i32) {
    %c0_i32 = arith.constant 0 : i32
    %c0_i32_0 = arith.constant 0 : i32
    %c0_i32_1 = arith.constant 0 : i32
    return %c0_i32, %c0_i32_0 : i32, i32
  }
  func.func @transform_35(%arg0: i32) -> (i32, i32, i32) {
    %c0_i32 = arith.constant 0 : i32
    %c0_i32_0 = arith.constant 0 : i32
    %c0_i32_1 = arith.constant 0 : i32
    return %arg0, %c0_i32, %c0_i32_0 : i32, i32, i32
  }
}

</mosaic_0001>

<bundles_post_ra>
// kernel: tpu_custom_call.1
= control target key start
LH: loop header
LB: loop body
LE: loop exit
PB: predicated region body
PF: predicated region fallthrough
CT: control target
= control target key end

     0   :  { %s3289_s6 = smov 1   ;;  %s3290_s10 = smov 2   ;;  %s4581_s0 = inlined_call_operand.smem [shape: u32[36], index: -1, kind: input, shape index: {}] }
   0x1   :  { %s3349_s5 = sld [smem:[%s4581_s0]]   ;;  %s3291_s14 = smov 3  }
   0x2   :  { %s3354_s9 = sld [smem:[%s4581_s0 + %s3289_s6]]   ;;  %s3292_s18 = smov 4  }
   0x3   :  { %s3359_s13 = sld [smem:[%s4581_s0 + %s3290_s10]]   ;;  %s3293_s22 = smov 5  }
   0x4   :  { %s3364_s17 = sld [smem:[%s4581_s0 + %s3291_s14]]   ;;  %s3294_s26 = smov 6  }
   0x5   :  { %s3369_s21 = sld [smem:[%s4581_s0 + %s3292_s18]]   ;;  %s3295_s30 = smov 7  }
   0x6   :  { %s3374_s25 = sld [smem:[%s4581_s0 + %s3293_s22]]   ;;  %s3296_s4 = smov 8  }
   0x7   :  { %s3379_s29 = sld [smem:[%s4581_s0 + %s3294_s26]]   ;;  %s3297_s10 = smov 9  }
   0x8   :  { %s3384_s3 = sld [smem:[%s4581_s0 + %s3295_s30]]   ;;  %s3298_s15 = smov 10  }
   0x9   :  { %s3389_s8 = sld [smem:[%s4581_s0 + %s3296_s4]]   ;;  %s3299_s20 = smov 11  }
   0xa   :  { %s3394_s14 = sld [smem:[%s4581_s0 + %s3297_s10]]   ;;  %s3300_s26 = smov 12  }
   0xb   :  { %s3399_s19 = sld [smem:[%s4581_s0 + %s3298_s15]]   ;;  %s3301_s1 = smov 13  }
   0xc   :  { %s3404_s24 = sld [smem:[%s4581_s0 + %s3299_s20]]   ;;  %s3302_s7 = smov 14  }
   0xd   :  { %s3409_s30 = sld [smem:[%s4581_s0 + %s3300_s26]]   ;;  %s3303_s15 = smov 15  }
   0xe   :  { %s3414_s6 = sld [smem:[%s4581_s0 + %s3301_s1]]   ;;  %s3304_s22 = smov 16  }
   0xf   :  { %s3419_s12 = sld [smem:[%s4581_s0 + %s3302_s7]]   ;;  %s3305_s28 = smov 17  }
  0x10   :  { %s3424_s20 = sld [smem:[%s4581_s0 + %s3303_s15]]   ;;  %s3306_s7 = smov 18  }
  0x11   :  { %s3429_s27 = sld [smem:[%s4581_s0 + %s3304_s22]]   ;;  %s3307_s15 = smov 19  }
  0x12   :  { %s3434_s4 = sld [smem:[%s4581_s0 + %s3305_s28]]   ;;  %s3308_s22 = smov 20  }
  0x13   :  { %s3309_s28 = smov 21   ;;  %s3321_s1 = smov 33  }
  0x14   :  { %4587 = sst [smem:[#allocation6_spill]] %s3414_s6  ;;  %s3322_s10 = smov 34  }
  0x15   :  { %s3439_s6 = sld [smem:[%s4581_s0 + %s3306_s7]]   ;;  %s3310_s7 = smov 22  }
  0x16   :  { %4588 = sst [smem:[#allocation7_spill]] %s3424_s20  ;;  %s3323_s16 = smov 35  }
  0x17   :  { %4589 = sst [smem:[#allocation8_spill]] %s3429_s27 }
  0x18   :  { %4590 = sst [smem:[#allocation9_spill]] %s3434_s4 }
  0x19   :  { %s3444_s20 = sld [smem:[%s4581_s0 + %s3307_s15]]   ;;  %s3311_s15 = smov 23  }
  0x1a   :  { %s3449_s27 = sld [smem:[%s4581_s0 + %s3308_s22]]   ;;  %s3312_s22 = smov 24  }
  0x1b   :  { %4591 = sst [smem:[#allocation10_spill]] %s3439_s6 }
  0x1c   :  { %s3454_s4 = sld [smem:[%s4581_s0 + %s3309_s28]]   ;;  %s3313_s28 = smov 25  }
  0x1d   :  { %s3459_s6 = sld [smem:[%s4581_s0 + %s3310_s7]]   ;;  %s3314_s7 = smov 26  }
  0x1f   :  { %4592 = sst [smem:[#allocation11_spill]] %s3444_s20 }
  0x20   :  { %4593 = sst [smem:[#allocation12_spill]] %s3449_s27 }
  0x21   :  { %s3464_s20 = sld [smem:[%s4581_s0 + %s3311_s15]]   ;;  %s3315_s15 = smov 27  }
  0x22   :  { %4594 = sst [smem:[#allocation13_spill]] %s3454_s4 }
  0x23   :  { %4595 = sst [smem:[#allocation14_spill]] %s3459_s6 }
  0x24   :  { %s3469_s27 = sld [smem:[%s4581_s0 + %s3312_s22]]   ;;  %s3316_s22 = smov 28  }
  0x25   :  { %s3474_s4 = sld [smem:[%s4581_s0 + %s3313_s28]]   ;;  %s3317_s28 = smov 29  }
  0x26   :  { %s3479_s6 = sld [smem:[%s4581_s0 + %s3314_s7]]   ;;  %s3318_s7 = smov 30  }
  0x27   :  { %4596 = sst [smem:[#allocation15_spill]] %s3464_s20 }
  0x28   :  { %s3484_s20 = sld [smem:[%s4581_s0 + %s3315_s15]]   ;;  %s3319_s15 = smov 31  }
  0x2a   :  { %4597 = sst [smem:[#allocation16_spill]] %s3469_s27 }
  0x2b   :  { %4598 = sst [smem:[#allocation17_spill]] %s3474_s4 }
  0x2c   :  { %4599 = sst [smem:[#allocation18_spill]] %s3479_s6 }
  0x2d   :  { %s3489_s27 = sld [smem:[%s4581_s0 + %s3316_s22]]   ;;  %s3320_s22 = smov 32  }
  0x2e   :  { %4600 = sst [smem:[#allocation19_spill]] %s3484_s20 }
  0x2f   :  { %s3494_s4 = sld [smem:[%s4581_s0 + %s3317_s28]]  }
  0x30   :  { %s3499_s6 = sld [smem:[%s4581_s0 + %s3318_s7]]  }
  0x31   :  { %s3504_s20 = sld [smem:[%s4581_s0 + %s3319_s15]]  }
  0x33   :  { %4601 = sst [smem:[#allocation20_spill]] %s3489_s27 }
  0x34   :  { %s2780_s27 = sld [smem:[%s4581_s0 + %s3320_s22]]  }
  0x35   :  { %4602 = sst [smem:[#allocation21_spill]] %s3494_s4 }
  0x36   :  { %4603 = sst [smem:[#allocation22_spill]] %s3499_s6 }
  0x37   :  { %4604 = sst [smem:[#allocation23_spill]] %s3504_s20 }
  0x38   :  { %s3512_s4 = sld [smem:[%s4581_s0 + %s3321_s1]]  }
  0x39   :  { %s3517_s6 = sld [smem:[%s4581_s0 + %s3322_s10]]  }
  0x3a   :  { %s3522_s20 = sld [smem:[%s4581_s0 + %s3323_s16]]   ;;  %v76_v0 = vstv %s2780_s27 }
  0x3b   :  { %77 = vst [vmem:[#allocation2] sm:$0x1] %v76_v0 }
  0x3c   :  { %v159_v1 = vld [vmem:[%s3354_s9 + $0x38] sm:$0xff]  ;;  %v158_v2 = vld [vmem:[%s3354_s9 + $0x30] sm:$0xff]  ;;  %v157_v3 = vld [vmem:[%s3354_s9 + $0x28] sm:$0xff] }
  0x3d   :  { %176 = vmatpush.msra.mxu0 %v159_v1  ;;  %v156_v4 = vld [vmem:[%s3354_s9 + $0x20] sm:$0xff]  ;;  %v155_v5 = vld [vmem:[%s3354_s9 + $0x18] sm:$0xff]  ;;  %v154_v6 = vld [vmem:[%s3354_s9 + $0x10] sm:$0xff] }
  0x3e   :  { %v153_v7 = vld [vmem:[%s3354_s9 + $0x8] sm:$0xff] }
  0x3f   :  { %177 = vmatpush.msra.mxu0 %v158_v2 }
  0x41   :  { %178 = vmatpush.msra.mxu0 %v157_v3 }
  0x43   :  { %179 = vmatpush.msra.mxu0 %v156_v4 }
  0x45   :  { %180 = vmatpush.msra.mxu0 %v155_v5 }
  0x46   :  { %78 = vsyncpa [#allocation4], 0  ;;  %v152_v8 = vld [vmem:[%s3354_s9] sm:$0xff]  ;;  %vm164_vm0 = vcmask 523264   ;;  %vm205_vm1 = vcmask 261120   ;;  %v200_v12 = vld [vmem:[%s3364_s17 + $0x18] sm:$0xff]  ;;  %v229_v40 = vlaneseq }
  0x47   :  { %181 = vmatpush.msra.mxu0 %v154_v6  ;;  %v151_v9 = vld [vmem:[%s3349_s5] sm:$0x3]  ;;  %v199_v13 = vld [vmem:[%s3364_s17 + $0x10] sm:$0xff]  ;;  %221 = vmatpush.msra.mxu1 %v200_v12  ;;  %v198_v14 = vld [vmem:[%s3364_s17 + $0x8] sm:$0xff]  ;;  %v3324_v28 = vmov 32.0   ;;  %s3325_s0 = smov 72  }
  0x48   :  { %v149_v10 = vld [vmem:[%s3374_s25] sm:$0xff]  ;;  %v3546_v41 = vshrl.u32 %v229_v40, 7  ;;  %v150_v50 = vld [vmem:[%s3374_s25 + $0x8] sm:$0xff]  ;;  %v384_v60 = vld [vmem:[%s3389_s8 + $0x18] sm:$0xff]  ;;  %s3326_s5 = smov 104   ;;  %s3327_s9 = smov 80  }
  0x49   :  { %182 = vmatpush.msra.mxu0 %v153_v7  ;;  %v272_v11 = vsel %vm205_vm1, %v149_v10, 0.0  ;;  %222 = vmatpush.msra.mxu1 %v199_v13  ;;  %v197_v15 = vld [vmem:[%s3364_s17] sm:$0xff]  ;;  %v383_v61 = vld [vmem:[%s3389_s8 + $0x10] sm:$0xff]  ;;  %v382_v62 = vld [vmem:[%s3389_s8 + $0x8] sm:$0xff]  ;;  %s3329_s17 = smov 112   ;;  %s3335_s27 = smov 64  }
  0x4a   :  { %273 = vadd.xlane.f32.xlu0 %v272_v11  ;;  %279 = vadd.xlane.f32.xlu1 %v272_v11  ;;  %v3057_v16 = vld [vmem:[%s3359_s13] ss:$0 sm:$0xff]  ;;  %v3550_v43 = vadd.s32 8, %v3546_v41  ;;  %s3328_s13 = smov 88   ;;  %s3336_s22 = smov 8  }
  0x4b   :  { %183 = vmatpush.msra.mxu0 %v152_v8  ;;  %223 = vmatpush.msra.mxu1 %v198_v14  ;;  %v3058_v42 = vld [vmem:[%s3369_s21] ss:$0 sm:$0xff]  ;;  %s3330_s21 = smov 120   ;;  %s3337_s23 = smov 16  }
  0x4c   :  { %2784 = vmatmul.msk.f32.vlgmr.msra.gmra.mxu0 %vm164_vm0, %v151_v9  ;;  %vm233_vm3 = vcmp.eq.s32.totalorder %v3550_v43, 10  ;;  %413 = vmatpush.msra.mxu2 %v384_v60  ;;  %v381_v63 = vld [vmem:[%s3389_s8] sm:$0xff]  ;;  %s3333_s8 = smov 40   ;;  %vm446_vm0 = vcmask 64512   ;;  %s3338_s26 = smov 24  }
  0x4d   :  { %224 = vmatpush.msra.mxu1 %v197_v15  ;;  %v3574_v9 = vld [vmem:[%s3379_s29] ss:$0 sm:$0xff]  ;;  %s3331_s29 = smov 96   ;;  %s4618_s1 = sld [smem:[#allocation10_spill]] }
  0x4e   :  { %414 = vmatpush.msra.mxu2 %v383_v61  ;;  %v3577_v12 = vld [vmem:[%s3384_s3] ss:$0 sm:$0xff]  ;;  %s3332_s3 = smov 56   ;;  %s4619_s28 = sld [smem:[#allocation11_spill]] }
  0x4f   :  { %s4620_s2 = sld [smem:[#allocation13_spill]] }
  0x50   :  { %415 = vmatpush.msra.mxu2 %v382_v62  ;;  %s4621_s10 = sld [smem:[#allocation14_spill]] }
  0x51   :  { %s4622_s7 = sld [smem:[#allocation15_spill]] }
  0x52   :  { %416 = vmatpush.msra.mxu2 %v381_v63  ;;  %s4623_s11 = sld [smem:[#allocation18_spill]] }
  0x53   :  { %s4624_s16 = sld [smem:[#allocation16_spill]] }
  0x54   :  { %s4625_s15 = sld [smem:[#allocation17_spill]] }
  0x55   :  { %s4626_s18 = sld [smem:[#allocation20_spill]] }
  0xbd   :  { %v274_v35 = vpop.xlane.xlu0 %273  ;;  %v280_v44 = vpop.xlane.xlu1 %279 }
  0xc9   :  { %v185_v17 = vpop.f32.mrf.mxu0 }
  0xca   :  { %v186_v18 = vadd.f32 %v3057_v16, %v185_v17 }
  0xcc   :  { %v189_v19 = vmul.f32 0.044715, %v186_v18  ;;  %v188_v25 = vmul.f32 0.5, %v186_v18 }
  0xce   :  { %v190_v20 = vmul.f32 %v189_v19, %v186_v18 }
  0xd0   :  { %v191_v21 = vmul.f32 %v190_v20, %v186_v18 }
  0xd2   :  { %v192_v22 = vadd.f32 %v191_v21, %v186_v18 }
  0xd4   :  { %v193_v23 = vmul.f32 0.7978846, %v192_v22 }
  0xd6   :  { %3078 = vtanh.f32 %v193_v23 }
  0xd7   :  { %3080 = vrcp.f32 %v3324_v28 }
  0xdc   :  { %v3079_v24 = vpop.eup %3078 }
  0xdd   :  { %v195_v26 = vadd.f32 1.0, %v3079_v24  ;;  %v3081_v29 = vpop.eup %3080 }
  0xde   :  { %v285_v30 = vmul.f32 32.0, %v3081_v29  ;;  %vm289_vm2 = vweird.f32 %v3081_v29 }
  0xdf   :  { %v196_v27 = vmul.f32 %v195_v26, %v188_v25  ;;  %v3593_v25 = vld [vmem:[%s3394_s14] ss:$0 sm:$0xff]  ;;  %s3334_s14 = smov 48  }
  0xe0   :  { %v286_v31 = vsub.f32 1.0, %v285_v30 }
  0xe1   :  { %2785 = vmatmul.msk.f32.vlgmr.msra.gmra.mxu1 %vm205_vm1, %v196_v27 }
  0xe2   :  { %v287_v32 = vmul.f32 %v3081_v29, %v286_v31 }
  0xe4   :  { %v288_v33 = vadd.f32 %v3081_v29, %v287_v32 }
  0xe6   :  { %v3541_v34 = vsel %vm289_vm2, %v3081_v29, %v288_v33 }
  0xe7   :  { %v291_v36 = vmul.f32 %v3541_v34, %v274_v35  ;;  %v293_v47 = vmul.f32 %v3541_v34, %v280_v44 }
  0xe9   :  { %v295_v37 = vsub.f32 %v149_v10, %v291_v36  ;;  %v3557_v54 = vsub.f32 %v149_v10, %v293_v47 }
  0xeb   :  { %v299_v38 = vmul.f32 %v295_v37, %v295_v37  ;;  %v301_v58 = vmul.f32 %v3557_v54, %v3557_v54 }
  0xed   :  { %v303_v39 = vsel %vm205_vm1, %v299_v38, 0.0  ;;  %v309_v59 = vsel %vm205_vm1, %v301_v58, 0.0 }
  0xee   :  { %304 = vadd.xlane.f32.xlu2 %v303_v39 }
 0x15e   :  { %v226_v45 = vpop.f32.mrf.mxu1 }
 0x15f   :  { %v227_v46 = vadd.f32 %v3058_v42, %v226_v45 }
 0x161   :  { %v234_v48 = vperm.slane %v227_v46, 0  ;;  %v239_v49 = vperm.slane %v227_v46, 1  ;;  %v305_v0 = vpop.xlane.xlu2 %304 }
 0x162   :  { %v315_v1 = vmul.f32 %v305_v0, %v3541_v34 }
 0x163   :  { %v236_v51 = vsel %vm233_vm3, %v234_v48, 0.0  ;;  %v241_v52 = vsel %vm233_vm3, %v239_v49, 0.0 }
 0x164   :  { %v3555_v53 = vadd.f32 %v241_v52, %v150_v50  ;;  %v3559_v55 = vadd.f32 %v236_v51, %v150_v50  ;;  %v319_v2 = vadd.f32 1e-05, %v315_v1 }
 0x166   :  { %v281_v56 = vsel %vm205_vm1, %v3555_v53, 0.0  ;;  %v275_v57 = vsel %vm205_vm1, %v3559_v55, 0.0  ;;  %3082 = vrsqrt.f32 %v319_v2  ;;  %vm329_vm4 = vweird.f32 %v319_v2 }
 0x167   :  { %282 = vadd.xlane.f32.xlu1 %v281_v56  ;;  %276 = vadd.xlane.f32.xlu0 %v275_v57 }
 0x16c   :  { %v3083_v3 = vpop.eup %3082 }
 0x16d   :  { %v324_v4 = vmul.f32 %v3083_v3, %v319_v2  ;;  %vm330_vm5 = vweird.f32 %v3083_v3 }
 0x16e   :  { %vm331_vm6 = vmor %vm329_vm4, %vm330_vm5 }
 0x16f   :  { %310 = vadd.xlane.f32.xlu0 %v309_v59  ;;  %v325_v5 = vmul.f32 %v3083_v3, %v324_v4 }
 0x171   :  { %v326_v6 = vmul.f32 0.5, %v325_v5 }
 0x173   :  { %v327_v7 = vsub.f32 1.5, %v326_v6 }
 0x175   :  { %v328_v8 = vmul.f32 %v3083_v3, %v327_v7 }
 0x177   :  { %v332_v10 = vsel %vm331_vm6, %v3083_v3, %v328_v8 }
 0x178   :  { %v363_v11 = vmul.f32 %v332_v10, %v295_v37 }
 0x17a   :  { %v370_v13 = vmul.f32 %v3574_v9, %v363_v11 }
 0x17c   :  { %v377_v14 = vadd.f32 %v3577_v12, %v370_v13 }
 0x17e   :  { %2786 = vmatmul.msk.f32.vlgmr.msra.gmra.mxu2 %vm205_vm1, %v377_v14 }
 0x1da   :  { %v283_v15 = vpop.xlane.xlu1 %282  ;;  %v277_v16 = vpop.xlane.xlu0 %276 }
 0x1db   :  { %v294_v17 = vmul.f32 %v3541_v34, %v283_v15  ;;  %v292_v18 = vmul.f32 %v3541_v34, %v277_v16 }
 0x1dd   :  { %v3585_v19 = vsub.f32 %v3555_v53, %v294_v17  ;;  %v296_v20 = vsub.f32 %v3559_v55, %v292_v18 }
 0x1df   :  { %v302_v21 = vmul.f32 %v3585_v19, %v3585_v19  ;;  %v300_v22 = vmul.f32 %v296_v20, %v296_v20 }
 0x1e1   :  { %v312_v23 = vsel %vm205_vm1, %v302_v21, 0.0  ;;  %v306_v24 = vsel %vm205_vm1, %v300_v22, 0.0 }
 0x1e2   :  { %313 = vadd.xlane.f32.xlu1 %v312_v23  ;;  %307 = vadd.xlane.f32.xlu2 %v306_v24  ;;  %v311_v29 = vpop.xlane.xlu0 %310 }
 0x1e3   :  { %v317_v30 = vmul.f32 %v311_v29, %v3541_v34 }
 0x1e5   :  { %v321_v31 = vadd.f32 1e-05, %v317_v30 }
 0x1e7   :  { %3084 = vrsqrt.f32 %v321_v31  ;;  %vm349_vm7 = vweird.f32 %v321_v31 }
 0x1ed   :  { %v3085_v37 = vpop.eup %3084 }
 0x1ee   :  { %v344_v42 = vmul.f32 %v3085_v37, %v321_v31  ;;  %vm350_vm8 = vweird.f32 %v3085_v37 }
 0x1ef   :  { %vm351_vm10 = vmor %vm349_vm7, %vm350_vm8 }
 0x1f0   :  { %v345_v44 = vmul.f32 %v3085_v37, %v344_v42 }
 0x1f2   :  { %v346_v47 = vmul.f32 0.5, %v345_v44 }
 0x1f4   :  { %v347_v51 = vsub.f32 1.5, %v346_v47 }
 0x1f6   :  { %v348_v58 = vmul.f32 %v3085_v37, %v347_v51 }
 0x1f8   :  { %v352_v0 = vsel %vm351_vm10, %v3085_v37, %v348_v58 }
 0x1f9   :  { %v365_v3 = vmul.f32 %v352_v0, %v3557_v54 }
 0x1fb   :  { %v372_v5 = vmul.f32 %v3574_v9, %v365_v3 }
 0x1fd   :  { %v379_v7 = vadd.f32 %v3577_v12, %v372_v5 }
 0x201   :  { %v418_v26 = vpop.f32.mrf.mxu2 }
 0x202   :  { %v3596_v27 = vadd.f32 %v3593_v25, %v418_v26 }
 0x204   :  { %638 = vrot.lane.b32.xlu2 %v3596_v27, %s3325_s0  ;;  %v3601_v28 = vmul.f32 0.35355338, %v3596_v27 }
 0x20c   :  { %630 = vrot.lane.b32.xlu2 %v3601_v28, %s3326_s5 }
 0x255   :  { %v314_v32 = vpop.xlane.xlu1 %313  ;;  %v308_v33 = vpop.xlane.xlu2 %307 }
 0x256   :  { %v318_v35 = vmul.f32 %v314_v32, %v3541_v34  ;;  %v316_v36 = vmul.f32 %v308_v33, %v3541_v34 }
 0x258   :  { %v322_v38 = vadd.f32 1e-05, %v318_v35  ;;  %v320_v39 = vadd.f32 1e-05, %v316_v36 }
 0x25a   :  { %3086 = vrsqrt.f32 %v322_v38  ;;  %vm339_vm11 = vweird.f32 %v320_v39  ;;  %vm359_vm14 = vweird.f32 %v322_v38 }
 0x25b   :  { %3088 = vrsqrt.f32 %v320_v39 }
 0x25e   :  { %v639_v21 = vpop.permute.xlu2 %638 }
 0x260   :  { %v3087_v45 = vpop.eup %3086 }
 0x261   :  { %v3089_v46 = vpop.eup %3088  ;;  %v354_v48 = vmul.f32 %v3087_v45, %v322_v38  ;;  %vm360_vm13 = vweird.f32 %v3087_v45 }
 0x262   :  { %v334_v49 = vmul.f32 %v3089_v46, %v320_v39  ;;  %vm340_vm9 = vweird.f32 %v3089_v46  ;;  %vm361_vm15 = vmor %vm359_vm14, %vm360_vm13  ;;  %vm1135_vm14 = vcmask 130048  }
 0x263   :  { %v355_v52 = vmul.f32 %v3087_v45, %v354_v48  ;;  %vm341_vm12 = vmor %vm339_vm11, %vm340_vm9 }
 0x264   :  { %v335_v50 = vmul.f32 %v3089_v46, %v334_v49 }
 0x265   :  { %v356_v59 = vmul.f32 0.5, %v355_v52 }
 0x266   :  { %v336_v56 = vmul.f32 0.5, %v335_v50  ;;  %v631_v22 = vpop.permute.xlu2 %630 }
 0x267   :  { %v357_v63 = vsub.f32 1.5, %v356_v59 }
 0x268   :  { %v337_v57 = vsub.f32 1.5, %v336_v56 }
 0x269   :  { %v358_v4 = vmul.f32 %v3087_v45, %v357_v63 }
 0x26a   :  { %v338_v60 = vmul.f32 %v3089_v46, %v337_v57 }
 0x26b   :  { %v362_v6 = vsel %vm361_vm15, %v3087_v45, %v358_v4  ;;  %vm1140_vm15 = vcmask 195584  }
 0x26c   :  { %v342_v61 = vsel %vm341_vm12, %v3089_v46, %v338_v60  ;;  %v366_v8 = vmul.f32 %v362_v6, %v3585_v19 }
 0x26d   :  { %v364_v62 = vmul.f32 %v342_v61, %v296_v20 }
 0x26e   :  { %v373_v10 = vmul.f32 %v3574_v9, %v366_v8  ;;  %v248_v8 = vshra.s32 %v3546_v41, 4 }
 0x26f   :  { %v371_v1 = vmul.f32 %v3574_v9, %v364_v62 }
 0x270   :  { %v380_v11 = vadd.f32 %v3577_v12, %v373_v10 }
 0x271   :  { %v378_v2 = vadd.f32 %v3577_v12, %v371_v1 }
 0x273   :  { %2787 = vmatmul.msk.f32.gmra.mxu2 %vm205_vm1, %v378_v2 }
 0x27b   :  { %2788 = vmatmul.msk.f32.gmra.mxu2 %vm205_vm1, %v379_v7  ;;  %v247_v7 = vand.u32 127, %v229_v40 }
 0x27d   :  { %v252_v10 = vshra.s32 %v247_v7, 4 }
 0x27f   :  { %vm253_vm2 = vcmp.eq.s32.totalorder %v248_v8, %v252_v10 }
 0x283   :  { %2789 = vmatmul.msk.f32.gmra.mxu2 %vm205_vm1, %v380_v11  ;;  %v257_v11 = vand.u32 15, %v247_v7 }
 0x2f6   :  { %v421_v54 = vpop.f32.mrf.mxu2 }
 0x2f7   :  { %v422_v13 = vadd.f32 %v3593_v25, %v421_v54  ;;  %v258_v54 = vand.u32 15, %v3546_v41 }
 0x2f9   :  { %575 = vrot.lane.b32.xlu0 %v422_v13, %s3327_s9  ;;  %640 = vrot.lane.b32.xlu1 %v422_v13, %s3325_s0  ;;  %v3636_v17 = vmul.f32 0.35355338, %v422_v13  ;;  %v3669_v20 = vpack.i.bf16 %v3596_v27, %v422_v13  ;;  %vm262_vm3 = vcmp.le.s32.totalorder %v257_v11, %v258_v54 }
 0x2fa   :  { %vm3722_vm4 = vmand %vm253_vm2, %vm262_vm3 }
 0x2fe   :  { %v424_v14 = vpop.f32.mrf.mxu2 }
 0x2ff   :  { %v425_v15 = vadd.f32 %v3593_v25, %v424_v14  ;;  %v249_v14 = vshra.s32 %v3550_v43, 4 }
 0x301   :  { %510 = vrot.lane.b32.xlu1 %v422_v13, %s3328_s13  ;;  %642 = vrot.lane.b32.xlu0 %v425_v15, %s3325_s0  ;;  %v3643_v18 = vmul.f32 0.35355338, %v425_v15  ;;  %vm254_vm5 = vcmp.eq.s32.totalorder %v249_v14, %v252_v10 }
 0x306   :  { %v427_v9 = vpop.f32.mrf.mxu2 }
 0x307   :  { %v428_v12 = vadd.f32 %v3593_v25, %v427_v9 }
 0x309   :  { %644 = vrot.lane.b32.xlu2 %v428_v12, %s3325_s0  ;;  %512 = vrot.lane.b32.xlu1 %v425_v15, %s3328_s13  ;;  %v3628_v16 = vpack.i.bf16 %v425_v15, %v428_v12  ;;  %v3655_v19 = vmul.f32 0.35355338, %v428_v12 }
 0x30a   :  { %577 = vrot.lane.b32.xlu0 %v425_v15, %s3327_s9 }
 0x311   :  { %508 = vrot.lane.b32.xlu2 %v3596_v27, %s3328_s13  ;;  %573 = vrot.lane.b32.xlu1 %v3596_v27, %s3327_s9 }
 0x312   :  { %579 = vrot.lane.b32.xlu0 %v428_v12, %s3327_s9 }
 0x319   :  { %514 = vrot.lane.b32.xlu2 %v428_v12, %s3328_s13  ;;  %565 = vrot.lane.b32.xlu1 %v3601_v28, %s3329_s17 }
 0x31a   :  { %632 = vrot.lane.b32.xlu0 %v3636_v17, %s3326_s5 }
 0x321   :  { %500 = vrot.lane.b32.xlu2 %v3601_v28, %s3330_s21  ;;  %567 = vrot.lane.b32.xlu1 %v3636_v17, %s3329_s17 }
 0x322   :  { %634 = vrot.lane.b32.xlu0 %v3643_v18, %s3326_s5 }
 0x329   :  { %502 = vrot.lane.b32.xlu2 %v3636_v17, %s3330_s21  ;;  %442 = vrot.lane.b32.xlu1 %v425_v15, %s3331_s29  ;;  %v259_v15 = vand.u32 15, %v3550_v43 }
 0x32a   :  { %444 = vrot.lane.b32.xlu0 %v428_v12, %s3331_s29 }
 0x32b   :  { %vm263_vm6 = vcmp.le.s32.totalorder %v257_v11, %v259_v15 }
 0x32c   :  { %vm3740_vm7 = vmand %vm254_vm5, %vm263_vm6 }
 0x331   :  { %636 = vrot.lane.b32.xlu2 %v3655_v19, %s3326_s5  ;;  %440 = vrot.lane.b32.xlu1 %v422_v13, %s3331_s29 }
 0x332   :  { %504 = vrot.lane.b32.xlu0 %v3643_v18, %s3330_s21 }
 0x339   :  { %571 = vrot.lane.b32.xlu1 %v3655_v19, %s3329_s17  ;;  %569 = vrot.lane.b32.xlu2 %v3643_v18, %s3329_s17 }
 0x33a   :  { %438 = vrot.lane.b32.xlu0 %v3596_v27, %s3331_s29 }
 0x341   :  { %2981 = vrot.lane.b32.xlu1 %v3628_v16, %s3332_s3  ;;  %506 = vrot.lane.b32.xlu2 %v3655_v19, %s3330_s21 }
 0x342   :  { %2986 = vrot.lane.b32.xlu0 %v3669_v20, %s3333_s8 }
 0x349   :  { %2976 = vrot.lane.b32.xlu2 %v3628_v16, %s3333_s8 }
 0x34a   :  { %2991 = vrot.lane.b32.xlu0 %v3628_v16, %s3334_s14 }
 0x352   :  { %2996 = vrot.lane.b32.xlu0 %v3669_v20, %s3332_s3 }
 0x363   :  { %v645_v23 = vpop.permute.xlu2 %644 }
 0x364   :  { %2814 = vmatpush.xpose.msk.msrb.mxu2 %vm446_vm0, %v645_v23 }
 0x36b   :  { %v641_v24 = vpop.permute.xlu1 %640  ;;  %v509_v25 = vpop.permute.xlu2 %508 }
 0x36c   :  { %v576_v26 = vpop.permute.xlu0 %575 }
 0x373   :  { %v511_v27 = vpop.permute.xlu1 %510  ;;  %v515_v29 = vpop.permute.xlu2 %514 }
 0x374   :  { %v643_v30 = vpop.permute.xlu0 %642  ;;  %2798 = vmatpush.xpose.msk.msrb.mxu1 %vm446_vm0, %v515_v29 }
 0x375   :  { %2815 = vmatpush.xpose.msk.msrb.mxu2 %vm446_vm0, %v643_v30 }
 0x379   :  { %2816 = vmatpush.xpose.msk.msrb.mxu2 %vm446_vm0, %v641_v24 }
 0x37b   :  { %v501_v31 = vpop.permute.xlu2 %500  ;;  %v513_v32 = vpop.permute.xlu1 %512 }
 0x37c   :  { %v578_v33 = vpop.permute.xlu0 %577  ;;  %2799 = vmatpush.xpose.msk.msrb.mxu1 %vm446_vm0, %v513_v32 }
 0x37d   :  { %2817 = vmatpush.xpose.msk.msrb.mxu2 %vm446_vm0, %v639_v21 }
 0x380   :  { %2818 = vmatmul.msk.f32.vlgmr.msrb.gmra.mxu2 %vm446_vm0, %v631_v22  ;;  %2800 = vmatpush.xpose.msk.msrb.mxu1 %vm446_vm0, %v511_v27  ;;  %v244_v27 = vadd.s32 16, %v3546_v41 }
 0x382   :  { %v250_v30 = vshra.s32 %v244_v27, 4 }
 0x383   :  { %v503_v35 = vpop.permute.xlu2 %502  ;;  %v574_v36 = vpop.permute.xlu1 %573 }
 0x384   :  { %v580_v37 = vpop.permute.xlu0 %579  ;;  %2801 = vmatpush.xpose.msk.msrb.mxu1 %vm446_vm0, %v509_v25  ;;  %vm255_vm8 = vcmp.eq.s32.totalorder %v250_v30, %v252_v10 }
 0x385   :  { %2806 = vmatpush.xpose.msk.msrb.mxu0 %vm446_vm0, %v580_v37 }
 0x387   :  { %2802 = vmatmul.msk.f32.vlgmr.msrb.gmra.mxu1 %vm446_vm0, %v501_v31  ;;  %v260_v31 = vand.u32 15, %v244_v27 }
 0x389   :  { %2807 = vmatpush.xpose.msk.msrb.mxu0 %vm446_vm0, %v578_v33  ;;  %vm264_vm9 = vcmp.le.s32.totalorder %v257_v11, %v260_v31 }
 0x38a   :  { %vm3764_vm10 = vmand %vm255_vm8, %vm264_vm9 }
 0x38b   :  { %v637_v38 = vpop.permute.xlu2 %636  ;;  %v566_v39 = vpop.permute.xlu1 %565 }
 0x38c   :  { %v633_v42 = vpop.permute.xlu0 %632 }
 0x38d   :  { %2808 = vmatpush.xpose.msk.msrb.mxu0 %vm446_vm0, %v576_v26  ;;  %2819 = vmatmul.msk.f32.gmra.mxu2 %vm446_vm0, %v633_v42 }
 0x38f   :  { %2803 = vmatmul.msk.f32.gmra.mxu1 %vm446_vm0, %v503_v35  ;;  %v245_v35 = vadd.s32 24, %v3546_v41 }
 0x391   :  { %2809 = vmatpush.xpose.msk.msrb.mxu0 %vm446_vm0, %v574_v36 }
 0x393   :  { %v568_v44 = vpop.permute.xlu1 %567  ;;  %v570_v45 = vpop.permute.xlu2 %569 }
 0x394   :  { %2810 = vmatmul.msk.f32.vlgmr.msrb.gmra.mxu0 %vm446_vm0, %v566_v39  ;;  %v635_v46 = vpop.permute.xlu0 %634  ;;  %v261_v39 = vand.u32 15, %v245_v35 }
 0x395   :  { %2820 = vmatmul.msk.f32.gmra.mxu2 %vm446_vm0, %v635_v46 }
 0x396   :  { %vm265_vm12 = vcmp.le.s32.totalorder %v257_v11, %v261_v39 }
 0x39b   :  { %v443_v47 = vpop.permute.xlu1 %442  ;;  %v507_v48 = vpop.permute.xlu2 %506 }
 0x39c   :  { %2811 = vmatmul.msk.f32.gmra.mxu0 %vm446_vm0, %v568_v44  ;;  %v445_v49 = vpop.permute.xlu0 %444 }
 0x39d   :  { %2790 = vmatpush.xpose.msk.msra.mxu3 %vm446_vm0, %v445_v49  ;;  %2821 = vmatmul.msk.f32.gmra.mxu2 %vm446_vm0, %v637_v38  ;;  %v251_v38 = vshra.s32 %v245_v35, 4 }
 0x39f   :  { %vm256_vm11 = vcmp.eq.s32.totalorder %v251_v38, %v252_v10 }
 0x3a0   :  { %vm3774_vm13 = vmand %vm256_vm11, %vm265_vm12 }
 0x3a1   :  { %2791 = vmatpush.xpose.msk.msra.mxu3 %vm446_vm0, %v443_v47 }
 0x3a3   :  { %v441_v50 = vpop.permute.xlu1 %440  ;;  %v2977_v51 = vpop.permute.xlu2 %2976 }
 0x3a4   :  { %v2978_v52 = vunpack.i.l.bf16 %v2977_v51  ;;  %2812 = vmatmul.msk.f32.gmra.mxu0 %vm446_vm0, %v570_v45  ;;  %v505_v56 = vpop.permute.xlu0 %504  ;;  %v2979_v57 = vunpack.i.h.bf16 %v2977_v51 }
 0x3a5   :  { %2792 = vmatpush.xpose.msk.msra.mxu3 %vm446_vm0, %v441_v50  ;;  %2804 = vmatmul.msk.f32.gmra.mxu1 %vm446_vm0, %v505_v56 }
 0x3a6   :  { %1066 = vmatpush.msra.mxu2 %v2978_v52 }
 0x3a8   :  { %1067 = vmatpush.msra.mxu2 %v2979_v57 }
 0x3ab   :  { %v572_v58 = vpop.permute.xlu1 %571 }
 0x3ac   :  { %v439_v59 = vpop.permute.xlu0 %438  ;;  %2813 = vmatmul.msk.f32.gmra.mxu0 %vm446_vm0, %v572_v58 }
 0x3ad   :  { %2793 = vmatpush.xpose.msk.msra.mxu3 %vm446_vm0, %v439_v59  ;;  %2805 = vmatmul.msk.f32.gmra.mxu1 %vm446_vm0, %v507_v48 }
 0x3b0   :  { %2794 = vmatmul.msk.f32.vlgmr.msra.gmra.mxu3 %vm446_vm0, %v3601_v28 }
 0x3b3   :  { %v2982_v60 = vpop.permute.xlu1 %2981 }
 0x3b4   :  { %v2983_v61 = vunpack.i.l.bf16 %v2982_v60  ;;  %v2987_v62 = vpop.permute.xlu0 %2986  ;;  %v2984_v0 = vunpack.i.h.bf16 %v2982_v60 }
 0x3b5   :  { %v2988_v63 = vunpack.i.l.bf16 %v2987_v62  ;;  %v2989_v1 = vunpack.i.h.bf16 %v2987_v62 }
 0x3b6   :  { %960 = vmatpush.msra.mxu1 %v2983_v61 }
 0x3b7   :  { %1068 = vmatpush.msra.mxu2 %v2988_v63 }
 0x3b8   :  { %2795 = vmatmul.msk.f32.gmra.mxu3 %vm446_vm0, %v3636_v17  ;;  %961 = vmatpush.msra.mxu1 %v2984_v0 }
 0x3b9   :  { %1069 = vmatpush.msra.mxu2 %v2989_v1 }
 0x3bc   :  { %v2992_v2 = vpop.permute.xlu0 %2991 }
 0x3bd   :  { %v2993_v3 = vunpack.i.l.bf16 %v2992_v2  ;;  %v2994_v4 = vunpack.i.h.bf16 %v2992_v2 }
 0x3bf   :  { %1013 = vmatpush.msra.mxu0 %v2993_v3 }
 0x3c0   :  { %2796 = vmatmul.msk.f32.gmra.mxu3 %vm446_vm0, %v3643_v18 }
 0x3c1   :  { %1014 = vmatpush.msra.mxu0 %v2994_v4 }
 0x3c4   :  { %v2997_v28 = vpop.permute.xlu0 %2996 }
 0x3c5   :  { %v2998_v5 = vunpack.i.l.bf16 %v2997_v28  ;;  %v2999_v6 = vunpack.i.h.bf16 %v2997_v28 }
 0x3c7   :  { %962 = vmatpush.msra.mxu1 %v2998_v5 }
 0x3c8   :  { %2797 = vmatmul.msk.f32.gmra.mxu3 %vm446_vm0, %v3655_v19 }
 0x3c9   :  { %963 = vmatpush.msra.mxu1 %v2999_v6 }
 0x403   :  { %v679_v9 = vpop.f32.mrf.mxu2 }
 0x404   :  { %v3730_v40 = vsel %vm3722_vm4, %v679_v9, -1e+30  ;;  %v549_v12 = vpop.f32.mrf.mxu1 }
 0x405   :  { %v3734_v17 = vsel %vm3722_vm4, %v549_v12, -1e+30  ;;  %v731_v18 = vsel %vm205_vm1, %v3730_v40, -inf }
 0x406   :  { %732 = vmax.xlane.f32.xlu0 %v731_v18  ;;  %v707_v19 = vsel %vm205_vm1, %v3734_v17, -inf }
 0x407   :  { %708 = vmax.xlane.f32.xlu2 %v707_v19 }
 0x40c   :  { %v552_v21 = vpop.f32.mrf.mxu1 }
 0x40d   :  { %v3746_v22 = vsel %vm3740_vm7, %v552_v21, -1e+30 }
 0x40e   :  { %v710_v23 = vsel %vm205_vm1, %v3746_v22, -inf }
 0x40f   :  { %711 = vmax.xlane.f32.xlu2 %v710_v23 }
 0x410   :  { %v682_v50 = vpop.f32.mrf.mxu2 }
 0x411   :  { %v614_v24 = vpop.f32.mrf.mxu0  ;;  %v3792_v52 = vsel %vm3740_vm7, %v682_v50, -1e+30 }
 0x412   :  { %v3752_v25 = vsel %vm3722_vm4, %v614_v24, -1e+30  ;;  %v734_v59 = vsel %vm205_vm1, %v3792_v52, -inf }
 0x413   :  { %v719_v26 = vsel %vm205_vm1, %v3752_v25, -inf }
 0x414   :  { %720 = vmax.xlane.f32.xlu1 %v719_v26 }
 0x418   :  { %v685_v61 = vpop.f32.mrf.mxu2 }
 0x419   :  { %v617_v29 = vpop.f32.mrf.mxu0  ;;  %v3804_v62 = vsel %vm3764_vm10, %v685_v61, -1e+30 }
 0x41a   :  { %v3759_v32 = vsel %vm3740_vm7, %v617_v29, -1e+30  ;;  %v737_v1 = vsel %vm205_vm1, %v3804_v62, -inf }
 0x41b   :  { %v722_v33 = vsel %vm205_vm1, %v3759_v32, -inf }
 0x41c   :  { %723 = vmax.xlane.f32.xlu1 %v722_v33 }
 0x420   :  { %v688_v11 = vpop.f32.mrf.mxu2 }
 0x421   :  { %v620_v37 = vpop.f32.mrf.mxu0  ;;  %v3834_v54 = vsel %vm3774_vm13, %v688_v11, -1e+30 }
 0x422   :  { %v3770_v42 = vsel %vm3764_vm10, %v620_v37, -1e+30  ;;  %v555_v58 = vpop.f32.mrf.mxu1  ;;  %v740_v14 = vsel %vm205_vm1, %v3834_v54, -inf }
 0x423   :  { %v725_v44 = vsel %vm205_vm1, %v3770_v42, -inf  ;;  %v3808_v63 = vsel %vm3764_vm10, %v555_v58, -1e+30 }
 0x424   :  { %726 = vmax.xlane.f32.xlu1 %v725_v44  ;;  %v713_v2 = vsel %vm205_vm1, %v3808_v63, -inf }
 0x429   :  { %v623_v41 = vpop.f32.mrf.mxu0 }
 0x42a   :  { %v3780_v46 = vsel %vm3774_vm13, %v623_v41, -1e+30  ;;  %v558_v3 = vpop.f32.mrf.mxu1 }
 0x42b   :  { %v728_v47 = vsel %vm205_vm1, %v3780_v46, -inf  ;;  %v3816_v4 = vsel %vm3774_vm13, %v558_v3, -1e+30 }
 0x42c   :  { %729 = vmax.xlane.f32.xlu1 %v728_v47  ;;  %v716_v7 = vsel %vm205_vm1, %v3816_v4, -inf }
 0x433   :  { %v484_v48 = vpop.f32.mrf.mxu3 }
 0x434   :  { %v3786_v49 = vsel %vm3722_vm4, %v484_v48, -1e+30 }
 0x435   :  { %v695_v51 = vsel %vm205_vm1, %v3786_v49, -inf }
 0x436   :  { %696 = vmax.xlane.f32.xlu0 %v695_v51 }
 0x43b   :  { %v487_v56 = vpop.f32.mrf.mxu3 }
 0x43c   :  { %v3796_v57 = vsel %vm3740_vm7, %v487_v56, -1e+30 }
 0x43d   :  { %v698_v60 = vsel %vm205_vm1, %v3796_v57, -inf }
 0x43e   :  { %735 = vmax.xlane.f32.xlu0 %v734_v59  ;;  %699 = vmax.xlane.f32.xlu2 %v698_v60 }
 0x443   :  { %v490_v0 = vpop.f32.mrf.mxu3 }
 0x444   :  { %v3820_v28 = vsel %vm3764_vm10, %v490_v0, -1e+30 }
 0x445   :  { %v701_v8 = vsel %vm205_vm1, %v3820_v28, -inf }
 0x446   :  { %738 = vmax.xlane.f32.xlu0 %v737_v1  ;;  %714 = vmax.xlane.f32.xlu2 %v713_v2 }
 0x44b   :  { %v493_v5 = vpop.f32.mrf.mxu3 }
 0x44c   :  { %v3824_v6 = vsel %vm3774_vm13, %v493_v5, -1e+30 }
 0x44d   :  { %v704_v10 = vsel %vm205_vm1, %v3824_v6, -inf }
 0x44e   :  { %717 = vmax.xlane.f32.xlu2 %v716_v7  ;;  %702 = vmax.xlane.f32.xlu0 %v701_v8 }
 0x44f   :  { %705 = vmax.xlane.f32.xlu1 %v704_v10 }
 0x456   :  { %741 = vmax.xlane.f32.xlu0 %v740_v14 }
 0x479   :  { %v733_v15 = vpop.xlane.xlu0 %732 }
 0x47a   :  { %v709_v9 = vpop.xlane.xlu2 %708  ;;  %v755_v18 = vsub.f32 %v3730_v40, %v733_v15 }
 0x47b   :  { %v747_v12 = vsub.f32 %v3734_v17, %v709_v9 }
 0x47c   :  { %v783_v21 = vmul.f32 1.442695, %v755_v18 }
 0x47d   :  { %v767_v19 = vmul.f32 1.442695, %v747_v12 }
 0x47f   :  { %3090 = vpow2.f32 %v767_v19 }
 0x480   :  { %3092 = vpow2.f32 %v783_v21 }
 0x482   :  { %v712_v26 = vpop.xlane.xlu2 %711 }
 0x483   :  { %v748_v30 = vsub.f32 %v3746_v22, %v712_v26 }
 0x485   :  { %v3840_v23 = vpop.eup %3090  ;;  %v769_v40 = vmul.f32 1.442695, %v748_v30 }
 0x486   :  { %v803_v24 = vsel %vm205_vm1, %v3840_v23, 0.0  ;;  %v3846_v17 = vpop.eup %3092 }
 0x487   :  { %v721_v27 = vpop.xlane.xlu1 %720  ;;  %804 = vadd.xlane.f32.xlu1 %v803_v24  ;;  %v827_v33 = vsel %vm205_vm1, %v3846_v17, 0.0 }
 0x488   :  { %v751_v29 = vsub.f32 %v3752_v25, %v721_v27 }
 0x48a   :  { %v775_v31 = vmul.f32 1.442695, %v751_v29 }
 0x48c   :  { %3094 = vpow2.f32 %v775_v31 }
 0x48d   :  { %3096 = vpow2.f32 %v769_v40 }
 0x48f   :  { %v724_v35 = vpop.xlane.xlu1 %723  ;;  %828 = vadd.xlane.f32.xlu1 %v827_v33 }
 0x490   :  { %v752_v37 = vsub.f32 %v3759_v32, %v724_v35 }
 0x492   :  { %v3851_v38 = vpop.eup %3094  ;;  %v777_v39 = vmul.f32 1.442695, %v752_v37 }
 0x493   :  { %v815_v25 = vsel %vm205_vm1, %v3851_v38, 0.0  ;;  %v3855_v22 = vpop.eup %3096 }
 0x494   :  { %3098 = vpow2.f32 %v777_v39  ;;  %816 = vadd.xlane.f32.xlu0 %v815_v25  ;;  %v806_v41 = vsel %vm205_vm1, %v3855_v22, 0.0 }
 0x497   :  { %v727_v32 = vpop.xlane.xlu1 %726 }
 0x498   :  { %v753_v51 = vsub.f32 %v3770_v42, %v727_v32 }
 0x49a   :  { %v3857_v44 = vpop.eup %3098  ;;  %v779_v58 = vmul.f32 1.442695, %v753_v51 }
 0x49b   :  { %v818_v47 = vsel %vm205_vm1, %v3857_v44, 0.0 }
 0x49c   :  { %807 = vadd.xlane.f32.xlu0 %v806_v41  ;;  %819 = vadd.xlane.f32.xlu1 %v818_v47 }
 0x49f   :  { %v730_v42 = vpop.xlane.xlu1 %729 }
 0x4a9   :  { %v697_v48 = vpop.xlane.xlu0 %696 }
 0x4aa   :  { %v743_v50 = vsub.f32 %v3786_v49, %v697_v48 }
 0x4ac   :  { %v759_v56 = vmul.f32 1.442695, %v743_v50 }
 0x4ae   :  { %3100 = vpow2.f32 %v759_v56 }
 0x4af   :  { %3102 = vpow2.f32 %v779_v58 }
 0x4b1   :  { %v700_v59 = vpop.xlane.xlu2 %699  ;;  %v736_v60 = vpop.xlane.xlu0 %735 }
 0x4b2   :  { %v756_v61 = vsub.f32 %v3792_v52, %v736_v60  ;;  %v754_v52 = vsub.f32 %v3780_v46, %v730_v42  ;;  %v744_v37 = vsub.f32 %v3796_v57, %v700_v59 }
 0x4b4   :  { %v3866_v0 = vpop.eup %3100  ;;  %v785_v1 = vmul.f32 1.442695, %v756_v61  ;;  %v781_v15 = vmul.f32 1.442695, %v754_v52  ;;  %v761_v39 = vmul.f32 1.442695, %v744_v37 }
 0x4b5   :  { %v791_v2 = vsel %vm205_vm1, %v3866_v0, 0.0  ;;  %v3870_v5 = vpop.eup %3102 }
 0x4b6   :  { %792 = vadd.xlane.f32.xlu0 %v791_v2  ;;  %3104 = vpow2.f32 %v785_v1  ;;  %v821_v11 = vsel %vm205_vm1, %v3870_v5, 0.0 }
 0x4b9   :  { %v715_v3 = vpop.xlane.xlu2 %714  ;;  %v739_v49 = vpop.xlane.xlu0 %738 }
 0x4ba   :  { %v757_v7 = vsub.f32 %v3804_v62, %v739_v49 }
 0x4bc   :  { %v787_v8 = vmul.f32 1.442695, %v757_v7  ;;  %v3873_v10 = vpop.eup %3104 }
 0x4bd   :  { %v830_v14 = vsel %vm205_vm1, %v3873_v10, 0.0 }
 0x4be   :  { %822 = vadd.xlane.f32.xlu0 %v821_v11  ;;  %3106 = vpow2.f32 %v787_v8  ;;  %831 = vadd.xlane.f32.xlu2 %v830_v14 }
 0x4bf   :  { %3108 = vpow2.f32 %v781_v15 }
 0x4c1   :  { %v718_v9 = vpop.xlane.xlu2 %717  ;;  %v703_v12 = vpop.xlane.xlu0 %702 }
 0x4c2   :  { %v750_v18 = vsub.f32 %v3816_v4, %v718_v9  ;;  %v706_v35 = vpop.xlane.xlu1 %705  ;;  %v745_v56 = vsub.f32 %v3820_v28, %v703_v12 }
 0x4c3   :  { %v746_v25 = vsub.f32 %v3824_v6, %v706_v35 }
 0x4c4   :  { %v773_v62 = vmul.f32 1.442695, %v750_v18  ;;  %v3881_v19 = vpop.eup %3106  ;;  %v763_v60 = vmul.f32 1.442695, %v745_v56 }
 0x4c5   :  { %v833_v46 = vsel %vm205_vm1, %v3881_v19, 0.0  ;;  %v3886_v26 = vpop.eup %3108  ;;  %v765_v32 = vmul.f32 1.442695, %v746_v25 }
 0x4c6   :  { %3110 = vpow2.f32 %v773_v62  ;;  %834 = vadd.xlane.f32.xlu1 %v833_v46  ;;  %v824_v30 = vsel %vm205_vm1, %v3886_v26, 0.0 }
 0x4c9   :  { %v742_v21 = vpop.xlane.xlu0 %741 }
 0x4ca   :  { %v758_v24 = vsub.f32 %v3834_v54, %v742_v21  ;;  %v749_v54 = vsub.f32 %v3808_v63, %v715_v3 }
 0x4cc   :  { %v3888_v27 = vpop.eup %3110  ;;  %v789_v29 = vmul.f32 1.442695, %v758_v24  ;;  %v771_v33 = vmul.f32 1.442695, %v749_v54 }
 0x4cd   :  { %v812_v4 = vsel %vm205_vm1, %v3888_v27, 0.0 }
 0x4ce   :  { %3112 = vpow2.f32 %v789_v29  ;;  %813 = vadd.xlane.f32.xlu0 %v812_v4  ;;  %825 = vadd.xlane.f32.xlu1 %v824_v30 }
 0x4cf   :  { %3114 = vpow2.f32 %v771_v33 }
 0x4d4   :  { %v3894_v31 = vpop.eup %3112 }
 0x4d5   :  { %v836_v40 = vsel %vm205_vm1, %v3894_v31, 0.0  ;;  %v3907_v47 = vpop.eup %3114 }
 0x4d6   :  { %3001 = vrot.lane.b32.xlu2 %v3669_v20, %s3334_s14  ;;  %837 = vadd.xlane.f32.xlu1 %v836_v40 }
 0x4e2   :  { %3011 = vrot.lane.b32.xlu0 %v3669_v20, %s3335_s27  ;;  %v809_v20 = vsel %vm205_vm1, %v3907_v47, 0.0 }
 0x4ef   :  { %3006 = vrot.lane.b32.xlu1 %v3628_v16, %s3335_s27 }
 0x4fa   :  { %v805_v41 = vpop.xlane.xlu1 %804 }
 0x4fb   :  { %3116 = vrcp.f32 %v805_v41 }
 0x4fc   :  { %3118 = vpow2.f32 %v761_v39 }
 0x4fd   :  { %3120 = vpow2.f32 %v765_v32 }
 0x4ff   :  { %810 = vadd.xlane.f32.xlu2 %v809_v20 }
 0x501   :  { %v3117_v63 = vpop.eup %3116 }
 0x502   :  { %v859_v16 = vmul.f32 %v3117_v63, %v3840_v23  ;;  %v829_v48 = vpop.xlane.xlu1 %828  ;;  %v3912_v57 = vpop.eup %3118 }
 0x503   :  { %3122 = vrcp.f32 %v829_v48  ;;  %v794_v6 = vsel %vm205_vm1, %v3912_v57, 0.0  ;;  %v3917_v51 = vpop.eup %3120 }
 0x504   :  { %2826 = vmatmul.msk.f32.vlgmr.msra.gmra.mxu1 %vm205_vm1, %v859_v16  ;;  %v800_v23 = vsel %vm205_vm1, %v3917_v51, 0.0  ;;  %3124 = vpow2.f32 %v763_v60 }
 0x507   :  { %v817_v50 = vpop.xlane.xlu0 %816  ;;  %795 = vadd.xlane.f32.xlu2 %v794_v6 }
 0x509   :  { %v3123_v58 = vpop.eup %3122 }
 0x50a   :  { %v867_v59 = vmul.f32 %v3123_v58, %v3846_v17  ;;  %v3924_v1 = vpop.eup %3124 }
 0x50b   :  { %v797_v28 = vsel %vm205_vm1, %v3924_v1, 0.0 }
 0x50c   :  { %801 = vadd.xlane.f32.xlu0 %v800_v23  ;;  %2834 = vmatmul.msk.f32.vlgmr.msra.gmra.mxu2 %vm205_vm1, %v867_v59 }
 0x50f   :  { %v808_v61 = vpop.xlane.xlu0 %807  ;;  %v820_v17 = vpop.xlane.xlu1 %819 }
 0x510   :  { %3126 = vrcp.f32 %v808_v61 }
 0x516   :  { %v3127_v2 = vpop.eup %3126 }
 0x517   :  { %v860_v3 = vmul.f32 %v3127_v2, %v3855_v22 }
 0x519   :  { %798 = vadd.xlane.f32.xlu1 %v797_v28  ;;  %2827 = vmatmul.msk.f32.gmra.mxu1 %vm205_vm1, %v860_v3  ;;  %v1148_v28 = vld [vmem:[%s3399_s19 + $0x18] sm:$0xff] }
 0x529   :  { %v793_v42 = vpop.xlane.xlu0 %792 }
 0x531   :  { %v832_v49 = vpop.xlane.xlu2 %831  ;;  %v823_v18 = vpop.xlane.xlu0 %822 }
 0x532   :  { %3128 = vrcp.f32 %v832_v49  ;;  %v1146_v49 = vld [vmem:[%s3399_s19 + $0x8] sm:$0xff] }
 0x533   :  { %3130 = vrcp.f32 %v817_v50 }
 0x538   :  { %v3129_v7 = vpop.eup %3128 }
 0x539   :  { %v3002_v8 = vpop.permute.xlu2 %3001  ;;  %v835_v52 = vpop.xlane.xlu1 %834  ;;  %v868_v11 = vmul.f32 %v3129_v7, %v3873_v10 }
 0x53a   :  { %v3131_v14 = vpop.eup %3130  ;;  %v3003_v15 = vunpack.i.l.bf16 %v3002_v8  ;;  %3132 = vrcp.f32 %v835_v52  ;;  %v3004_v22 = vunpack.i.h.bf16 %v3002_v8 }
 0x53b   :  { %2835 = vmatmul.msk.f32.gmra.mxu2 %vm205_vm1, %v868_v11  ;;  %3134 = vrcp.f32 %v820_v17  ;;  %v863_v9 = vmul.f32 %v3131_v14, %v3851_v38  ;;  %v1147_v17 = vld [vmem:[%s3399_s19 + $0x10] sm:$0xff] }
 0x53c   :  { %1015 = vmatpush.msra.mxu0 %v3003_v15  ;;  %3136 = vrcp.f32 %v823_v18 }
 0x53e   :  { %1016 = vmatpush.msra.mxu0 %v3004_v22 }
 0x53f   :  { %2830 = vmatmul.msk.f32.vlgmr.msra.gmra.mxu0 %vm205_vm1, %v863_v9 }
 0x540   :  { %v3133_v12 = vpop.eup %3132 }
 0x541   :  { %v826_v62 = vpop.xlane.xlu1 %825  ;;  %v869_v46 = vmul.f32 %v3133_v12, %v3881_v19  ;;  %v3135_v21 = vpop.eup %3134 }
 0x542   :  { %v864_v10 = vmul.f32 %v3135_v21, %v3857_v44  ;;  %v3137_v29 = vpop.eup %3136  ;;  %v814_v44 = vpop.xlane.xlu0 %813 }
 0x543   :  { %2836 = vmatmul.msk.f32.gmra.mxu2 %vm205_vm1, %v869_v46  ;;  %v865_v38 = vmul.f32 %v3137_v29, %v3870_v5 }
 0x547   :  { %2831 = vmatmul.msk.f32.gmra.mxu0 %vm205_vm1, %v864_v10 }
 0x549   :  { %v838_v24 = vpop.xlane.xlu1 %837 }
 0x54a   :  { %3138 = vrcp.f32 %v838_v24 }
 0x54b   :  { %3140 = vrcp.f32 %v826_v62 }
 0x54c   :  { %3142 = vrcp.f32 %v793_v42  ;;  %v1145_v42 = vld [vmem:[%s3399_s19] sm:$0xff]  ;;  %s4614_s19 = sld [smem:[#allocation8_spill]] }
 0x54f   :  { %2832 = vmatmul.msk.f32.gmra.mxu0 %vm205_vm1, %v865_v38 }
 0x550   :  { %v3139_v4 = vpop.eup %3138 }
 0x551   :  { %v870_v30 = vmul.f32 %v3139_v4, %v3894_v31  ;;  %v3141_v19 = vpop.eup %3140 }
 0x552   :  { %v866_v40 = vmul.f32 %v3141_v19, %v3886_v26  ;;  %v3143_v5 = vpop.eup %3142 }
 0x553   :  { %2837 = vmatmul.msk.f32.gmra.mxu2 %vm205_vm1, %v870_v30  ;;  %v855_v31 = vmul.f32 %v3143_v5, %v3866_v0 }
 0x554   :  { %v3012_v35 = vpop.permute.xlu0 %3011 }
 0x555   :  { %v3013_v39 = vunpack.i.l.bf16 %v3012_v35  ;;  %v3014_v25 = vunpack.i.h.bf16 %v3012_v35 }
 0x557   :  { %2833 = vmatmul.msk.f32.gmra.mxu0 %vm205_vm1, %v866_v40 }
 0x561   :  { %v3007_v54 = vpop.permute.xlu1 %3006 }
 0x562   :  { %v3008_v33 = vunpack.i.l.bf16 %v3007_v54  ;;  %v3009_v37 = vunpack.i.h.bf16 %v3007_v54 }
 0x564   :  { %907 = vmatpush.msrb.mxu3 %v3008_v33 }
 0x566   :  { %908 = vmatpush.msrb.mxu3 %v3009_v37 }
 0x568   :  { %909 = vmatpush.msrb.mxu3 %v3013_v39 }
 0x56a   :  { %910 = vmatpush.msrb.mxu3 %v3014_v25 }
 0x56b   :  { %2822 = vmatmul.msk.f32.vlgmr.msrb.gmra.mxu3 %vm205_vm1, %v855_v31 }
 0x56c   :  { %1173 = vmatpush.msra.mxu3 %v1148_v28 }
 0x56e   :  { %1174 = vmatpush.msra.mxu3 %v1147_v17 }
 0x570   :  { %1175 = vmatpush.msra.mxu3 %v1146_v49 }
 0x572   :  { %v811_v26 = vpop.xlane.xlu2 %810  ;;  %1176 = vmatpush.msra.mxu3 %v1145_v42 }
 0x573   :  { %3144 = vrcp.f32 %v811_v26 }
 0x574   :  { %3146 = vrcp.f32 %v814_v44 }
 0x579   :  { %v3145_v41 = vpop.eup %3144 }
 0x57a   :  { %v796_v32 = vpop.xlane.xlu2 %795  ;;  %v861_v20 = vmul.f32 %v3145_v41, %v3907_v47  ;;  %v3147_v63 = vpop.eup %3146  ;;  %v3062_v41 = vld [vmem:[%s3404_s24] ss:$0 sm:$0xff]  ;;  %s4615_s24 = sld [smem:[#allocation7_spill]] }
 0x57b   :  { %3148 = vrcp.f32 %v796_v32  ;;  %v862_v6 = vmul.f32 %v3147_v63, %v3888_v27 }
 0x57c   :  { %2828 = vmatmul.msk.f32.gmra.mxu1 %vm205_vm1, %v861_v20  ;;  %v3262_v20 = vld [vmem:[%s3374_s25] sm:$0xff]  ;;  %s4613_s25 = sld [smem:[#allocation6_spill]] }
 0x57f   :  { %v802_v47 = vpop.xlane.xlu0 %801 }
 0x581   :  { %v965_v16 = vpop.f32.mrf.mxu1  ;;  %v3149_v48 = vpop.eup %3148 }
 0x582   :  { %1087 = vrot.lane.b32.xlu2 %v965_v16, %s3336_s22  ;;  %v856_v0 = vmul.f32 %v3149_v48, %v3912_v57 }
 0x584   :  { %2823 = vmatmul.msk.f32.gmra.mxu3 %vm205_vm1, %v856_v0  ;;  %2829 = vmatmul.msk.f32.gmra.mxu1 %vm205_vm1, %v862_v6 }
 0x58c   :  { %v799_v50 = vpop.xlane.xlu1 %798 }
 0x58d   :  { %3150 = vrcp.f32 %v799_v50 }
 0x58e   :  { %3152 = vrcp.f32 %v802_v47 }
 0x58f   :  { %v1071_v27 = vpop.f32.mrf.mxu2 }
 0x593   :  { %v3151_v56 = vpop.eup %3150 }
 0x594   :  { %v857_v58 = vmul.f32 %v3151_v56, %v3924_v1  ;;  %v3153_v23 = vpop.eup %3152 }
 0x595   :  { %v858_v57 = vmul.f32 %v3153_v23, %v3917_v51 }
 0x596   :  { %2824 = vmatmul.msk.f32.gmra.mxu3 %vm205_vm1, %v857_v58  ;;  %v968_v59 = vpop.f32.mrf.mxu1 }
 0x597   :  { %1089 = vrot.lane.b32.xlu1 %v968_v59, %s3336_s22 }
 0x59e   :  { %2825 = vmatmul.msk.f32.gmra.mxu3 %vm205_vm1, %v858_v57 }
 0x5bc   :  { %v1018_v60 = vpop.f32.mrf.mxu0 }
 0x5bd   :  { %1103 = vrot.lane.b32.xlu2 %v1018_v60, %s3337_s23 }
 0x5be   :  { %v1074_v61 = vpop.f32.mrf.mxu2 }
 0x5c4   :  { %v1021_v1 = vpop.f32.mrf.mxu0 }
 0x5c5   :  { %1105 = vrot.lane.b32.xlu0 %v1021_v1, %s3337_s23  ;;  %1119 = vrot.lane.b32.xlu2 %v1071_v27, %s3338_s26 }
 0x5c6   :  { %v1077_v2 = vpop.f32.mrf.mxu2 }
 0x5cc   :  { %v1024_v8 = vpop.f32.mrf.mxu0 }
 0x5cd   :  { %1123 = vrot.lane.b32.xlu0 %v1077_v2, %s3338_s26 }
 0x5d4   :  { %v1027_v11 = vpop.f32.mrf.mxu0 }
 0x5d6   :  { %v1080_v51 = vpop.f32.mrf.mxu2 }
 0x5d7   :  { %1125 = vrot.lane.b32.xlu0 %v1080_v51, %s3338_s26 }
 0x5dc   :  { %v1088_v52 = vpop.permute.xlu2 %1087 }
 0x5ee   :  { %v912_v15 = vpop.f32.mrf.mxu3 }
 0x5ef   :  { %v1131_v22 = vsel %vm446_vm0, %v912_v15, %v1088_v52 }
 0x5f9   :  { %v971_v3 = vpop.f32.mrf.mxu1 }
 0x5fa   :  { %1091 = vrot.lane.b32.xlu2 %v971_v3, %s3336_s22 }
 0x601   :  { %v974_v7 = vpop.f32.mrf.mxu1 }
 0x602   :  { %1093 = vrot.lane.b32.xlu1 %v974_v7, %s3336_s22  ;;  %1121 = vrot.lane.b32.xlu2 %v1074_v61, %s3338_s26 }
 0x607   :  { %v915_v10 = vpop.f32.mrf.mxu3 }
 0x609   :  { %v1090_v46 = vpop.permute.xlu1 %1089 }
 0x60a   :  { %1107 = vrot.lane.b32.xlu2 %v1024_v8, %s3337_s23  ;;  %v1132_v24 = vsel %vm446_vm0, %v915_v10, %v1090_v46  ;;  %v1308_v46 = vld [vmem:[%s3419_s12 + $0x10] sm:$0xff]  ;;  %v1306_v10 = vld [vmem:[%s3419_s12] sm:$0xff] }
 0x612   :  { %1109 = vrot.lane.b32.xlu2 %v1027_v11, %s3337_s23 }
 0x617   :  { %v1104_v14 = vpop.permute.xlu2 %1103 }
 0x618   :  { %v1136_v9 = vsel %vm1135_vm14, %v1131_v22, %v1104_v14 }
 0x619   :  { %v918_v30 = vpop.f32.mrf.mxu3 }
 0x61f   :  { %v1120_v12 = vpop.permute.xlu2 %1119 }
 0x620   :  { %v1141_v18 = vsel %vm1140_vm15, %v1136_v9, %v1120_v12 }
 0x621   :  { %2838 = vmatmul.msk.f32.vlgmr.msra.gmra.mxu3 %vm205_vm1, %v1141_v18  ;;  %v921_v35 = vpop.f32.mrf.mxu3 }
 0x637   :  { %v1106_v21 = vpop.permute.xlu0 %1105 }
 0x638   :  { %v1137_v29 = vsel %vm1135_vm14, %v1132_v24, %v1106_v21  ;;  %v1307_v21 = vld [vmem:[%s3419_s12 + $0x8] sm:$0xff] }
 0x63f   :  { %v1124_v44 = vpop.permute.xlu0 %1123 }
 0x649   :  { %v1126_v25 = vpop.permute.xlu0 %1125 }
 0x654   :  { %v1092_v62 = vpop.permute.xlu2 %1091 }
 0x655   :  { %v1133_v19 = vsel %vm446_vm0, %v918_v30, %v1092_v62  ;;  %v1309_v62 = vld [vmem:[%s3419_s12 + $0x18] sm:$0xff]  ;;  %s4617_s12 = sld [smem:[#allocation12_spill]] }
 0x656   :  { %1338 = vmatpush.msrb.mxu1 %v1309_v62 }
 0x658   :  { %1339 = vmatpush.msrb.mxu1 %v1308_v46 }
 0x65a   :  { %1340 = vmatpush.msrb.mxu1 %v1307_v21 }
 0x65c   :  { %v1122_v38 = vpop.permute.xlu2 %1121  ;;  %1341 = vmatpush.msrb.mxu1 %v1306_v10 }
 0x65d   :  { %v1142_v4 = vsel %vm1140_vm15, %v1137_v29, %v1122_v38 }
 0x65e   :  { %2839 = vmatmul.msk.f32.gmra.mxu3 %vm205_vm1, %v1142_v4 }
 0x664   :  { %v1108_v40 = vpop.permute.xlu2 %1107 }
 0x665   :  { %v1138_v54 = vsel %vm1135_vm14, %v1133_v19, %v1108_v40 }
 0x666   :  { %v1143_v33 = vsel %vm1140_vm15, %v1138_v54, %v1124_v44 }
 0x667   :  { %2840 = vmatmul.msk.f32.gmra.mxu3 %vm205_vm1, %v1143_v33  ;;  %v4038_v33 = vld [vmem:[%s3409_s30] ss:$0 sm:$0xff]  ;;  %s4616_s30 = sld [smem:[#allocation9_spill]] }
 0x66c   :  { %v1110_v5 = vpop.permute.xlu2 %1109 }
 0x674   :  { %v1094_v37 = vpop.permute.xlu1 %1093 }
 0x675   :  { %v1134_v39 = vsel %vm446_vm0, %v921_v35, %v1094_v37 }
 0x676   :  { %v1139_v31 = vsel %vm1135_vm14, %v1134_v39, %v1110_v5  ;;  %v4041_v5 = vld [vmem:[%s4613_s25] ss:$0 sm:$0xff] }
 0x677   :  { %v1144_v26 = vsel %vm1140_vm15, %v1139_v31, %v1126_v25 }
 0x678   :  { %2841 = vmatmul.msk.f32.gmra.mxu3 %vm205_vm1, %v1144_v26 }
 0x6a4   :  { %v1178_v32 = vpop.f32.mrf.mxu3 }
 0x6a5   :  { %v1190_v63 = vadd.f32 %v3262_v20, %v1178_v32 }
 0x6a7   :  { %v3990_v16 = vadd.f32 %v3062_v41, %v1190_v63 }
 0x6a9   :  { %v1204_v48 = vsel %vm205_vm1, %v3990_v16, 0.0 }
 0x6aa   :  { %1205 = vadd.xlane.f32.xlu1 %v1204_v48 }
 0x6e1   :  { %v1181_v0 = vpop.f32.mrf.mxu3 }
 0x6e2   :  { %v1191_v6 = vadd.f32 %v1181_v0, %v3559_v55 }
 0x6e4   :  { %v3995_v50 = vadd.f32 %v3062_v41, %v1191_v6 }
 0x6e6   :  { %v1207_v47 = vsel %vm205_vm1, %v3995_v50, 0.0 }
 0x6e7   :  { %1208 = vadd.xlane.f32.xlu2 %v1207_v47 }
 0x6ea   :  { %v1184_v56 = vpop.f32.mrf.mxu3 }
 0x6eb   :  { %v1192_v58 = vadd.f32 %v3262_v20, %v1184_v56 }
 0x6ed   :  { %v3999_v59 = vadd.f32 %v3062_v41, %v1192_v58 }
 0x6ef   :  { %v1210_v23 = vsel %vm205_vm1, %v3999_v59, 0.0 }
 0x6f0   :  { %1211 = vadd.xlane.f32.xlu0 %v1210_v23 }
 0x6fb   :  { %v1187_v57 = vpop.f32.mrf.mxu3 }
 0x6fc   :  { %v1193_v27 = vadd.f32 %v1187_v57, %v3555_v53 }
 0x6fe   :  { %v4004_v60 = vadd.f32 %v3062_v41, %v1193_v27 }
 0x700   :  { %v1213_v55 = vsel %vm205_vm1, %v4004_v60, 0.0 }
 0x701   :  { %1214 = vadd.xlane.f32.xlu1 %v1213_v55 }
 0x71d   :  { %v1206_v61 = vpop.xlane.xlu1 %1205 }
 0x71e   :  { %v1216_v1 = vmul.f32 %v1206_v61, %v3541_v34 }
 0x720   :  { %v1220_v2 = vsub.f32 %v3990_v16, %v1216_v1  ;;  %v1406_v1 = vld [vmem:[%s4614_s19 + $0x78] sm:$0xff] }
 0x721   :  { %1407 = vmatpush.msrb.mxu0 %v1406_v1  ;;  %2907 = vmatpush.msrb.mxu2 %v1406_v1 }
 0x722   :  { %v1224_v51 = vmul.f32 %v1220_v2, %v1220_v2 }
 0x724   :  { %v1228_v3 = vsel %vm205_vm1, %v1224_v51, 0.0 }
 0x725   :  { %1229 = vadd.xlane.f32.xlu2 %v1228_v3 }
 0x75a   :  { %v1209_v28 = vpop.xlane.xlu2 %1208 }
 0x75b   :  { %v1217_v17 = vmul.f32 %v1209_v28, %v3541_v34  ;;  %v1404_v28 = vld [vmem:[%s4614_s19 + $0x68] sm:$0xff] }
 0x75d   :  { %v4013_v53 = vsub.f32 %v3995_v50, %v1217_v17 }
 0x75f   :  { %v1225_v49 = vmul.f32 %v4013_v53, %v4013_v53 }
 0x761   :  { %v1231_v42 = vsel %vm205_vm1, %v1225_v49, 0.0 }
 0x762   :  { %1232 = vadd.xlane.f32.xlu0 %v1231_v42 }
 0x763   :  { %v1212_v7 = vpop.xlane.xlu0 %1211 }
 0x764   :  { %v1218_v8 = vmul.f32 %v1212_v7, %v3541_v34 }
 0x766   :  { %v4020_v52 = vsub.f32 %v3999_v59, %v1218_v8  ;;  %v1403_v8 = vld [vmem:[%s4614_s19 + $0x60] sm:$0xff] }
 0x768   :  { %v1226_v11 = vmul.f32 %v4020_v52, %v4020_v52 }
 0x76a   :  { %v1234_v14 = vsel %vm205_vm1, %v1226_v11, 0.0 }
 0x76b   :  { %1235 = vadd.xlane.f32.xlu1 %v1234_v14 }
 0x774   :  { %v1215_v15 = vpop.xlane.xlu1 %1214 }
 0x775   :  { %v1219_v22 = vmul.f32 %v1215_v15, %v3541_v34 }
 0x777   :  { %v4027_v9 = vsub.f32 %v4004_v60, %v1219_v22 }
 0x779   :  { %v1227_v12 = vmul.f32 %v4027_v9, %v4027_v9 }
 0x77b   :  { %v1237_v18 = vsel %vm205_vm1, %v1227_v12, 0.0 }
 0x77c   :  { %1238 = vadd.xlane.f32.xlu2 %v1237_v18 }
 0x798   :  { %v1230_v24 = vpop.xlane.xlu2 %1229 }
 0x799   :  { %v1240_v29 = vmul.f32 %v1230_v24, %v3541_v34 }
 0x79b   :  { %v1244_v38 = vadd.f32 1e-05, %v1240_v29 }
 0x79d   :  { %3154 = vrsqrt.f32 %v1244_v38  ;;  %vm1254_vm3 = vweird.f32 %v1244_v38 }
 0x7a3   :  { %v3155_v4 = vpop.eup %3154 }
 0x7a4   :  { %v1249_v30 = vmul.f32 %v3155_v4, %v1244_v38  ;;  %vm1255_vm2 = vweird.f32 %v3155_v4 }
 0x7a5   :  { %vm1256_vm5 = vmor %vm1254_vm3, %vm1255_vm2 }
 0x7a6   :  { %v1250_v19 = vmul.f32 %v3155_v4, %v1249_v30  ;;  %v1402_v30 = vld [vmem:[%s4614_s19 + $0x58] sm:$0xff] }
 0x7a8   :  { %v1251_v40 = vmul.f32 0.5, %v1250_v19  ;;  %v1401_v19 = vld [vmem:[%s4614_s19 + $0x50] sm:$0xff] }
 0x7aa   :  { %v1252_v44 = vsub.f32 1.5, %v1251_v40  ;;  %v1400_v40 = vld [vmem:[%s4614_s19 + $0x48] sm:$0xff] }
 0x7ac   :  { %v1253_v54 = vmul.f32 %v3155_v4, %v1252_v44  ;;  %v1398_v44 = vld [vmem:[%s4614_s19 + $0x38] sm:$0xff] }
 0x7ae   :  { %v1257_v35 = vsel %vm1256_vm5, %v3155_v4, %v1253_v54  ;;  %v1397_v54 = vld [vmem:[%s4614_s19 + $0x30] sm:$0xff] }
 0x7af   :  { %v1288_v37 = vmul.f32 %v1257_v35, %v1220_v2  ;;  %v1405_v2 = vld [vmem:[%s4614_s19 + $0x70] sm:$0xff]  ;;  %v1395_v35 = vld [vmem:[%s4614_s19 + $0x20] sm:$0xff] }
 0x7b0   :  { %1408 = vmatpush.msrb.mxu0 %v1405_v2  ;;  %2908 = vmatpush.msrb.mxu2 %v1405_v2 }
 0x7b1   :  { %v1295_v39 = vmul.f32 %v4038_v33, %v1288_v37  ;;  %v1394_v37 = vld [vmem:[%s4614_s19 + $0x18] sm:$0xff] }
 0x7b2   :  { %1409 = vmatpush.msrb.mxu0 %v1404_v28  ;;  %2909 = vmatpush.msrb.mxu2 %v1404_v28 }
 0x7b3   :  { %v1302_v25 = vadd.f32 %v4041_v5, %v1295_v39  ;;  %v1392_v39 = vld [vmem:[%s4614_s19 + $0x8] sm:$0xff] }
 0x7b4   :  { %1410 = vmatpush.msrb.mxu0 %v1403_v8  ;;  %2910 = vmatpush.msrb.mxu2 %v1403_v8 }
 0x7b5   :  { %2842 = vmatmul.msk.f32.vlgmr.msrb.gmra.mxu1 %vm205_vm1, %v1302_v25  ;;  %v1391_v25 = vld [vmem:[%s4614_s19] sm:$0xff] }
 0x7b6   :  { %1411 = vmatpush.msrb.mxu0 %v1402_v30  ;;  %2911 = vmatpush.msrb.mxu2 %v1402_v30 }
 0x7b8   :  { %1412 = vmatpush.msrb.mxu0 %v1401_v19  ;;  %2912 = vmatpush.msrb.mxu2 %v1401_v19 }
 0x7ba   :  { %1413 = vmatpush.msrb.mxu0 %v1400_v40  ;;  %2913 = vmatpush.msrb.mxu2 %v1400_v40  ;;  %v3066_v40 = vld [vmem:[%s4616_s30] ss:$0 sm:$0xff] }
 0x7d5   :  { %v1233_v31 = vpop.xlane.xlu0 %1232 }
 0x7d6   :  { %v1241_v26 = vmul.f32 %v1233_v31, %v3541_v34  ;;  %v3065_v31 = vld [vmem:[%s4615_s24] ss:$0 sm:$0xff] }
 0x7d8   :  { %v1245_v41 = vadd.f32 1e-05, %v1241_v26 }
 0x7da   :  { %3156 = vrsqrt.f32 %v1245_v41  ;;  %vm1264_vm8 = vweird.f32 %v1245_v41 }
 0x7de   :  { %v1236_v32 = vpop.xlane.xlu1 %1235 }
 0x7df   :  { %v1242_v20 = vmul.f32 %v1236_v32, %v3541_v34 }
 0x7e0   :  { %v3157_v63 = vpop.eup %3156 }
 0x7e1   :  { %v1259_v48 = vmul.f32 %v3157_v63, %v1245_v41  ;;  %v1246_v0 = vadd.f32 1e-05, %v1242_v20  ;;  %vm1265_vm6 = vweird.f32 %v3157_v63 }
 0x7e2   :  { %vm1266_vm9 = vmor %vm1264_vm8, %vm1265_vm6 }
 0x7e3   :  { %v1260_v6 = vmul.f32 %v3157_v63, %v1259_v48  ;;  %3158 = vrsqrt.f32 %v1246_v0  ;;  %vm1274_vm12 = vweird.f32 %v1246_v0 }
 0x7e5   :  { %v1261_v47 = vmul.f32 0.5, %v1260_v6 }
 0x7e7   :  { %v1262_v56 = vsub.f32 1.5, %v1261_v47 }
 0x7e9   :  { %v3159_v58 = vpop.eup %3158  ;;  %v1263_v23 = vmul.f32 %v3157_v63, %v1262_v56 }
 0x7ea   :  { %v1269_v57 = vmul.f32 %v3159_v58, %v1246_v0  ;;  %vm1275_vm11 = vweird.f32 %v3159_v58 }
 0x7eb   :  { %v1267_v27 = vsel %vm1266_vm9, %v3157_v63, %v1263_v23  ;;  %vm1276_vm2 = vmor %vm1274_vm12, %vm1275_vm11 }
 0x7ec   :  { %v1270_v55 = vmul.f32 %v3159_v58, %v1269_v57  ;;  %v1289_v61 = vmul.f32 %v1267_v27, %v4013_v53 }
 0x7ee   :  { %v1271_v51 = vmul.f32 0.5, %v1270_v55  ;;  %v1296_v3 = vmul.f32 %v4038_v33, %v1289_v61 }
 0x7ef   :  { %v1239_v17 = vpop.xlane.xlu2 %1238 }
 0x7f0   :  { %v1272_v49 = vsub.f32 1.5, %v1271_v51  ;;  %v1243_v42 = vmul.f32 %v1239_v17, %v3541_v34  ;;  %v1303_v7 = vadd.f32 %v4041_v5, %v1296_v3 }
 0x7f2   :  { %v1273_v53 = vmul.f32 %v3159_v58, %v1272_v49  ;;  %v1247_v11 = vadd.f32 1e-05, %v1243_v42  ;;  %2843 = vmatmul.msk.f32.gmra.mxu1 %vm205_vm1, %v1303_v7 }
 0x7f4   :  { %v1277_v14 = vsel %vm1276_vm2, %v3159_v58, %v1273_v53  ;;  %3160 = vrsqrt.f32 %v1247_v11  ;;  %vm1284_vm5 = vweird.f32 %v1247_v11 }
 0x7f5   :  { %v1290_v15 = vmul.f32 %v1277_v14, %v4020_v52 }
 0x7f7   :  { %v1297_v22 = vmul.f32 %v4038_v33, %v1290_v15 }
 0x7f9   :  { %v1304_v12 = vadd.f32 %v4041_v5, %v1297_v22 }
 0x7fa   :  { %v3161_v18 = vpop.eup %3160 }
 0x7fb   :  { %v1279_v62 = vmul.f32 %v3161_v18, %v1247_v11  ;;  %2844 = vmatmul.msk.f32.gmra.mxu1 %vm205_vm1, %v1304_v12  ;;  %vm1285_vm3 = vweird.f32 %v3161_v18 }
 0x7fc   :  { %vm1286_vm6 = vmor %vm1284_vm5, %vm1285_vm3 }
 0x7fd   :  { %v1280_v46 = vmul.f32 %v3161_v18, %v1279_v62 }
 0x7ff   :  { %v1281_v21 = vmul.f32 0.5, %v1280_v46 }
 0x801   :  { %v1282_v10 = vsub.f32 1.5, %v1281_v21 }
 0x803   :  { %v1283_v24 = vmul.f32 %v3161_v18, %v1282_v10 }
 0x805   :  { %v1287_v52 = vsel %vm1286_vm6, %v3161_v18, %v1283_v24 }
 0x806   :  { %v1291_v29 = vmul.f32 %v1287_v52, %v4027_v9  ;;  %v1399_v9 = vld [vmem:[%s4614_s19 + $0x40] sm:$0xff] }
 0x807   :  { %1414 = vmatpush.msrb.mxu0 %v1399_v9  ;;  %2914 = vmatpush.msrb.mxu2 %v1399_v9 }
 0x808   :  { %v1298_v38 = vmul.f32 %v4038_v33, %v1291_v29  ;;  %v1396_v33 = vld [vmem:[%s4614_s19 + $0x28] sm:$0xff] }
 0x809   :  { %1415 = vmatpush.msrb.mxu0 %v1398_v44  ;;  %2915 = vmatpush.msrb.mxu2 %v1398_v44 }
 0x80a   :  { %v1305_v4 = vadd.f32 %v4041_v5, %v1298_v38  ;;  %v1393_v5 = vld [vmem:[%s4614_s19 + $0x10] sm:$0xff] }
 0x80b   :  { %1416 = vmatpush.msrb.mxu0 %v1397_v54  ;;  %2916 = vmatpush.msrb.mxu2 %v1397_v54 }
 0x80c   :  { %2845 = vmatmul.msk.f32.gmra.mxu1 %vm205_vm1, %v1305_v4 }
 0x80d   :  { %1417 = vmatpush.msrb.mxu0 %v1396_v33  ;;  %2917 = vmatpush.msrb.mxu2 %v1396_v33 }
 0x80f   :  { %1418 = vmatpush.msrb.mxu0 %v1395_v35  ;;  %2918 = vmatpush.msrb.mxu2 %v1395_v35 }
 0x811   :  { %1419 = vmatpush.msrb.mxu0 %v1394_v37  ;;  %2919 = vmatpush.msrb.mxu2 %v1394_v37 }
 0x813   :  { %1420 = vmatpush.msrb.mxu0 %v1393_v5  ;;  %2920 = vmatpush.msrb.mxu2 %v1393_v5 }
 0x815   :  { %1421 = vmatpush.msrb.mxu0 %v1392_v39  ;;  %2921 = vmatpush.msrb.mxu2 %v1392_v39 }
 0x817   :  { %1422 = vmatpush.msrb.mxu0 %v1391_v25  ;;  %2922 = vmatpush.msrb.mxu2 %v1391_v25 }
 0x832   :  { %v1343_v26 = vpop.f32.mrf.mxu1 }
 0x833   :  { %v1344_v41 = vadd.f32 %v3065_v31, %v1343_v26 }
 0x835   :  { %v1359_v32 = vmul.f32 0.044715, %v1344_v41  ;;  %v1355_v47 = vmul.f32 0.5, %v1344_v41 }
 0x837   :  { %v1363_v20 = vmul.f32 %v1359_v32, %v1344_v41 }
 0x839   :  { %v1367_v63 = vmul.f32 %v1363_v20, %v1344_v41 }
 0x83b   :  { %v1371_v48 = vadd.f32 %v1367_v63, %v1344_v41 }
 0x83d   :  { %v1375_v0 = vmul.f32 0.7978846, %v1371_v48 }
 0x83f   :  { %3162 = vtanh.f32 %v1375_v0 }
 0x845   :  { %v3163_v6 = vpop.eup %3162 }
 0x846   :  { %v1383_v56 = vadd.f32 1.0, %v3163_v6 }
 0x848   :  { %v1387_v58 = vmul.f32 %v1383_v56, %v1355_v47 }
 0x84a   :  { %1423 = vmatmul.f32.vlgmr.msrb.gmra.mxu0 %v1387_v58 }
 0x86f   :  { %v1346_v23 = vpop.f32.mrf.mxu1 }
 0x870   :  { %v1347_v57 = vadd.f32 %v3065_v31, %v1346_v23 }
 0x872   :  { %v1360_v27 = vmul.f32 0.044715, %v1347_v57  ;;  %v1356_v8 = vmul.f32 0.5, %v1347_v57 }
 0x874   :  { %v1364_v55 = vmul.f32 %v1360_v27, %v1347_v57 }
 0x876   :  { %v1368_v61 = vmul.f32 %v1364_v55, %v1347_v57 }
 0x878   :  { %v1349_v1 = vpop.f32.mrf.mxu1  ;;  %v1372_v2 = vadd.f32 %v1368_v61, %v1347_v57 }
 0x879   :  { %v1350_v51 = vadd.f32 %v3065_v31, %v1349_v1 }
 0x87a   :  { %v1376_v3 = vmul.f32 0.7978846, %v1372_v2 }
 0x87b   :  { %v1361_v28 = vmul.f32 0.044715, %v1350_v51  ;;  %v1357_v62 = vmul.f32 0.5, %v1350_v51 }
 0x87c   :  { %3164 = vtanh.f32 %v1376_v3 }
 0x87d   :  { %v1365_v17 = vmul.f32 %v1361_v28, %v1350_v51 }
 0x87f   :  { %v1369_v49 = vmul.f32 %v1365_v17, %v1350_v51 }
 0x881   :  { %v1373_v42 = vadd.f32 %v1369_v49, %v1350_v51  ;;  %v1555_v49 = vld [vmem:[%s4617_s12 + $0x18] sm:$0xff] }
 0x882   :  { %v3165_v7 = vpop.eup %3164  ;;  %1584 = vmatpush.msra.mxu2 %v1555_v49 }
 0x883   :  { %v1384_v53 = vadd.f32 1.0, %v3165_v7  ;;  %v1377_v11 = vmul.f32 0.7978846, %v1373_v42  ;;  %v1554_v42 = vld [vmem:[%s4617_s12 + $0x10] sm:$0xff]  ;;  %v1553_v7 = vld [vmem:[%s4617_s12 + $0x8] sm:$0xff] }
 0x884   :  { %1585 = vmatpush.msra.mxu2 %v1554_v42 }
 0x885   :  { %v1388_v14 = vmul.f32 %v1384_v53, %v1356_v8  ;;  %3166 = vtanh.f32 %v1377_v11  ;;  %v1552_v8 = vld [vmem:[%s4617_s12] sm:$0xff] }
 0x886   :  { %1586 = vmatpush.msra.mxu2 %v1553_v7 }
 0x887   :  { %1426 = vmatmul.f32.gmra.mxu0 %v1388_v14 }
 0x888   :  { %1587 = vmatpush.msra.mxu2 %v1552_v8 }
 0x889   :  { %v1352_v15 = vpop.f32.mrf.mxu1 }
 0x88a   :  { %v1353_v22 = vadd.f32 %v3065_v31, %v1352_v15 }
 0x88b   :  { %v3167_v12 = vpop.eup %3166 }
 0x88c   :  { %v1362_v18 = vmul.f32 0.044715, %v1353_v22  ;;  %v1385_v46 = vadd.f32 1.0, %v3167_v12  ;;  %v1358_v4 = vmul.f32 0.5, %v1353_v22 }
 0x88e   :  { %v1366_v21 = vmul.f32 %v1362_v18, %v1353_v22  ;;  %v1389_v10 = vmul.f32 %v1385_v46, %v1357_v62 }
 0x890   :  { %v1370_v24 = vmul.f32 %v1366_v21, %v1353_v22  ;;  %1429 = vmatmul.f32.gmra.mxu0 %v1389_v10  ;;  %v3067_v21 = vld [vmem:[%s4618_s1] ss:$0 sm:$0xff] }
 0x892   :  { %v1374_v52 = vadd.f32 %v1370_v24, %v1353_v22 }
 0x894   :  { %v1378_v29 = vmul.f32 0.7978846, %v1374_v52  ;;  %v3068_v52 = vld [vmem:[%s4619_s28] ss:$0 sm:$0xff] }
 0x896   :  { %3168 = vtanh.f32 %v1378_v29 }
 0x89c   :  { %v3169_v38 = vpop.eup %3168 }
 0x89d   :  { %v1386_v30 = vadd.f32 1.0, %v3169_v38 }
 0x89f   :  { %v1390_v19 = vmul.f32 %v1386_v30, %v1358_v4 }
 0x8a1   :  { %1432 = vmatmul.f32.vlgmr.msrb.gmra.mxu2 %v1390_v19 }
 0x8c7   :  { %v1424_v9 = vpop.f32.mrf.mxu0 }
 0x8c8   :  { %v1436_v44 = vadd.f32 %v1424_v9, %v3990_v16 }
 0x8ca   :  { %v4080_v54 = vadd.f32 %v3066_v40, %v1436_v44 }
 0x8cc   :  { %v1450_v33 = vsel %vm205_vm1, %v4080_v54, 0.0 }
 0x8cd   :  { %1451 = vadd.xlane.f32.xlu0 %v1450_v33 }
 0x904   :  { %v1427_v35 = vpop.f32.mrf.mxu0 }
 0x905   :  { %v1437_v37 = vadd.f32 %v1427_v35, %v3995_v50 }
 0x907   :  { %v4085_v5 = vadd.f32 %v3066_v40, %v1437_v37 }
 0x909   :  { %v1453_v39 = vsel %vm205_vm1, %v4085_v5, 0.0 }
 0x90a   :  { %1454 = vadd.xlane.f32.xlu1 %v1453_v39 }
 0x90d   :  { %v1430_v25 = vpop.f32.mrf.mxu0 }
 0x90e   :  { %v1438_v31 = vadd.f32 %v1430_v25, %v3999_v59 }
 0x910   :  { %v4090_v26 = vadd.f32 %v3066_v40, %v1438_v31 }
 0x912   :  { %v1456_v16 = vsel %vm205_vm1, %v4090_v26, 0.0 }
 0x913   :  { %1457 = vadd.xlane.f32.xlu2 %v1456_v16 }
 0x924   :  { %v1433_v41 = vpop.f32.mrf.mxu2 }
 0x925   :  { %v1439_v32 = vadd.f32 %v1433_v41, %v4004_v60 }
 0x927   :  { %v4095_v20 = vadd.f32 %v3066_v40, %v1439_v32 }
 0x929   :  { %v1459_v50 = vsel %vm205_vm1, %v4095_v20, 0.0 }
 0x92a   :  { %1460 = vadd.xlane.f32.xlu0 %v1459_v50 }
 0x940   :  { %v1452_v63 = vpop.xlane.xlu0 %1451 }
 0x941   :  { %v1462_v48 = vmul.f32 %v1452_v63, %v3541_v34 }
 0x943   :  { %v1466_v59 = vsub.f32 %v4080_v54, %v1462_v48 }
 0x945   :  { %v1470_v0 = vmul.f32 %v1466_v59, %v1466_v59 }
 0x947   :  { %v1474_v6 = vsel %vm205_vm1, %v1470_v0, 0.0 }
 0x948   :  { %1475 = vadd.xlane.f32.xlu1 %v1474_v6 }
 0x97d   :  { %v1455_v47 = vpop.xlane.xlu1 %1454 }
 0x97e   :  { %v1463_v56 = vmul.f32 %v1455_v47, %v3541_v34 }
 0x980   :  { %v4104_v60 = vsub.f32 %v4085_v5, %v1463_v56 }
 0x982   :  { %v1471_v58 = vmul.f32 %v4104_v60, %v4104_v60 }
 0x984   :  { %v1477_v23 = vsel %vm205_vm1, %v1471_v58, 0.0 }
 0x985   :  { %1478 = vadd.xlane.f32.xlu2 %v1477_v23 }
 0x986   :  { %v1458_v57 = vpop.xlane.xlu2 %1457 }
 0x987   :  { %v1464_v27 = vmul.f32 %v1458_v57, %v3541_v34 }
 0x989   :  { %v4111_v55 = vsub.f32 %v4090_v26, %v1464_v27 }
 0x98b   :  { %v1472_v61 = vmul.f32 %v4111_v55, %v4111_v55 }
 0x98d   :  { %v1480_v1 = vsel %vm205_vm1, %v1472_v61, 0.0 }
 0x98e   :  { %1481 = vadd.xlane.f32.xlu0 %v1480_v1 }
 0x99d   :  { %v1461_v2 = vpop.xlane.xlu0 %1460 }
 0x99e   :  { %v1465_v51 = vmul.f32 %v1461_v2, %v3541_v34 }
 0x9a0   :  { %v4118_v3 = vsub.f32 %v4095_v20, %v1465_v51 }
 0x9a2   :  { %v1473_v28 = vmul.f32 %v4118_v3, %v4118_v3 }
 0x9a4   :  { %v1483_v17 = vsel %vm205_vm1, %v1473_v28, 0.0 }
 0x9a5   :  { %1484 = vadd.xlane.f32.xlu1 %v1483_v17 }
 0x9bb   :  { %v1476_v53 = vpop.xlane.xlu1 %1475 }
 0x9bc   :  { %v1486_v11 = vmul.f32 %v1476_v53, %v3541_v34  ;;  %v3069_v53 = vld [vmem:[%s4620_s2] ss:$0 sm:$0xff] }
 0x9be   :  { %v1490_v14 = vadd.f32 1e-05, %v1486_v11 }
 0x9c0   :  { %3170 = vrsqrt.f32 %v1490_v14  ;;  %vm1500_vm9 = vweird.f32 %v1490_v14 }
 0x9c6   :  { %v3171_v15 = vpop.eup %3170 }
 0x9c7   :  { %v1495_v22 = vmul.f32 %v3171_v15, %v1490_v14  ;;  %vm1501_vm8 = vweird.f32 %v3171_v15 }
 0x9c8   :  { %vm1502_vm11 = vmor %vm1500_vm9, %vm1501_vm8 }
 0x9c9   :  { %v1496_v12 = vmul.f32 %v3171_v15, %v1495_v22 }
 0x9cb   :  { %v1497_v18 = vmul.f32 0.5, %v1496_v12 }
 0x9cd   :  { %v1498_v62 = vsub.f32 1.5, %v1497_v18 }
 0x9cf   :  { %v1499_v46 = vmul.f32 %v3171_v15, %v1498_v62 }
 0x9d1   :  { %v1503_v10 = vsel %vm1502_vm11, %v3171_v15, %v1499_v46 }
 0x9d2   :  { %v1534_v24 = vmul.f32 %v1503_v10, %v1466_v59 }
 0x9d4   :  { %v1541_v29 = vmul.f32 %v3067_v21, %v1534_v24 }
 0x9d6   :  { %v1548_v38 = vadd.f32 %v3068_v52, %v1541_v29 }
 0x9d8   :  { %2846 = vmatmul.msk.f32.vlgmr.msra.gmra.mxu2 %vm205_vm1, %v1548_v38 }
 0x9f8   :  { %v1479_v4 = vpop.xlane.xlu2 %1478 }
 0x9f9   :  { %v1487_v30 = vmul.f32 %v1479_v4, %v3541_v34 }
 0x9fb   :  { %v1491_v19 = vadd.f32 1e-05, %v1487_v30 }
 0x9fd   :  { %3172 = vrsqrt.f32 %v1491_v19  ;;  %vm1510_vm2 = vweird.f32 %v1491_v19 }
 0xa01   :  { %v1482_v40 = vpop.xlane.xlu0 %1481 }
 0xa02   :  { %v1488_v9 = vmul.f32 %v1482_v40, %v3541_v34 }
 0xa03   :  { %v3173_v44 = vpop.eup %3172 }
 0xa04   :  { %v1505_v33 = vmul.f32 %v3173_v44, %v1491_v19  ;;  %v1492_v35 = vadd.f32 1e-05, %v1488_v9  ;;  %vm1511_vm12 = vweird.f32 %v3173_v44 }
 0xa05   :  { %vm1512_vm3 = vmor %vm1510_vm2, %vm1511_vm12 }
 0xa06   :  { %v1506_v37 = vmul.f32 %v3173_v44, %v1505_v33  ;;  %3174 = vrsqrt.f32 %v1492_v35  ;;  %vm1520_vm6 = vweird.f32 %v1492_v35 }
 0xa08   :  { %v1507_v39 = vmul.f32 0.5, %v1506_v37 }
 0xa0a   :  { %v1508_v25 = vsub.f32 1.5, %v1507_v39 }
 0xa0c   :  { %v3175_v31 = vpop.eup %3174  ;;  %v1509_v16 = vmul.f32 %v3173_v44, %v1508_v25 }
 0xa0d   :  { %v1515_v41 = vmul.f32 %v3175_v31, %v1492_v35  ;;  %vm1521_vm5 = vweird.f32 %v3175_v31 }
 0xa0e   :  { %v1513_v32 = vsel %vm1512_vm3, %v3173_v44, %v1509_v16  ;;  %vm1522_vm8 = vmor %vm1520_vm6, %vm1521_vm5 }
 0xa0f   :  { %v1516_v50 = vmul.f32 %v3175_v31, %v1515_v41  ;;  %v1535_v63 = vmul.f32 %v1513_v32, %v4104_v60 }
 0xa11   :  { %v1517_v48 = vmul.f32 0.5, %v1516_v50  ;;  %v1542_v59 = vmul.f32 %v3067_v21, %v1535_v63 }
 0xa13   :  { %v1518_v0 = vsub.f32 1.5, %v1517_v48  ;;  %v1549_v6 = vadd.f32 %v3068_v52, %v1542_v59 }
 0xa15   :  { %v1519_v47 = vmul.f32 %v3175_v31, %v1518_v0  ;;  %2847 = vmatmul.msk.f32.gmra.mxu2 %vm205_vm1, %v1549_v6 }
 0xa17   :  { %v1523_v56 = vsel %vm1522_vm8, %v3175_v31, %v1519_v47 }
 0xa18   :  { %v1485_v58 = vpop.xlane.xlu1 %1484  ;;  %v1536_v23 = vmul.f32 %v1523_v56, %v4111_v55 }
 0xa19   :  { %v1489_v57 = vmul.f32 %v1485_v58, %v3541_v34 }
 0xa1a   :  { %v1543_v27 = vmul.f32 %v3067_v21, %v1536_v23 }
 0xa1b   :  { %v1493_v61 = vadd.f32 1e-05, %v1489_v57 }
 0xa1c   :  { %v1550_v1 = vadd.f32 %v3068_v52, %v1543_v27 }
 0xa1d   :  { %3176 = vrsqrt.f32 %v1493_v61  ;;  %vm1530_vm11 = vweird.f32 %v1493_v61 }
 0xa1e   :  { %2848 = vmatmul.msk.f32.gmra.mxu2 %vm205_vm1, %v1550_v1 }
 0xa23   :  { %v3177_v60 = vpop.eup %3176 }
 0xa24   :  { %v1525_v2 = vmul.f32 %v3177_v60, %v1493_v61  ;;  %vm1531_vm9 = vweird.f32 %v3177_v60 }
 0xa25   :  { %vm1532_vm12 = vmor %vm1530_vm11, %vm1531_vm9  ;;  %vm2613_vm9 = vcmask 256001  }
 0xa26   :  { %v1526_v51 = vmul.f32 %v3177_v60, %v1525_v2 }
 0xa28   :  { %v1527_v28 = vmul.f32 0.5, %v1526_v51 }
 0xa2a   :  { %v1528_v17 = vsub.f32 1.5, %v1527_v28 }
 0xa2c   :  { %v1529_v49 = vmul.f32 %v3177_v60, %v1528_v17 }
 0xa2e   :  { %v1533_v42 = vsel %vm1532_vm12, %v3177_v60, %v1529_v49 }
 0xa2f   :  { %v1537_v55 = vmul.f32 %v1533_v42, %v4118_v3 }
 0xa31   :  { %v1544_v7 = vmul.f32 %v3067_v21, %v1537_v55 }
 0xa33   :  { %v1551_v8 = vadd.f32 %v3068_v52, %v1544_v7 }
 0xa35   :  { %2849 = vmatmul.msk.f32.gmra.mxu2 %vm205_vm1, %v1551_v8 }
 0xa5b   :  { %v1589_v11 = vpop.f32.mrf.mxu2 }
 0xa5c   :  { %v1590_v14 = vadd.f32 %v3069_v53, %v1589_v11 }
 0xa5e   :  { %1808 = vrot.lane.b32.xlu0 %v1590_v14, %s3325_s0  ;;  %v4143_v15 = vmul.f32 0.35355338, %v1590_v14 }
 0xa66   :  { %1678 = vrot.lane.b32.xlu0 %v1590_v14, %s3328_s13 }
 0xa6e   :  { %1800 = vrot.lane.b32.xlu0 %v4143_v15, %s3326_s5 }
 0xa98   :  { %v1592_v22 = vpop.f32.mrf.mxu2 }
 0xa99   :  { %v1593_v12 = vadd.f32 %v3069_v53, %v1592_v22 }
 0xa9b   :  { %1680 = vrot.lane.b32.xlu2 %v1593_v12, %s3328_s13  ;;  %1810 = vrot.lane.b32.xlu1 %v1593_v12, %s3325_s0  ;;  %v4153_v62 = vmul.f32 0.35355338, %v1593_v12  ;;  %v4181_v29 = vpack.i.bf16 %v1590_v14, %v1593_v12 }
 0xaa1   :  { %v1595_v3 = vpop.f32.mrf.mxu2 }
 0xaa2   :  { %v1596_v18 = vadd.f32 %v3069_v53, %v1595_v3 }
 0xaa3   :  { %1745 = vrot.lane.b32.xlu1 %v1593_v12, %s3327_s9 }
 0xaa4   :  { %1682 = vrot.lane.b32.xlu2 %v1596_v18, %s3328_s13  ;;  %1812 = vrot.lane.b32.xlu0 %v1596_v18, %s3325_s0  ;;  %v4157_v10 = vmul.f32 0.35355338, %v1596_v18 }
 0xaab   :  { %1747 = vrot.lane.b32.xlu1 %v1596_v18, %s3327_s9 }
 0xab3   :  { %1802 = vrot.lane.b32.xlu1 %v4153_v62, %s3326_s5 }
 0xab8   :  { %v1598_v46 = vpop.f32.mrf.mxu2 }
 0xab9   :  { %v1599_v21 = vadd.f32 %v3069_v53, %v1598_v46 }
 0xabb   :  { %1814 = vrot.lane.b32.xlu2 %v1599_v21, %s3325_s0  ;;  %1684 = vrot.lane.b32.xlu0 %v1599_v21, %s3328_s13  ;;  %v4163_v24 = vpack.i.bf16 %v1596_v18, %v1599_v21  ;;  %v4174_v52 = vmul.f32 0.35355338, %v1599_v21  ;;  %s4627_s0 = sld [smem:[#allocation19_spill]] }
 0xabc   :  { %1804 = vrot.lane.b32.xlu1 %v4157_v10, %s3326_s5  ;;  %s4630_s13 = sld [smem:[#allocation23_spill]] }
 0xac3   :  { %1743 = vrot.lane.b32.xlu2 %v1590_v14, %s3327_s9  ;;  %1670 = vrot.lane.b32.xlu0 %v4143_v15, %s3330_s21 }
 0xac4   :  { %1615 = vrot.lane.b32.xlu1 %v1599_v21, %s3331_s29 }
 0xacb   :  { %1749 = vrot.lane.b32.xlu2 %v1599_v21, %s3327_s9  ;;  %1672 = vrot.lane.b32.xlu0 %v4153_v62, %s3330_s21  ;;  %s4629_s9 = sld [smem:[#allocation22_spill]] }
 0xacc   :  { %1674 = vrot.lane.b32.xlu1 %v4157_v10, %s3330_s21 }
 0xad0   :  { %v1809_v38 = vpop.permute.xlu0 %1808 }
 0xad3   :  { %1735 = vrot.lane.b32.xlu2 %v4143_v15, %s3329_s17  ;;  %1806 = vrot.lane.b32.xlu0 %v4174_v52, %s3326_s5  ;;  %s4628_s5 = sld [smem:[#allocation21_spill]] }
 0xad4   :  { %1609 = vrot.lane.b32.xlu1 %v1590_v14, %s3331_s29 }
 0xad8   :  { %v1679_v30 = vpop.permute.xlu0 %1678 }
 0xadb   :  { %1737 = vrot.lane.b32.xlu2 %v4153_v62, %s3329_s17  ;;  %1739 = vrot.lane.b32.xlu0 %v4157_v10, %s3329_s17 }
 0xadc   :  { %3026 = vrot.lane.b32.xlu1 %v4181_v29, %s3333_s8 }
 0xae0   :  { %v1801_v9 = vpop.permute.xlu0 %1800 }
 0xae3   :  { %1613 = vrot.lane.b32.xlu2 %v1596_v18, %s3331_s29  ;;  %1676 = vrot.lane.b32.xlu0 %v4174_v52, %s3330_s21  ;;  %s2740_s21 = sshll.u32 %s3522_s20, 4  ;;  %s2741_s21 = int_to_ptr.hbm [resolvable:$true] %s2740_s21 }
 0xaeb   :  { %1611 = vrot.lane.b32.xlu2 %v1593_v12, %s3331_s29  ;;  %3021 = vrot.lane.b32.xlu0 %v4163_v24, %s3332_s3  ;;  %s3275_s29 = sshra.s32 %s2741_s21, 4  ;;  %s3276_s29 = int_to_ptr.hbm [resolvable:$true] %s3275_s29 }
 0xaec   :  { %p3280_p1 = scmp.lt.s32.totalorder %s3276_s29, %s3522_s20 }
 0xaf3   :  { %1741 = vrot.lane.b32.xlu2 %v4174_v52, %s3329_s17  ;;  %3031 = vrot.lane.b32.xlu0 %v4163_v24, %s3334_s14 }
 0xaf5   :  { %v1681_v4 = vpop.permute.xlu2 %1680 }
 0xafb   :  { %3016 = vrot.lane.b32.xlu2 %v4163_v24, %s3333_s8  ;;  %3036 = vrot.lane.b32.xlu0 %v4181_v29, %s3332_s3  ;;  %s3277_s3 = scalar_lea.hbm %s3276_s29, 2  ;;  %s3279_s8 = scalar_lea.hbm %s3522_s20, 2 }
 0xafc   :  { %p3278_p0 = scmp.ne.s32.totalorder %s3276_s29, %s3277_s3  ;;  %p3281_p2 = scmp.lt.s32.totalorder %s3279_s8, %s3277_s3 }
 0xafe   :  { %v1683_v19 = vpop.permute.xlu2 %1682  ;;  %p3282_p3 = por %p3281_p2, %p3280_p1 }
 0xb00   :  { %p3283_p4 = pnand %p3282_p3, %p3278_p0 }
 0xb0d   :  { %v1811_v40 = vpop.permute.xlu1 %1810 }
 0xb15   :  { %v1746_v44 = vpop.permute.xlu1 %1745  ;;  %v1815_v33 = vpop.permute.xlu2 %1814 }
 0xb16   :  { %2874 = vmatpush.xpose.msk.msrb.mxu2 %vm446_vm0, %v1815_v33  ;;  %v1813_v35 = vpop.permute.xlu0 %1812 }
 0xb1a   :  { %2875 = vmatpush.xpose.msk.msrb.mxu2 %vm446_vm0, %v1813_v35 }
 0xb1d   :  { %v1748_v37 = vpop.permute.xlu1 %1747  ;;  %v1744_v39 = vpop.permute.xlu2 %1743 }
 0xb1e   :  { %2876 = vmatpush.xpose.msk.msrb.mxu2 %vm446_vm0, %v1811_v40 }
 0xb22   :  { %2877 = vmatpush.xpose.msk.msrb.mxu2 %vm446_vm0, %v1809_v38 }
 0xb25   :  { %v1803_v25 = vpop.permute.xlu1 %1802  ;;  %v1750_v31 = vpop.permute.xlu2 %1749  ;;  %2878 = vmatmul.msk.f32.vlgmr.msrb.gmra.mxu2 %vm446_vm0, %v1801_v9 }
 0xb26   :  { %2866 = vmatpush.xpose.msk.msra.mxu0 %vm446_vm0, %v1750_v31 }
 0xb2a   :  { %2867 = vmatpush.xpose.msk.msra.mxu0 %vm446_vm0, %v1748_v37 }
 0xb2d   :  { %v1736_v16 = vpop.permute.xlu2 %1735  ;;  %2879 = vmatmul.msk.f32.gmra.mxu2 %vm446_vm0, %v1803_v25  ;;  %v1685_v41 = vpop.permute.xlu0 %1684 }
 0xb2e   :  { %v1805_v32 = vpop.permute.xlu1 %1804  ;;  %2858 = vmatpush.xpose.msk.msra.mxu1 %vm446_vm0, %v1685_v41  ;;  %2868 = vmatpush.xpose.msk.msra.mxu0 %vm446_vm0, %v1746_v44 }
 0xb32   :  { %2859 = vmatpush.xpose.msk.msra.mxu1 %vm446_vm0, %v1683_v19  ;;  %2869 = vmatpush.xpose.msk.msra.mxu0 %vm446_vm0, %v1744_v39 }
 0xb35   :  { %2870 = vmatmul.msk.f32.vlgmr.msra.gmra.mxu0 %vm446_vm0, %v1736_v16  ;;  %v1738_v50 = vpop.permute.xlu2 %1737  ;;  %2880 = vmatmul.msk.f32.gmra.mxu2 %vm446_vm0, %v1805_v32  ;;  %v1671_v63 = vpop.permute.xlu0 %1670 }
 0xb36   :  { %v1616_v48 = vpop.permute.xlu1 %1615  ;;  %2860 = vmatpush.xpose.msk.msra.mxu1 %vm446_vm0, %v1681_v4 }
 0xb37   :  { %2850 = vmatpush.xpose.msk.msrb.mxu3 %vm446_vm0, %v1616_v48 }
 0xb3a   :  { %2861 = vmatpush.xpose.msk.msra.mxu1 %vm446_vm0, %v1679_v30 }
 0xb3d   :  { %2871 = vmatmul.msk.f32.gmra.mxu0 %vm446_vm0, %v1738_v50  ;;  %v1614_v59 = vpop.permute.xlu2 %1613  ;;  %2862 = vmatmul.msk.f32.vlgmr.msra.gmra.mxu1 %vm446_vm0, %v1671_v63  ;;  %v1673_v0 = vpop.permute.xlu0 %1672 }
 0xb3e   :  { %2851 = vmatpush.xpose.msk.msrb.mxu3 %vm446_vm0, %v1614_v59  ;;  %v1675_v6 = vpop.permute.xlu1 %1674 }
 0xb45   :  { %v1612_v47 = vpop.permute.xlu2 %1611  ;;  %2863 = vmatmul.msk.f32.gmra.mxu1 %vm446_vm0, %v1673_v0  ;;  %v1807_v56 = vpop.permute.xlu0 %1806 }
 0xb46   :  { %2852 = vmatpush.xpose.msk.msrb.mxu3 %vm446_vm0, %v1612_v47  ;;  %2881 = vmatmul.msk.f32.gmra.mxu2 %vm446_vm0, %v1807_v56  ;;  %v1610_v58 = vpop.permute.xlu1 %1609 }
 0xb4a   :  { %2853 = vmatpush.xpose.msk.msrb.mxu3 %vm446_vm0, %v1610_v58 }
 0xb4d   :  { %v1742_v23 = vpop.permute.xlu2 %1741  ;;  %2854 = vmatmul.msk.f32.vlgmr.msrb.gmra.mxu3 %vm446_vm0, %v4143_v15  ;;  %2864 = vmatmul.msk.f32.gmra.mxu1 %vm446_vm0, %v1675_v6  ;;  %v1740_v57 = vpop.permute.xlu0 %1739 }
 0xb4e   :  { %2872 = vmatmul.msk.f32.gmra.mxu0 %vm446_vm0, %v1740_v57  ;;  %v3027_v60 = vpop.permute.xlu1 %3026 }
 0xb4f   :  { %v3028_v51 = vunpack.i.l.bf16 %v3027_v60  ;;  %v3029_v28 = vunpack.i.h.bf16 %v3027_v60 }
 0xb55   :  { %v3017_v27 = vpop.permute.xlu2 %3016  ;;  %2855 = vmatmul.msk.f32.gmra.mxu3 %vm446_vm0, %v4153_v62  ;;  %v1677_v61 = vpop.permute.xlu0 %1676 }
 0xb56   :  { %v3018_v1 = vunpack.i.l.bf16 %v3017_v27  ;;  %2865 = vmatmul.msk.f32.gmra.mxu1 %vm446_vm0, %v1677_v61  ;;  %2873 = vmatmul.msk.f32.gmra.mxu0 %vm446_vm0, %v1742_v23  ;;  %v3019_v2 = vunpack.i.h.bf16 %v3017_v27 }
 0xb58   :  { %2236 = vmatpush.msra.mxu2 %v3018_v1 }
 0xb5a   :  { %2237 = vmatpush.msra.mxu2 %v3019_v2 }
 0xb5c   :  { %2238 = vmatpush.msra.mxu2 %v3028_v51 }
 0xb5d   :  { %2856 = vmatmul.msk.f32.gmra.mxu3 %vm446_vm0, %v4157_v10  ;;  %v3022_v17 = vpop.permute.xlu0 %3021 }
 0xb5e   :  { %v3023_v49 = vunpack.i.l.bf16 %v3022_v17  ;;  %2239 = vmatpush.msra.mxu2 %v3029_v28  ;;  %v3024_v42 = vunpack.i.h.bf16 %v3022_v17 }
 0xb60   :  { %2130 = vmatpush.msrb.mxu1 %v3023_v49 }
 0xb62   :  { %2131 = vmatpush.msrb.mxu1 %v3024_v42 }
 0xb65   :  { %2857 = vmatmul.msk.f32.gmra.mxu3 %vm446_vm0, %v4174_v52  ;;  %v3032_v55 = vpop.permute.xlu0 %3031 }
 0xb66   :  { %v3033_v7 = vunpack.i.l.bf16 %v3032_v55  ;;  %v3034_v8 = vunpack.i.h.bf16 %v3032_v55 }
 0xb68   :  { %2183 = vmatpush.msrb.mxu0 %v3033_v7 }
 0xb6a   :  { %2184 = vmatpush.msrb.mxu0 %v3034_v8 }
 0xb6d   :  { %v3037_v53 = vpop.permute.xlu0 %3036 }
 0xb6e   :  { %v3038_v11 = vunpack.i.l.bf16 %v3037_v53  ;;  %v3039_v14 = vunpack.i.h.bf16 %v3037_v53 }
 0xb70   :  { %2132 = vmatpush.msrb.mxu1 %v3038_v11 }
 0xb72   :  { %2133 = vmatpush.msrb.mxu1 %v3039_v14 }
 0xba8   :  { %v1849_v15 = vpop.f32.mrf.mxu2 }
 0xba9   :  { %v4241_v22 = vsel %vm3722_vm4, %v1849_v15, -1e+30 }
 0xbaa   :  { %v1901_v12 = vsel %vm205_vm1, %v4241_v22, -inf }
 0xbab   :  { %1902 = vmax.xlane.f32.xlu1 %v1901_v12 }
 0xbb0   :  { %v1852_v39 = vpop.f32.mrf.mxu2 }
 0xbb1   :  { %v4286_v32 = vsel %vm3740_vm7, %v1852_v39, -1e+30 }
 0xbb2   :  { %v1784_v3 = vpop.f32.mrf.mxu0  ;;  %v1904_v48 = vsel %vm205_vm1, %v4286_v32, -inf }
 0xbb3   :  { %v1796_v18 = vsel %vm3722_vm4, %v1784_v3, -1e+30 }
 0xbb4   :  { %v1889_v62 = vsel %vm205_vm1, %v1796_v18, -inf }
 0xbb5   :  { %1890 = vmax.xlane.f32.xlu2 %v1889_v62 }
 0xbb8   :  { %v1855_v0 = vpop.f32.mrf.mxu2 }
 0xbb9   :  { %v4298_v6 = vsel %vm3764_vm10, %v1855_v0, -1e+30 }
 0xbba   :  { %v1719_v46 = vpop.f32.mrf.mxu1  ;;  %v1787_v52 = vpop.f32.mrf.mxu0  ;;  %v1907_v43 = vsel %vm205_vm1, %v4298_v6, -inf }
 0xbbb   :  { %v4250_v21 = vsel %vm3722_vm4, %v1719_v46, -1e+30  ;;  %v4256_v38 = vsel %vm3740_vm7, %v1787_v52, -1e+30 }
 0xbbc   :  { %v1877_v10 = vsel %vm205_vm1, %v4250_v21, -inf  ;;  %v1892_v19 = vsel %vm205_vm1, %v4256_v38, -inf }
 0xbbd   :  { %1878 = vmax.xlane.f32.xlu0 %v1877_v10 }
 0xbc2   :  { %v1722_v4 = vpop.f32.mrf.mxu1 }
 0xbc3   :  { %v4260_v30 = vsel %vm3740_vm7, %v1722_v4, -1e+30 }
 0xbc4   :  { %v1880_v40 = vsel %vm205_vm1, %v4260_v30, -inf }
 0xbc5   :  { %1893 = vmax.xlane.f32.xlu0 %v1892_v19  ;;  %1881 = vmax.xlane.f32.xlu2 %v1880_v40 }
 0xbc9   :  { %v1858_v60 = vpop.f32.mrf.mxu2 }
 0xbca   :  { %v1725_v63 = vpop.f32.mrf.mxu1  ;;  %v4322_v2 = vsel %vm3774_vm13, %v1858_v60, -1e+30 }
 0xbcb   :  { %v1790_v9 = vpop.f32.mrf.mxu0  ;;  %v4302_v47 = vsel %vm3764_vm10, %v1725_v63, -1e+30  ;;  %v1910_v51 = vsel %vm205_vm1, %v4322_v2, -inf }
 0xbcc   :  { %v4268_v44 = vsel %vm3764_vm10, %v1790_v9, -1e+30  ;;  %v1883_v56 = vsel %vm205_vm1, %v4302_v47, -inf }
 0xbcd   :  { %v1895_v33 = vsel %vm205_vm1, %v4268_v44, -inf }
 0xbce   :  { %1896 = vmax.xlane.f32.xlu0 %v1895_v33 }
 0xbd0   :  { %v1654_v35 = vpop.f32.mrf.mxu3 }
 0xbd1   :  { %v4274_v37 = vsel %vm3722_vm4, %v1654_v35, -1e+30 }
 0xbd2   :  { %v1865_v25 = vsel %vm205_vm1, %v4274_v37, -inf }
 0xbd3   :  { %1866 = vmax.xlane.f32.xlu1 %v1865_v25  ;;  %v1793_v31 = vpop.f32.mrf.mxu0  ;;  %v1728_v58 = vpop.f32.mrf.mxu1 }
 0xbd4   :  { %v4280_v16 = vsel %vm3774_vm13, %v1793_v31, -1e+30  ;;  %v4310_v57 = vsel %vm3774_vm13, %v1728_v58, -1e+30 }
 0xbd5   :  { %v1898_v41 = vsel %vm205_vm1, %v4280_v16, -inf  ;;  %v1886_v61 = vsel %vm205_vm1, %v4310_v57, -inf }
 0xbd6   :  { %1899 = vmax.xlane.f32.xlu0 %v1898_v41 }
 0xbd8   :  { %v1657_v13 = vpop.f32.mrf.mxu3 }
 0xbd9   :  { %v4290_v50 = vsel %vm3740_vm7, %v1657_v13, -1e+30 }
 0xbda   :  { %v1868_v59 = vsel %vm205_vm1, %v4290_v50, -inf }
 0xbdb   :  { %1905 = vmax.xlane.f32.xlu1 %v1904_v48  ;;  %1869 = vmax.xlane.f32.xlu2 %v1868_v59 }
 0xbe0   :  { %v1660_v23 = vpop.f32.mrf.mxu3 }
 0xbe1   :  { %v4314_v27 = vsel %vm3764_vm10, %v1660_v23, -1e+30 }
 0xbe2   :  { %v1871_v1 = vsel %vm205_vm1, %v4314_v27, -inf }
 0xbe3   :  { %1908 = vmax.xlane.f32.xlu1 %v1907_v43  ;;  %1884 = vmax.xlane.f32.xlu2 %v1883_v56 }
 0xbe8   :  { %v1663_v36 = vpop.f32.mrf.mxu3 }
 0xbe9   :  { %v4328_v28 = vsel %vm3774_vm13, %v1663_v36, -1e+30 }
 0xbea   :  { %v1874_v17 = vsel %vm205_vm1, %v4328_v28, -inf }
 0xbeb   :  { %1872 = vmax.xlane.f32.xlu1 %v1871_v1  ;;  %1887 = vmax.xlane.f32.xlu2 %v1886_v61 }
 0xbf3   :  { %1911 = vmax.xlane.f32.xlu1 %v1910_v51 }
 0xbfb   :  { %1875 = vmax.xlane.f32.xlu1 %v1874_v17 }
 0xc1e   :  { %v1903_v7 = vpop.xlane.xlu1 %1902 }
 0xc1f   :  { %v1925_v14 = vsub.f32 %v4241_v22, %v1903_v7 }
 0xc21   :  { %v1953_v12 = vmul.f32 1.442695, %v1925_v14 }
 0xc28   :  { %v1891_v49 = vpop.xlane.xlu2 %1890 }
 0xc29   :  { %v1921_v42 = vsub.f32 %v1796_v18, %v1891_v49 }
 0xc2b   :  { %v1945_v55 = vmul.f32 1.442695, %v1921_v42 }
 0xc2d   :  { %3178 = vpow2.f32 %v1945_v55 }
 0xc30   :  { %v1879_v8 = vpop.xlane.xlu0 %1878 }
 0xc31   :  { %v1917_v53 = vsub.f32 %v4250_v21, %v1879_v8 }
 0xc33   :  { %v4333_v11 = vpop.eup %3178  ;;  %v1937_v15 = vmul.f32 1.442695, %v1917_v53 }
 0xc34   :  { %v1985_v45 = vsel %vm205_vm1, %v4333_v11, 0.0 }
 0xc35   :  { %3180 = vpow2.f32 %v1937_v15  ;;  %1986 = vadd.xlane.f32.xlu1 %v1985_v45 }
 0xc36   :  { %3182 = vpow2.f32 %v1953_v12 }
 0xc38   :  { %v1882_v3 = vpop.xlane.xlu2 %1881  ;;  %v1894_v62 = vpop.xlane.xlu0 %1893 }
 0xc39   :  { %v1922_v18 = vsub.f32 %v4256_v38, %v1894_v62  ;;  %v1918_v21 = vsub.f32 %v4260_v30, %v1882_v3 }
 0xc3b   :  { %v4339_v46 = vpop.eup %3180  ;;  %v1947_v10 = vmul.f32 1.442695, %v1922_v18  ;;  %v1939_v52 = vmul.f32 1.442695, %v1918_v21 }
 0xc3c   :  { %v1973_v22 = vsel %vm205_vm1, %v4339_v46, 0.0  ;;  %v4344_v4 = vpop.eup %3182 }
 0xc3d   :  { %1974 = vadd.xlane.f32.xlu0 %v1973_v22  ;;  %3184 = vpow2.f32 %v1947_v10  ;;  %v1997_v38 = vsel %vm205_vm1, %v4344_v4, 0.0 }
 0xc3e   :  { %3186 = vpow2.f32 %v1939_v52 }
 0xc41   :  { %v1897_v33 = vpop.xlane.xlu0 %1896 }
 0xc42   :  { %v1923_v3 = vsub.f32 %v4268_v44, %v1897_v33 }
 0xc43   :  { %v4346_v19 = vpop.eup %3184 }
 0xc44   :  { %v1988_v40 = vsel %vm205_vm1, %v4346_v19, 0.0  ;;  %v4352_v9 = vpop.eup %3186  ;;  %v1949_v62 = vmul.f32 1.442695, %v1923_v3 }
 0xc45   :  { %1998 = vadd.xlane.f32.xlu0 %v1997_v38  ;;  %1989 = vadd.xlane.f32.xlu1 %v1988_v40  ;;  %v1976_v35 = vsel %vm205_vm1, %v4352_v9, 0.0 }
 0xc46   :  { %v1867_v30 = vpop.xlane.xlu1 %1866 }
 0xc47   :  { %v1913_v61 = vsub.f32 %v4274_v37, %v1867_v30 }
 0xc49   :  { %v1900_v13 = vpop.xlane.xlu0 %1899  ;;  %v1929_v60 = vmul.f32 1.442695, %v1913_v61 }
 0xc4a   :  { %v1924_v56 = vsub.f32 %v4280_v16, %v1900_v13 }
 0xc4c   :  { %v1951_v1 = vmul.f32 1.442695, %v1924_v56 }
 0xc4d   :  { %1977 = vadd.xlane.f32.xlu0 %v1976_v35 }
 0xc4e   :  { %v1906_v39 = vpop.xlane.xlu1 %1905  ;;  %v1870_v25 = vpop.xlane.xlu2 %1869 }
 0xc4f   :  { %v1926_v31 = vsub.f32 %v4286_v32, %v1906_v39  ;;  %v1914_v18 = vsub.f32 %v4290_v50, %v1870_v25 }
 0xc51   :  { %v1955_v41 = vmul.f32 1.442695, %v1926_v31  ;;  %v1931_v21 = vmul.f32 1.442695, %v1914_v18 }
 0xc53   :  { %3188 = vpow2.f32 %v1955_v41 }
 0xc56   :  { %v1909_v63 = vpop.xlane.xlu1 %1908  ;;  %v1885_v48 = vpop.xlane.xlu2 %1884 }
 0xc57   :  { %v1927_v59 = vsub.f32 %v4298_v6, %v1909_v63  ;;  %v1919_v0 = vsub.f32 %v4302_v47, %v1885_v48 }
 0xc59   :  { %v4359_v43 = vpop.eup %3188  ;;  %v1957_v58 = vmul.f32 1.442695, %v1927_v59  ;;  %v1941_v23 = vmul.f32 1.442695, %v1919_v0 }
 0xc5a   :  { %v2000_v32 = vsel %vm205_vm1, %v4359_v43, 0.0 }
 0xc5b   :  { %3190 = vpow2.f32 %v1957_v58  ;;  %2001 = vadd.xlane.f32.xlu2 %v2000_v32 }
 0xc5c   :  { %3192 = vpow2.f32 %v1941_v23 }
 0xc5d   :  { %3194 = vpow2.f32 %v1951_v1 }
 0xc5e   :  { %v1873_v51 = vpop.xlane.xlu1 %1872  ;;  %v1888_v6 = vpop.xlane.xlu2 %1887  ;;  %3196 = vpow2.f32 %v1929_v60 }
 0xc5f   :  { %v1920_v16 = vsub.f32 %v4310_v57, %v1888_v6 }
 0xc61   :  { %v4365_v36 = vpop.eup %3190  ;;  %v1943_v49 = vmul.f32 1.442695, %v1920_v16 }
 0xc62   :  { %v4367_v47 = vpop.eup %3192  ;;  %v2003_v37 = vsel %vm205_vm1, %v4365_v36, 0.0 }
 0xc63   :  { %v1979_v17 = vsel %vm205_vm1, %v4367_v47, 0.0  ;;  %2004 = vadd.xlane.f32.xlu1 %v2003_v37  ;;  %v4374_v55 = vpop.eup %3194  ;;  %3198 = vpow2.f32 %v1943_v49 }
 0xc64   :  { %1980 = vadd.xlane.f32.xlu0 %v1979_v17  ;;  %v4377_v8 = vpop.eup %3196  ;;  %v1994_v57 = vsel %vm205_vm1, %v4374_v55, 0.0 }
 0xc65   :  { %v1961_v14 = vsel %vm205_vm1, %v4377_v8, 0.0 }
 0xc66   :  { %v1912_v42 = vpop.xlane.xlu1 %1911 }
 0xc67   :  { %v1928_v7 = vsub.f32 %v4322_v2, %v1912_v42 }
 0xc69   :  { %v1959_v53 = vmul.f32 1.442695, %v1928_v7  ;;  %v4383_v15 = vpop.eup %3198 }
 0xc6a   :  { %v1982_v12 = vsel %vm205_vm1, %v4383_v15, 0.0 }
 0xc6b   :  { %3200 = vpow2.f32 %v1959_v53  ;;  %1995 = vadd.xlane.f32.xlu1 %v1994_v57 }
 0xc6c   :  { %1962 = vadd.xlane.f32.xlu0 %v1961_v14  ;;  %3202 = vpow2.f32 %v1949_v62 }
 0xc6d   :  { %3204 = vpow2.f32 %v1931_v21 }
 0xc6e   :  { %v1876_v44 = vpop.xlane.xlu1 %1875 }
 0xc6f   :  { %v1916_v40 = vsub.f32 %v4328_v28, %v1876_v44 }
 0xc71   :  { %v4385_v45 = vpop.eup %3200  ;;  %v1935_v50 = vmul.f32 1.442695, %v1916_v40 }
 0xc72   :  { %v2006_v2 = vsel %vm205_vm1, %v4385_v45, 0.0  ;;  %v4399_v10 = vpop.eup %3202 }
 0xc73   :  { %3041 = vrot.lane.b32.xlu2 %v4181_v29, %s3334_s14  ;;  %2007 = vadd.xlane.f32.xlu1 %v2006_v2  ;;  %v1991_v22 = vsel %vm205_vm1, %v4399_v10, 0.0  ;;  %v4403_v52 = vpop.eup %3204 }
 0xc74   :  { %1983 = vadd.xlane.f32.xlu0 %v1982_v12 }
 0xc88   :  { %3051 = vrot.lane.b32.xlu0 %v4181_v29, %s3335_s27  ;;  %v1915_v29 = vsub.f32 %v4314_v27, %v1873_v51 }
 0xc8a   :  { %v1933_v38 = vmul.f32 1.442695, %v1915_v29 }
 0xc8c   :  { %3046 = vrot.lane.b32.xlu1 %v4163_v24, %s3335_s27  ;;  %v1964_v24 = vsel %vm205_vm1, %v4403_v52, 0.0  ;;  %3206 = vpow2.f32 %v1933_v38 }
 0xc8d   :  { %3208 = vpow2.f32 %v1935_v50 }
 0xc92   :  { %v4409_v30 = vpop.eup %3206 }
 0xc93   :  { %v1967_v35 = vsel %vm205_vm1, %v4409_v30, 0.0  ;;  %v4413_v39 = vpop.eup %3208 }
 0xc94   :  { %v1970_v27 = vsel %vm205_vm1, %v4413_v39, 0.0 }
 0xc9c   :  { %1992 = vadd.xlane.f32.xlu2 %v1991_v22 }
 0xca4   :  { %1965 = vadd.xlane.f32.xlu2 %v1964_v24 }
 0xca8   :  { %v1987_v48 = vpop.xlane.xlu1 %1986 }
 0xcb0   :  { %v1975_v33 = vpop.xlane.xlu0 %1974 }
 0xcb1   :  { %3210 = vrcp.f32 %v1975_v33 }
 0xcb2   :  { %1968 = vadd.xlane.f32.xlu0 %v1967_v35 }
 0xcb6   :  { %1971 = vadd.xlane.f32.xlu1 %v1970_v27 }
 0xcb7   :  { %v3211_v25 = vpop.eup %3210 }
 0xcb8   :  { %v2029_v28 = vmul.f32 %v3211_v25, %v4339_v46  ;;  %v1999_v31 = vpop.xlane.xlu0 %1998  ;;  %v1990_v56 = vpop.xlane.xlu1 %1989 }
 0xcb9   :  { %3212 = vrcp.f32 %v1999_v31 }
 0xcba   :  { %2886 = vmatmul.msk.f32.vlgmr.msrb.gmra.mxu1 %vm205_vm1, %v2029_v28 }
 0xcbf   :  { %v3213_v41 = vpop.eup %3212 }
 0xcc0   :  { %v2037_v13 = vmul.f32 %v3213_v41, %v4344_v4  ;;  %v1978_v63 = vpop.xlane.xlu0 %1977 }
 0xcc1   :  { %3214 = vrcp.f32 %v1978_v63 }
 0xcc2   :  { %2894 = vmatmul.msk.f32.vlgmr.msra.gmra.mxu2 %vm205_vm1, %v2037_v13 }
 0xcc7   :  { %v3215_v59 = vpop.eup %3214 }
 0xcc8   :  { %v2030_v0 = vmul.f32 %v3215_v59, %v4352_v9 }
 0xcca   :  { %2887 = vmatmul.msk.f32.gmra.mxu1 %vm205_vm1, %v2030_v0  ;;  %v2315_v0 = vld [vmem:[%s4621_s10 + $0x10] sm:$0xff] }
 0xcce   :  { %v2002_v58 = vpop.xlane.xlu2 %2001 }
 0xccf   :  { %3216 = vrcp.f32 %v2002_v58  ;;  %v2313_v58 = vld [vmem:[%s4621_s10] sm:$0xff] }
 0xcd0   :  { %3218 = vrcp.f32 %v1987_v48  ;;  %v2316_v48 = vld [vmem:[%s4621_s10 + $0x18] sm:$0xff] }
 0xcd5   :  { %v3217_v46 = vpop.eup %3216 }
 0xcd6   :  { %v3042_v23 = vpop.permute.xlu2 %3041  ;;  %v2005_v61 = vpop.xlane.xlu1 %2004  ;;  %v2038_v32 = vmul.f32 %v3217_v46, %v4359_v43 }
 0xcd7   :  { %v3219_v4 = vpop.eup %3218  ;;  %v3043_v1 = vunpack.i.l.bf16 %v3042_v23  ;;  %3220 = vrcp.f32 %v2005_v61  ;;  %v1981_v60 = vpop.xlane.xlu0 %1980  ;;  %v3044_v9 = vunpack.i.h.bf16 %v3042_v23 }
 0xcd8   :  { %3222 = vrcp.f32 %v1981_v60  ;;  %2895 = vmatmul.msk.f32.gmra.mxu2 %vm205_vm1, %v2038_v32  ;;  %v2033_v51 = vmul.f32 %v3219_v4, %v4333_v11 }
 0xcd9   :  { %3224 = vrcp.f32 %v1990_v56  ;;  %2185 = vmatpush.msrb.mxu0 %v3043_v1  ;;  %v2314_v56 = vld [vmem:[%s4621_s10 + $0x8] sm:$0xff] }
 0xcdb   :  { %2186 = vmatpush.msrb.mxu0 %v3044_v9 }
 0xcdc   :  { %2890 = vmatmul.msk.f32.vlgmr.msrb.gmra.mxu0 %vm205_vm1, %v2033_v51 }
 0xcdd   :  { %v3221_v6 = vpop.eup %3220 }
 0xcde   :  { %v3223_v16 = vpop.eup %3222  ;;  %v1996_v37 = vpop.xlane.xlu1 %1995  ;;  %v2039_v43 = vmul.f32 %v3221_v6, %v4365_v36 }
 0xcdf   :  { %v3225_v17 = vpop.eup %3224  ;;  %v1963_v49 = vpop.xlane.xlu0 %1962  ;;  %v2031_v42 = vmul.f32 %v3223_v16, %v4367_v47 }
 0xce0   :  { %2896 = vmatmul.msk.f32.gmra.mxu2 %vm205_vm1, %v2039_v43  ;;  %v2034_v7 = vmul.f32 %v3225_v17, %v4346_v19 }
 0xce1   :  { %2888 = vmatmul.msk.f32.gmra.mxu1 %vm205_vm1, %v2031_v42 }
 0xce4   :  { %2891 = vmatmul.msk.f32.gmra.mxu0 %vm205_vm1, %v2034_v7 }
 0xce6   :  { %v2008_v11 = vpop.xlane.xlu1 %2007 }
 0xce7   :  { %3226 = vrcp.f32 %v2008_v11  ;;  %v1984_v53 = vpop.xlane.xlu0 %1983 }
 0xce8   :  { %3228 = vrcp.f32 %v1984_v53 }
 0xce9   :  { %3230 = vrcp.f32 %v1963_v49 }
 0xced   :  { %v3227_v57 = vpop.eup %3226 }
 0xcee   :  { %v3229_v14 = vpop.eup %3228  ;;  %v2040_v36 = vmul.f32 %v3227_v57, %v4385_v45 }
 0xcef   :  { %v2032_v2 = vmul.f32 %v3229_v14, %v4383_v15  ;;  %v3231_v62 = vpop.eup %3230 }
 0xcf0   :  { %2897 = vmatmul.msk.f32.gmra.mxu2 %vm205_vm1, %v2040_v36  ;;  %v2025_v22 = vmul.f32 %v3231_v62, %v4377_v8 }
 0xcf1   :  { %2889 = vmatmul.msk.f32.gmra.mxu1 %vm205_vm1, %v2032_v2 }
 0xcfa   :  { %v3052_v19 = vpop.permute.xlu0 %3051 }
 0xcfb   :  { %v3053_v18 = vunpack.i.l.bf16 %v3052_v19  ;;  %v3054_v21 = vunpack.i.h.bf16 %v3052_v19 }
 0xcfe   :  { %v3047_v47 = vpop.permute.xlu1 %3046 }
 0xcff   :  { %v3048_v12 = vunpack.i.l.bf16 %v3047_v47  ;;  %v3049_v3 = vunpack.i.h.bf16 %v3047_v47 }
 0xd01   :  { %2077 = vmatpush.msra.mxu3 %v3048_v12 }
 0xd03   :  { %2078 = vmatpush.msra.mxu3 %v3049_v3 }
 0xd05   :  { %2079 = vmatpush.msra.mxu3 %v3053_v18 }
 0xd07   :  { %2080 = vmatpush.msra.mxu3 %v3054_v21 }
 0xd08   :  { %2882 = vmatmul.msk.f32.vlgmr.msra.gmra.mxu3 %vm205_vm1, %v2025_v22  ;;  %v3070_v22 = vld [vmem:[%s4622_s7] ss:$0 sm:$0xff] }
 0xd09   :  { %2341 = vmatpush.msrb.mxu3 %v2316_v48 }
 0xd0b   :  { %2342 = vmatpush.msrb.mxu3 %v2315_v0 }
 0xd0d   :  { %2343 = vmatpush.msrb.mxu3 %v2314_v56 }
 0xd0f   :  { %v1993_v15 = vpop.xlane.xlu2 %1992  ;;  %2344 = vmatpush.msrb.mxu3 %v2313_v58 }
 0xd10   :  { %3232 = vrcp.f32 %v1993_v15 }
 0xd11   :  { %3234 = vrcp.f32 %v1996_v37 }
 0xd16   :  { %v3233_v45 = vpop.eup %3232 }
 0xd17   :  { %v1966_v29 = vpop.xlane.xlu2 %1965  ;;  %v2035_v44 = vmul.f32 %v3233_v45, %v4399_v10  ;;  %v3235_v24 = vpop.eup %3234 }
 0xd18   :  { %3236 = vrcp.f32 %v1966_v29  ;;  %v2036_v50 = vmul.f32 %v3235_v24, %v4374_v55 }
 0xd19   :  { %2892 = vmatmul.msk.f32.gmra.mxu0 %vm205_vm1, %v2035_v44 }
 0xd1e   :  { %v3237_v38 = vpop.eup %3236 }
 0xd1f   :  { %v2026_v40 = vmul.f32 %v3237_v38, %v4403_v52 }
 0xd21   :  { %2883 = vmatmul.msk.f32.gmra.mxu3 %vm205_vm1, %v2026_v40  ;;  %2893 = vmatmul.msk.f32.gmra.mxu0 %vm205_vm1, %v2036_v50 }
 0xd25   :  { %v1969_v8 = vpop.xlane.xlu0 %1968 }
 0xd26   :  { %3238 = vrcp.f32 %v1969_v8 }
 0xd29   :  { %v1972_v33 = vpop.xlane.xlu1 %1971 }
 0xd2a   :  { %3240 = vrcp.f32 %v1972_v33 }
 0xd2c   :  { %v3239_v35 = vpop.eup %3238 }
 0xd2d   :  { %v2027_v10 = vmul.f32 %v3239_v35, %v4409_v30 }
 0xd2f   :  { %2884 = vmatmul.msk.f32.gmra.mxu3 %vm205_vm1, %v2027_v10 }
 0xd30   :  { %v3241_v27 = vpop.eup %3240 }
 0xd31   :  { %v2028_v25 = vmul.f32 %v3241_v27, %v4413_v39 }
 0xd37   :  { %2885 = vmatmul.msk.f32.gmra.mxu3 %vm205_vm1, %v2028_v25  ;;  %v2135_v52 = vpop.f32.mrf.mxu1 }
 0xd38   :  { %2257 = vrot.lane.b32.xlu2 %v2135_v52, %s3336_s22 }
 0xd45   :  { %v2241_v31 = vpop.f32.mrf.mxu2 }
 0xd47   :  { %v2138_v55 = vpop.f32.mrf.mxu1 }
 0xd48   :  { %2259 = vrot.lane.b32.xlu0 %v2138_v55, %s3336_s22 }
 0xd59   :  { %v2188_v28 = vpop.f32.mrf.mxu0 }
 0xd5a   :  { %2273 = vrot.lane.b32.xlu2 %v2188_v28, %s3337_s23 }
 0xd5b   :  { %v2244_v41 = vpop.f32.mrf.mxu2 }
 0xd5e   :  { %v2141_v39 = vpop.f32.mrf.mxu1 }
 0xd61   :  { %v2191_v30 = vpop.f32.mrf.mxu0 }
 0xd62   :  { %2275 = vrot.lane.b32.xlu1 %v2191_v30, %s3337_s23  ;;  %2289 = vrot.lane.b32.xlu2 %v2241_v31, %s3338_s26 }
 0xd63   :  { %v2247_v13 = vpop.f32.mrf.mxu2 }
 0xd6a   :  { %2261 = vrot.lane.b32.xlu2 %v2141_v39, %s3336_s22 }
 0xd6e   :  { %v2144_v46 = vpop.f32.mrf.mxu1 }
 0xd72   :  { %2291 = vrot.lane.b32.xlu2 %v2244_v41, %s3338_s26 }
 0xd73   :  { %v2250_v63 = vpop.f32.mrf.mxu2 }
 0xd7a   :  { %2293 = vrot.lane.b32.xlu2 %v2247_v13, %s3338_s26 }
 0xd82   :  { %2295 = vrot.lane.b32.xlu2 %v2250_v63, %s3338_s26 }
 0xd8b   :  { %v2082_v4 = vpop.f32.mrf.mxu3 }
 0xd92   :  { %v2258_v61 = vpop.permute.xlu2 %2257 }
 0xd93   :  { %v2301_v1 = vsel %vm446_vm0, %v2082_v4, %v2258_v61  ;;  %v2477_v4 = vld [vmem:[%s4623_s11 + $0x18] sm:$0xff] }
 0xd94   :  { %2506 = vmatpush.msra.mxu1 %v2477_v4 }
 0xd96   :  { %v2194_v59 = vpop.f32.mrf.mxu0 }
 0xd97   :  { %2277 = vrot.lane.b32.xlu0 %v2194_v59, %s3337_s23 }
 0xd9e   :  { %v2197_v23 = vpop.f32.mrf.mxu0 }
 0xd9f   :  { %2279 = vrot.lane.b32.xlu1 %v2197_v23, %s3337_s23  ;;  %2263 = vrot.lane.b32.xlu0 %v2144_v46, %s3336_s22 }
 0xda4   :  { %v2085_v37 = vpop.f32.mrf.mxu3 }
 0xdb2   :  { %v2088_v11 = vpop.f32.mrf.mxu3 }
 0xdb4   :  { %v2274_v32 = vpop.permute.xlu2 %2273 }
 0xdb5   :  { %v2305_v60 = vsel %vm1135_vm14, %v2301_v1, %v2274_v32  ;;  %v2476_v1 = vld [vmem:[%s4623_s11 + $0x10] sm:$0xff] }
 0xdb6   :  { %2507 = vmatpush.msra.mxu1 %v2476_v1 }
 0xdba   :  { %v2260_v16 = vpop.permute.xlu0 %2259  ;;  %v2091_v47 = vpop.f32.mrf.mxu3 }
 0xdbb   :  { %v2302_v43 = vsel %vm446_vm0, %v2085_v37, %v2260_v16 }
 0xdbc   :  { %v2290_v9 = vpop.permute.xlu2 %2289 }
 0xdbd   :  { %v2309_v51 = vsel %vm1140_vm15, %v2305_v60, %v2290_v9  ;;  %v2475_v60 = vld [vmem:[%s4623_s11 + $0x8] sm:$0xff]  ;;  %v2474_v9 = vld [vmem:[%s4623_s11] sm:$0xff] }
 0xdbe   :  { %2898 = vmatmul.msk.f32.vlgmr.msrb.gmra.mxu3 %vm205_vm1, %v2309_v51  ;;  %2508 = vmatpush.msra.mxu1 %v2475_v60  ;;  %v2570_v60 = vld [vmem:[%s4626_s18 + $0x58] sm:$0xff] }
 0xdc0   :  { %2509 = vmatpush.msra.mxu1 %v2474_v9  ;;  %v2569_v9 = vld [vmem:[%s4626_s18 + $0x50] sm:$0xff] }
 0xdc4   :  { %v2262_v6 = vpop.permute.xlu2 %2261 }
 0xdc5   :  { %v2303_v53 = vsel %vm446_vm0, %v2088_v11, %v2262_v6  ;;  %v4520_v11 = vld [vmem:[%s4624_s16] ss:$0 sm:$0xff] }
 0xdcc   :  { %v2292_v49 = vpop.permute.xlu2 %2291 }
 0xdd4   :  { %v2276_v17 = vpop.permute.xlu1 %2275  ;;  %v2294_v57 = vpop.permute.xlu2 %2293 }
 0xdd5   :  { %v2306_v42 = vsel %vm1135_vm14, %v2302_v43, %v2276_v17 }
 0xdd6   :  { %v2310_v7 = vsel %vm1140_vm15, %v2306_v42, %v2292_v49 }
 0xdd7   :  { %2899 = vmatmul.msk.f32.gmra.mxu3 %vm205_vm1, %v2310_v7 }
 0xddc   :  { %v2296_v62 = vpop.permute.xlu2 %2295 }
 0xe09   :  { %v2278_v14 = vpop.permute.xlu0 %2277 }
 0xe0a   :  { %v2307_v36 = vsel %vm1135_vm14, %v2303_v53, %v2278_v14  ;;  %v4523_v14 = vld [vmem:[%s4625_s15] ss:$0 sm:$0xff] }
 0xe0b   :  { %v2311_v2 = vsel %vm1140_vm15, %v2307_v36, %v2294_v57 }
 0xe0c   :  { %2900 = vmatmul.msk.f32.gmra.mxu3 %vm205_vm1, %v2311_v2 }
 0xe11   :  { %v2280_v12 = vpop.permute.xlu1 %2279  ;;  %v2264_v19 = vpop.permute.xlu0 %2263 }
 0xe12   :  { %v2304_v3 = vsel %vm446_vm0, %v2091_v47, %v2264_v19 }
 0xe13   :  { %v2308_v18 = vsel %vm1135_vm14, %v2304_v3, %v2280_v12 }
 0xe14   :  { %v2312_v21 = vsel %vm1140_vm15, %v2308_v18, %v2296_v62 }
 0xe15   :  { %2901 = vmatmul.msk.f32.gmra.mxu3 %vm205_vm1, %v2312_v21 }
 0xe41   :  { %v2346_v15 = vpop.f32.mrf.mxu3 }
 0xe42   :  { %v2358_v45 = vadd.f32 %v2346_v15, %v4080_v54 }
 0xe44   :  { %v2366_v29 = vadd.f32 %v3070_v22, %v2358_v45 }
 0xe46   :  { %v2372_v44 = vsel %vm205_vm1, %v2366_v29, 0.0 }
 0xe47   :  { %2373 = vadd.xlane.f32.xlu0 %v2372_v44 }
 0xe5a   :  { %v2349_v24 = vpop.f32.mrf.mxu3 }
 0xe5b   :  { %v2359_v38 = vadd.f32 %v2349_v24, %v4085_v5 }
 0xe5d   :  { %v4485_v40 = vadd.f32 %v3070_v22, %v2359_v38 }
 0xe5f   :  { %v2375_v50 = vsel %vm205_vm1, %v4485_v40, 0.0 }
 0xe60   :  { %2376 = vadd.xlane.f32.xlu1 %v2375_v50 }
 0xe8f   :  { %v2352_v8 = vpop.f32.mrf.mxu3 }
 0xe90   :  { %v2360_v33 = vadd.f32 %v2352_v8, %v4090_v26 }
 0xe92   :  { %v2368_v35 = vadd.f32 %v3070_v22, %v2360_v33  ;;  %v2574_v33 = vld [vmem:[%s4626_s18 + $0x78] sm:$0xff] }
 0xe93   :  { %2575 = vmatpush.msra.mxu0 %v2574_v33 }
 0xe94   :  { %v2378_v10 = vsel %vm205_vm1, %v2368_v35, 0.0 }
 0xe95   :  { %2379 = vadd.xlane.f32.xlu2 %v2378_v10  ;;  %v2572_v10 = vld [vmem:[%s4626_s18 + $0x68] sm:$0xff] }
 0xe98   :  { %v2355_v54 = vpop.f32.mrf.mxu3 }
 0xe99   :  { %v2361_v27 = vadd.f32 %v2355_v54, %v4095_v20 }
 0xe9b   :  { %v4492_v25 = vadd.f32 %v3070_v22, %v2361_v27 }
 0xe9d   :  { %v2381_v5 = vsel %vm205_vm1, %v4492_v25, 0.0 }
 0xe9e   :  { %2382 = vadd.xlane.f32.xlu0 %v2381_v5  ;;  %v2571_v5 = vld [vmem:[%s4626_s18 + $0x60] sm:$0xff] }
 0xeba   :  { %v2374_v52 = vpop.xlane.xlu0 %2373 }
 0xebb   :  { %v2384_v55 = vmul.f32 %v2374_v52, %v3541_v34 }
 0xebd   :  { %v2388_v28 = vsub.f32 %v2366_v29, %v2384_v55 }
 0xebf   :  { %v2392_v31 = vmul.f32 %v2388_v28, %v2388_v28 }
 0xec1   :  { %v2396_v26 = vsel %vm205_vm1, %v2392_v31, 0.0 }
 0xec2   :  { %2397 = vadd.xlane.f32.xlu1 %v2396_v26 }
 0xed3   :  { %v2377_v30 = vpop.xlane.xlu1 %2376 }
 0xed4   :  { %v2385_v39 = vmul.f32 %v2377_v30, %v3541_v34 }
 0xed6   :  { %v2389_v41 = vsub.f32 %v4485_v40, %v2385_v39 }
 0xed8   :  { %v2393_v20 = vmul.f32 %v2389_v41, %v2389_v41 }
 0xeda   :  { %v2399_v13 = vsel %vm205_vm1, %v2393_v20, 0.0 }
 0xedb   :  { %2400 = vadd.xlane.f32.xlu2 %v2399_v13 }
 0xf08   :  { %v2380_v63 = vpop.xlane.xlu2 %2379 }
 0xf09   :  { %v2386_v48 = vmul.f32 %v2380_v63, %v3541_v34 }
 0xf0b   :  { %v4502_v59 = vsub.f32 %v2368_v35, %v2386_v48  ;;  %v2573_v35 = vld [vmem:[%s4626_s18 + $0x70] sm:$0xff] }
 0xf0c   :  { %2576 = vmatpush.msra.mxu0 %v2573_v35 }
 0xf0d   :  { %v2394_v0 = vmul.f32 %v4502_v59, %v4502_v59 }
 0xf0e   :  { %2577 = vmatpush.msra.mxu0 %v2572_v10 }
 0xf0f   :  { %v2402_v56 = vsel %vm205_vm1, %v2394_v0, 0.0 }
 0xf10   :  { %2403 = vadd.xlane.f32.xlu0 %v2402_v56  ;;  %2578 = vmatpush.msra.mxu0 %v2571_v5 }
 0xf11   :  { %v2383_v58 = vpop.xlane.xlu0 %2382 }
 0xf12   :  { %v2387_v46 = vmul.f32 %v2383_v58, %v3541_v34  ;;  %2579 = vmatpush.msra.mxu0 %v2570_v60 }
 0xf14   :  { %v4509_v23 = vsub.f32 %v4492_v25, %v2387_v46  ;;  %2580 = vmatpush.msra.mxu0 %v2569_v9 }
 0xf16   :  { %v2395_v61 = vmul.f32 %v4509_v23, %v4509_v23 }
 0xf18   :  { %v2405_v32 = vsel %vm205_vm1, %v2395_v61, 0.0 }
 0xf19   :  { %2406 = vadd.xlane.f32.xlu1 %v2405_v32 }
 0xf35   :  { %v2398_v51 = vpop.xlane.xlu1 %2397 }
 0xf36   :  { %v2408_v6 = vmul.f32 %v2398_v51, %v3541_v34  ;;  %v2568_v51 = vld [vmem:[%s4626_s18 + $0x48] sm:$0xff] }
 0xf37   :  { %2581 = vmatpush.msra.mxu0 %v2568_v51 }
 0xf38   :  { %v2412_v16 = vadd.f32 1e-05, %v2408_v6  ;;  %v2567_v6 = vld [vmem:[%s4626_s18 + $0x40] sm:$0xff] }
 0xf39   :  { %2582 = vmatpush.msra.mxu0 %v2567_v6 }
 0xf3a   :  { %3242 = vrsqrt.f32 %v2412_v16  ;;  %vm2422_vm4 = vweird.f32 %v2412_v16 }
 0xf40   :  { %v3243_v37 = vpop.eup %3242 }
 0xf41   :  { %v2417_v43 = vmul.f32 %v3243_v37, %v2412_v16  ;;  %vm2423_vm0 = vweird.f32 %v3243_v37  ;;  %v2566_v16 = vld [vmem:[%s4626_s18 + $0x38] sm:$0xff] }
 0xf42   :  { %vm2424_vm7 = vmor %vm2422_vm4, %vm2423_vm0  ;;  %2583 = vmatpush.msra.mxu0 %v2566_v16 }
 0xf43   :  { %v2418_v17 = vmul.f32 %v3243_v37, %v2417_v43  ;;  %v2563_v43 = vld [vmem:[%s4626_s18 + $0x20] sm:$0xff] }
 0xf45   :  { %v2419_v49 = vmul.f32 0.5, %v2418_v17  ;;  %v2562_v17 = vld [vmem:[%s4626_s18 + $0x18] sm:$0xff] }
 0xf47   :  { %v2420_v42 = vsub.f32 1.5, %v2419_v49  ;;  %v2561_v49 = vld [vmem:[%s4626_s18 + $0x10] sm:$0xff] }
 0xf49   :  { %v2421_v7 = vmul.f32 %v3243_v37, %v2420_v42  ;;  %v2560_v42 = vld [vmem:[%s4626_s18 + $0x8] sm:$0xff] }
 0xf4b   :  { %v2425_v53 = vsel %vm2424_vm7, %v3243_v37, %v2421_v7  ;;  %v2564_v37 = vld [vmem:[%s4626_s18 + $0x28] sm:$0xff]  ;;  %v2559_v7 = vld [vmem:[%s4626_s18] sm:$0xff] }
 0xf4c   :  { %v2456_v57 = vmul.f32 %v2425_v53, %v2388_v28 }
 0xf4e   :  { %v2463_v36 = vmul.f32 %v4520_v11, %v2456_v57  ;;  %v2401_v2 = vpop.xlane.xlu2 %2400 }
 0xf4f   :  { %v2409_v47 = vmul.f32 %v2401_v2, %v3541_v34 }
 0xf50   :  { %v2470_v12 = vadd.f32 %v4523_v14, %v2463_v36 }
 0xf51   :  { %v2413_v19 = vadd.f32 1e-05, %v2409_v47 }
 0xf52   :  { %2902 = vmatmul.msk.f32.vlgmr.msra.gmra.mxu1 %vm205_vm1, %v2470_v12 }
 0xf53   :  { %3244 = vrsqrt.f32 %v2413_v19  ;;  %vm2432_vm13 = vweird.f32 %v2413_v19 }
 0xf59   :  { %v3245_v3 = vpop.eup %3244 }
 0xf5a   :  { %v2427_v62 = vmul.f32 %v3245_v3, %v2413_v19  ;;  %vm2433_vm10 = vweird.f32 %v3245_v3 }
 0xf5b   :  { %vm2434_vm14 = vmor %vm2432_vm13, %vm2433_vm10  ;;  %vm2699_vm13 = vcmask 1040384  }
 0xf5c   :  { %v2428_v18 = vmul.f32 %v3245_v3, %v2427_v62 }
 0xf5e   :  { %v2429_v21 = vmul.f32 0.5, %v2428_v18 }
 0xf60   :  { %v2430_v22 = vsub.f32 1.5, %v2429_v21 }
 0xf62   :  { %v2431_v15 = vmul.f32 %v3245_v3, %v2430_v22 }
 0xf64   :  { %v2435_v45 = vsel %vm2434_vm14, %v3245_v3, %v2431_v15 }
 0xf65   :  { %v2457_v29 = vmul.f32 %v2435_v45, %v2389_v41 }
 0xf67   :  { %v2464_v44 = vmul.f32 %v4520_v11, %v2457_v29 }
 0xf69   :  { %v2471_v24 = vadd.f32 %v4523_v14, %v2464_v44 }
 0xf6b   :  { %2903 = vmatmul.msk.f32.gmra.mxu1 %vm205_vm1, %v2471_v24 }
 0xf83   :  { %v2404_v38 = vpop.xlane.xlu0 %2403 }
 0xf84   :  { %v2410_v50 = vmul.f32 %v2404_v38, %v3541_v34 }
 0xf86   :  { %v2414_v8 = vadd.f32 1e-05, %v2410_v50 }
 0xf88   :  { %3246 = vrsqrt.f32 %v2414_v8  ;;  %vm2442_vm2 = vweird.f32 %v2414_v8 }
 0xf8c   :  { %v2407_v54 = vpop.xlane.xlu1 %2406 }
 0xf8d   :  { %v2411_v27 = vmul.f32 %v2407_v54, %v3541_v34 }
 0xf8e   :  { %v3247_v52 = vpop.eup %3246 }
 0xf8f   :  { %v2437_v55 = vmul.f32 %v3247_v52, %v2414_v8  ;;  %v2415_v28 = vadd.f32 1e-05, %v2411_v27  ;;  %vm2443_vm15 = vweird.f32 %v3247_v52 }
 0xf90   :  { %vm2444_vm3 = vmor %vm2442_vm2, %vm2443_vm15 }
 0xf91   :  { %v2438_v31 = vmul.f32 %v3247_v52, %v2437_v55  ;;  %3248 = vrsqrt.f32 %v2415_v28  ;;  %vm2452_vm6 = vweird.f32 %v2415_v28 }
 0xf93   :  { %v2439_v26 = vmul.f32 0.5, %v2438_v31 }
 0xf95   :  { %v2440_v30 = vsub.f32 1.5, %v2439_v26 }
 0xf97   :  { %v3249_v39 = vpop.eup %3248  ;;  %v2441_v41 = vmul.f32 %v3247_v52, %v2440_v30 }
 0xf98   :  { %v2447_v20 = vmul.f32 %v3249_v39, %v2415_v28  ;;  %vm2453_vm5 = vweird.f32 %v3249_v39 }
 0xf99   :  { %v2445_v13 = vsel %vm2444_vm3, %v3247_v52, %v2441_v41  ;;  %vm2454_vm8 = vmor %vm2452_vm6, %vm2453_vm5 }
 0xf9a   :  { %v2448_v63 = vmul.f32 %v3249_v39, %v2447_v20  ;;  %v2458_v48 = vmul.f32 %v2445_v13, %v4502_v59 }
 0xf9c   :  { %v2449_v0 = vmul.f32 0.5, %v2448_v63  ;;  %v2465_v56 = vmul.f32 %v4520_v11, %v2458_v48 }
 0xf9e   :  { %v2450_v58 = vsub.f32 1.5, %v2449_v0  ;;  %v2472_v46 = vadd.f32 %v4523_v14, %v2465_v56 }
 0xfa0   :  { %v2451_v61 = vmul.f32 %v3249_v39, %v2450_v58  ;;  %2904 = vmatmul.msk.f32.gmra.mxu1 %vm205_vm1, %v2472_v46 }
 0xfa2   :  { %v2455_v32 = vsel %vm2454_vm8, %v3249_v39, %v2451_v61 }
 0xfa3   :  { %v2459_v59 = vmul.f32 %v2455_v32, %v4509_v23  ;;  %v2565_v23 = vld [vmem:[%s4626_s18 + $0x30] sm:$0xff] }
 0xfa4   :  { %2584 = vmatpush.msra.mxu0 %v2565_v23 }
 0xfa5   :  { %v2466_v4 = vmul.f32 %v4520_v11, %v2459_v59  ;;  %v3073_v11 = vld [vmem:[%s4627_s0] ss:$0 sm:$0xff] }
 0xfa6   :  { %2585 = vmatpush.msra.mxu0 %v2564_v37  ;;  %v3074_v59 = vld [vmem:[%s4628_s5] ss:$0 sm:$0xff] }
 0xfa7   :  { %v2473_v1 = vadd.f32 %v4523_v14, %v2466_v4 }
 0xfa8   :  { %2586 = vmatpush.msra.mxu0 %v2563_v43  ;;  %v2610_v43 = vld [vmem:[#allocation2] sm:$0x1] }
 0xfa9   :  { %2905 = vmatmul.msk.f32.gmra.mxu1 %vm205_vm1, %v2473_v1 }
 0xfaa   :  { %2587 = vmatpush.msra.mxu0 %v2562_v17  ;;  %v3339_v17 = vmov 0  }
 0xfab   :  { %3056 = vset.pattern.permute.xlu1 %v3339_v17  ;;  %3055 = vset.pattern.permute.xlu0 %v3339_v17 }
 0xfac   :  { %2588 = vmatpush.msra.mxu0 %v2561_v49  ;;  %v2651_v49 = vsub.f32 1.0, %v2610_v43 }
 0xfae   :  { %2589 = vmatpush.msra.mxu0 %v2560_v42 }
 0xfb0   :  { %2590 = vmatpush.msra.mxu0 %v2559_v7 }
 0xfcf   :  { %v2511_v53 = vpop.f32.mrf.mxu1 }
 0xfd0   :  { %v2512_v57 = vadd.f32 %v3073_v11, %v2511_v53 }
 0xfd2   :  { %v2527_v14 = vmul.f32 0.044715, %v2512_v57  ;;  %v2523_v3 = vmul.f32 0.5, %v2512_v57 }
 0xfd4   :  { %v2531_v36 = vmul.f32 %v2527_v14, %v2512_v57 }
 0xfd6   :  { %v2535_v2 = vmul.f32 %v2531_v36, %v2512_v57 }
 0xfd8   :  { %v2539_v47 = vadd.f32 %v2535_v2, %v2512_v57 }
 0xfda   :  { %v2543_v12 = vmul.f32 0.7978846, %v2539_v47 }
 0xfdc   :  { %3250 = vtanh.f32 %v2543_v12 }
 0xfe2   :  { %v3251_v19 = vpop.eup %3250 }
 0xfe3   :  { %v2551_v62 = vadd.f32 1.0, %v3251_v19 }
 0xfe5   :  { %v2555_v18 = vmul.f32 %v2551_v62, %v2523_v3 }
 0xfe7   :  { %2591 = vmatmul.f32.vlgmr.msra.gmra.mxu0 %v2555_v18 }
 0xfe8   :  { %v2514_v21 = vpop.f32.mrf.mxu1 }
 0xfe9   :  { %v2515_v22 = vadd.f32 %v3073_v11, %v2514_v21 }
 0xfeb   :  { %v2528_v15 = vmul.f32 0.044715, %v2515_v22  ;;  %v2524_v50 = vmul.f32 0.5, %v2515_v22 }
 0xfed   :  { %v2532_v45 = vmul.f32 %v2528_v15, %v2515_v22  ;;  %v2703_v15 = vld [vmem:[%s3512_s4 + $0x10] sm:$0xff] }
 0xfef   :  { %v2536_v29 = vmul.f32 %v2532_v45, %v2515_v22  ;;  %v2702_v45 = vld [vmem:[%s3512_s4 + $0x8] sm:$0xff] }
 0xff1   :  { %v2540_v44 = vadd.f32 %v2536_v29, %v2515_v22  ;;  %v2704_v22 = vld [vmem:[%s3512_s4 + $0x18] sm:$0xff] }
 0xff2   :  { %2724 = vmatpush.msrb.mxu2 %v2704_v22 }
 0xff3   :  { %v2544_v24 = vmul.f32 0.7978846, %v2540_v44 }
 0xff4   :  { %2725 = vmatpush.msrb.mxu2 %v2703_v15 }
 0xff5   :  { %3252 = vtanh.f32 %v2544_v24 }
 0xff6   :  { %2726 = vmatpush.msrb.mxu2 %v2702_v45 }
 0xffb   :  { %v3253_v38 = vpop.eup %3252 }
 0xffc   :  { %v2552_v8 = vadd.f32 1.0, %v3253_v38  ;;  %v2701_v38 = vld [vmem:[%s3512_s4] sm:$0xff]  ;;  %s3340_s4 = smov [#allocation3]  }
 0xffd   :  { %2727 = vmatpush.msrb.mxu2 %v2701_v38  ;;  %s2738_s17 = sshll.u32 %s3340_s4, 4  ;;  %s2739_s17 = int_to_ptr.vmem [resolvable:$true] %s2738_s17 }
 0xffe   :  { %v2556_v33 = vmul.f32 %v2552_v8, %v2524_v50 }
0x1000   :  { %2593 = vmatmul.f32.gmra.mxu0 %v2556_v33 }
0x101d   :  { %v2517_v35 = vpop.f32.mrf.mxu1 }
0x101e   :  { %v2518_v10 = vadd.f32 %v3073_v11, %v2517_v35 }
0x1020   :  { %v2529_v54 = vmul.f32 0.044715, %v2518_v10  ;;  %v2525_v13 = vmul.f32 0.5, %v2518_v10 }
0x1022   :  { %v2533_v27 = vmul.f32 %v2529_v54, %v2518_v10  ;;  %v3075_v54 = vld [vmem:[%s4629_s9] ss:$0 sm:$0xff] }
0x1024   :  { %v2537_v5 = vmul.f32 %v2533_v27, %v2518_v10 }
0x1026   :  { %v2520_v52 = vpop.f32.mrf.mxu1  ;;  %v2541_v55 = vadd.f32 %v2537_v5, %v2518_v10 }
0x1027   :  { %v2521_v28 = vadd.f32 %v3073_v11, %v2520_v52 }
0x1028   :  { %v2545_v31 = vmul.f32 0.7978846, %v2541_v55  ;;  %v3076_v55 = vld [vmem:[%s4630_s13] ss:$0 sm:$0xff] }
0x1029   :  { %v2530_v26 = vmul.f32 0.044715, %v2521_v28  ;;  %v2526_v58 = vmul.f32 0.5, %v2521_v28 }
0x102a   :  { %3254 = vtanh.f32 %v2545_v31 }
0x102b   :  { %v2534_v30 = vmul.f32 %v2530_v26, %v2521_v28 }
0x102d   :  { %v2538_v39 = vmul.f32 %v2534_v30, %v2521_v28 }
0x102f   :  { %v2542_v41 = vadd.f32 %v2538_v39, %v2521_v28 }
0x1030   :  { %v3255_v20 = vpop.eup %3254 }
0x1031   :  { %v2553_v63 = vadd.f32 1.0, %v3255_v20  ;;  %v2546_v48 = vmul.f32 0.7978846, %v2542_v41 }
0x1033   :  { %v2557_v0 = vmul.f32 %v2553_v63, %v2525_v13  ;;  %3256 = vtanh.f32 %v2546_v48 }
0x1035   :  { %2596 = vmatmul.f32.gmra.mxu0 %v2557_v0 }
0x1039   :  { %v3257_v56 = vpop.eup %3256 }
0x103a   :  { %v2554_v46 = vadd.f32 1.0, %v3257_v56 }
0x103c   :  { %v2558_v61 = vmul.f32 %v2554_v46, %v2526_v58 }
0x103e   :  { %2598 = vmatmul.f32.gmra.mxu0 %v2558_v61 }
0x1064   :  { %v2592_v32 = vpop.f32.mrf.mxu0 }
0x107d   :  { %v2594_v4 = vpop.f32.mrf.mxu0 }
0x107e   :  { %v2602_v1 = vadd.f32 %v2594_v4, %v4485_v40 }
0x1080   :  { %v2608_v60 = vadd.f32 %v3074_v59, %v2602_v1 }
0x1082   :  { %v2614_v9 = vsel %vm2613_vm9, %v2608_v60, 0.0 }
0x1083   :  { %2615 = vadd.xlane.f32.xlu2 %v2614_v9 }
0x10b2   :  { %v2597_v51 = vpop.f32.mrf.mxu0 }
0x10bb   :  { %v2599_v6 = vpop.f32.mrf.mxu0 }
0x10bc   :  { %v2603_v16 = vadd.f32 %v2599_v6, %v4492_v25  ;;  %v3077_v6 = vld [vmem:[%s3517_s6] ss:$0 sm:$0xff] }
0x10be   :  { %v2609_v23 = vadd.f32 %v3074_v59, %v2603_v16 }
0x10c0   :  { %v2663_v37 = vsel %vm2613_vm9, %v2609_v23, 0.0 }
0x10c1   :  { %2664 = vadd.xlane.f32.xlu0 %v2663_v37 }
0x10d5   :  { %2654 = vperm.xlu0 %3055, %v2651_v49  }
0x10f6   :  { %v2616_v40 = vpop.xlane.xlu2 %2615 }
0x10f7   :  { %v2617_v42 = vmul.f32 %v2616_v40, %v3541_v34 }
0x10f9   :  { %v2618_v7 = vsub.f32 %v2608_v60, %v2617_v42 }
0x10fb   :  { %v2619_v11 = vmul.f32 %v2618_v7, %v2618_v7 }
0x10fd   :  { %v2620_v53 = vsel %vm2613_vm9, %v2619_v11, 0.0 }
0x10fe   :  { %2621 = vadd.xlane.f32.xlu1 %v2620_v53 }
0x1117   :  { %2646 = vperm.xlu1 %3056, %v2610_v43  }
0x1134   :  { %v2665_v25 = vpop.xlane.xlu0 %2664 }
0x1135   :  { %v2666_v57 = vmul.f32 %v2665_v25, %v3541_v34 }
0x1137   :  { %v2667_v14 = vsub.f32 %v2609_v23, %v2666_v57 }
0x1139   :  { %v2668_v36 = vmul.f32 %v2667_v14, %v2667_v14 }
0x113b   :  { %v2669_v2 = vsel %vm2613_vm9, %v2668_v36, 0.0 }
0x113c   :  { %2670 = vadd.xlane.f32.xlu2 %v2669_v2 }
0x1147   :  { %v2655_v28 = vpop.permute.xlu0 %2654 }
0x1148   :  { %v2657_v30 = vperm.slane %v2655_v28, 0 }
0x1171   :  { %v2622_v47 = vpop.xlane.xlu1 %2621 }
0x1172   :  { %v2623_v12 = vmul.f32 %v2622_v47, %v3541_v34 }
0x1174   :  { %v2624_v19 = vadd.f32 1e-05, %v2623_v12 }
0x1176   :  { %3258 = vrsqrt.f32 %v2624_v19  ;;  %vm2631_vm12 = vweird.f32 %v2624_v19 }
0x117c   :  { %v3259_v3 = vpop.eup %3258 }
0x117d   :  { %v2626_v62 = vmul.f32 %v3259_v3, %v2624_v19  ;;  %vm2632_vm11 = vweird.f32 %v3259_v3 }
0x117e   :  { %vm2633_vm0 = vmor %vm2631_vm12, %vm2632_vm11 }
0x117f   :  { %v2627_v18 = vmul.f32 %v3259_v3, %v2626_v62 }
0x1181   :  { %v2628_v21 = vmul.f32 0.5, %v2627_v18 }
0x1183   :  { %v2629_v29 = vsub.f32 1.5, %v2628_v21 }
0x1185   :  { %v2630_v8 = vmul.f32 %v3259_v3, %v2629_v29 }
0x1187   :  { %v2634_v33 = vsel %vm2633_vm0, %v3259_v3, %v2630_v8 }
0x1188   :  { %v2635_v10 = vmul.f32 %v2634_v33, %v2618_v7 }
0x1189   :  { %v2647_v41 = vpop.permute.xlu1 %2646 }
0x118a   :  { %v2639_v52 = vmul.f32 %v3075_v54, %v2635_v10  ;;  %v2649_v48 = vperm.slane %v2647_v41, 0 }
0x118c   :  { %v2643_v26 = vadd.f32 %v3076_v55, %v2639_v52 }
0x118e   :  { %v2658_v13 = vmul.f32 %v2657_v30, %v2643_v26  ;;  %v2650_v46 = vmul.f32 %v2649_v48, %v2643_v26 }
0x1190   :  { %v2660_v56 = vrot.slane %v2658_v13, 7 }
0x1192   :  { %v2662_v32 = vadd.f32 %v2660_v56, %v2650_v46 }
0x1194   :  { %v2694_v60 = vrot.slane %v2662_v32, 2 }
0x11af   :  { %v2671_v44 = vpop.xlane.xlu2 %2670 }
0x11b0   :  { %v2672_v24 = vmul.f32 %v2671_v44, %v3541_v34 }
0x11b2   :  { %v2673_v50 = vadd.f32 1e-05, %v2672_v24 }
0x11b4   :  { %3260 = vrsqrt.f32 %v2673_v50  ;;  %vm2680_vm7 = vweird.f32 %v2673_v50 }
0x11ba   :  { %v3261_v35 = vpop.eup %3260 }
0x11bb   :  { %v2675_v27 = vmul.f32 %v3261_v35, %v2673_v50  ;;  %vm2681_vm4 = vweird.f32 %v3261_v35 }
0x11bc   :  { %vm2682_vm10 = vmor %vm2680_vm7, %vm2681_vm4 }
0x11bd   :  { %v2676_v5 = vmul.f32 %v3261_v35, %v2675_v27 }
0x11bf   :  { %v2677_v34 = vmul.f32 0.5, %v2676_v5 }
0x11c1   :  { %v2678_v31 = vsub.f32 1.5, %v2677_v34 }
0x11c3   :  { %v2679_v39 = vmul.f32 %v3261_v35, %v2678_v31 }
0x11c5   :  { %v2683_v20 = vsel %vm2682_vm10, %v3261_v35, %v2679_v39 }
0x11c6   :  { %v2684_v63 = vmul.f32 %v2683_v20, %v2667_v14 }
0x11c8   :  { %v2685_v0 = vmul.f32 %v3075_v54, %v2684_v63 }
0x11ca   :  { %v2686_v58 = vadd.f32 %v3076_v55, %v2685_v0 }
0x11cc   :  { %v2688_v61 = vmul.f32 %v2686_v58, %v2657_v30  ;;  %v2687_v59 = vmul.f32 %v2686_v58, %v2649_v48 }
0x11ce   :  { %v2690_v4 = vrot.slane %v2688_v61, 7 }
0x11d0   :  { %v2692_v1 = vadd.f32 %v2690_v4, %v2687_v59 }
0x11d2   :  { %v2697_v9 = vrot.slane %v2692_v1, 1 }
0x11d4   :  { %v2700_v51 = vsel %vm2699_vm13, %v2694_v60, %v2697_v9 }
0x11d5   :  { %2906 = vmatmul.msk.f32.vlgmr.msrb.gmra.mxu2 %vm205_vm1, %v2700_v51 }
0x1258   :  { %v2729_v16 = vpop.f32.mrf.mxu2 }
0x1259   :  { %v2730_v23 = vadd.f32 %v3077_v6, %v2729_v16 }
0x125b   :  { %2732 = vst [vmem:[#allocation3] sm:$0x3] %v2730_v23 }
0x125c   :  { %3286 = shalt.err (!%p3283_p4)
}
0x125d   :  { %2743 = dma.vmem_to_hbm [thread:$0]  %s2739_s17, 32, %s2741_s21, [#allocation4]  }
0x125e   :  { %3287 = dma.done.wait [#allocation4], 32  }
0x125f   :  { %3288 = vsyncadd [#allocation4], 4294967264 }
0x1260   :  { %2748 = vsyncpa [#allocation4], 1 }

</bundles_post_ra>
